<compile_context>
chip_gen: v5e
topology: v5e:2x2
jax: 0.10.0
libtpu: 0.0.40
codegen_flags: <defaults>
</compile_context>

<pallas_src>
import functools

import jax
import jax.numpy as jnp
from jax.experimental import pallas as pl
from jax.experimental.pallas import tpu as pltpu


# ---------------------------------------------------------------------------
# Fused forward kernel.  One grid step handles TM rows (all N columns).
# ---------------------------------------------------------------------------
def _fused_forward_kernel(x_ref, sp_ref, xn_ref, wd_ref, bd_ref,
                          z_ref, de_ref, hr_ref,
                          *, d, k, scale, n, tm, col_bits, agg_dtype):
    """x_ref  : (N, D)         f32 spot features (queries + keys)
       sp_ref : (N, 2)         f32 spot coordinates
       xn_ref : (scale, N, D)  f32 super-res neighbor features
       wd_ref : (D, out)       f32 BN-folded decoder weight
       bd_ref : (1, out)       f32 BN-folded decoder bias
       z_ref  : (TM, D)        x1_lr rows of this block
       de_ref : (TM, out)      decoded rows of this block
       hr_ref : (TM, scale*D)  x1_hr rows of this block (torch column order)
    """
    f32 = jnp.float32
    i32 = jnp.int32

    r0 = pl.multiple_of(pl.program_id(0) * tm, 8)        # first row of block
    x_all = x_ref[...]                                   # (n, d)
    x_rows = x_ref[pl.ds(r0, tm), :]                     # (tm, d)
    sp_rows = sp_ref[pl.ds(r0, tm), :]                   # (tm, 2)

    # ---- pairwise distances (kept in f32: neighbor selection stays exact) --
    g = jax.lax.dot_general(x_rows, x_all, (((1,), (1,)), ((), ())),
                            preferred_element_type=f32)           # (tm, n) MXU
    sq_rows = jnp.sum(x_rows * x_rows, axis=-1, keepdims=True)     # (tm, 1)
    sq_all_t = jnp.transpose(jnp.sum(x_all * x_all, axis=-1,
                                     keepdims=True))               # (1, n) XLU
    feat_d = jnp.maximum(sq_rows + sq_all_t - 2.0 * g, 0.0)        # feature dist

    sp_t = jnp.transpose(sp_ref[...])                              # (2, n): one
    dx = sp_rows[:, 0:1] - sp_t[0:1, :]                            # transpose for
    dy = sp_rows[:, 1:2] - sp_t[1:2, :]                            # sx.T and sy.T
    sel_d = feat_d + dx * dx + dy * dy                             # feat + spatial

    # ---- top-k neighbor selection: ONE XLU reduction per pick --------------
    # sel_d >= 0, so its f32 bit pattern is order preserving; pack the column
    # index into the low `col_bits` bits -> per-row keys are unique, a single
    # min gives the nearest not-yet-selected column with min-index tie break.
    cols = jax.lax.broadcasted_iota(i32, (tm, n), 1)
    grow = jax.lax.broadcasted_iota(i32, (tm, n), 0) + r0          # global rows
    low_mask = (1 << col_bits) - 1
    packed = (pltpu.bitcast(sel_d, i32) & ~low_mask) | cols
    sentinel = jnp.iinfo(i32).max                                  # compare-only
    score = jnp.where(grow == cols, sentinel, packed)              # exclude self

    mask = jnp.zeros((tm, n), jnp.bool_)                           # boolean top-k
    for _ in range(k):                                             # unrolled, k=10
        best = jnp.min(score, axis=-1, keepdims=True)              # 1 reduce/pick
        hit = score == best                                        # unique per row
        mask = jnp.logical_or(mask, hit)
        score = jnp.where(hit, sentinel, score)

    # ---- single masked row-softmax of -(feature distance) ------------------
    logits = jnp.where(mask, -feat_d, f32(-1e30))
    row_max = jnp.max(logits, axis=-1, keepdims=True)
    p = jnp.where(mask, jnp.exp(logits - row_max), 0.0)
    denom = jnp.sum(p, axis=-1, keepdims=True)
    adj = p * pl.reciprocal(denom, approx=True)                    # EUP divide

    # ---- neighbor aggregation + decoder (MXU, bf16 inputs / f32 accum) -----
    adj_c = adj.astype(agg_dtype)
    lr = jnp.dot(adj_c, x_all.astype(agg_dtype),
                 preferred_element_type=f32)                       # (tm, d)
    z_ref[...] = lr

    # build the torch (N, scale*D) column order in-kernel (lane concat), then
    # one MXU pass produces x1_hr rows directly -> no wrapper transpose/pad.
    xn_cat = jnp.concatenate([xn_ref[s] for s in range(scale)], axis=-1)
    hr_ref[...] = jnp.dot(adj_c, xn_cat.astype(agg_dtype),
                          preferred_element_type=f32)              # (tm, scale*d)

    # decoder: Linear (BN folded) + ELU; Dropout is identity in eval mode.
    y = jnp.dot(lr.astype(agg_dtype), wd_ref[...].astype(agg_dtype),
                preferred_element_type=f32) + bd_ref[...]
    de_ref[...] = jnp.where(y > 0.0, y, jnp.exp(jnp.minimum(y, 0.0)) - 1.0)


# ---------------------------------------------------------------------------
# Parameter handling: torch-like params + one-time BatchNorm fold.
# ---------------------------------------------------------------------------
def init_weights(key, latent_dim, input_dim, dec_cluster_n):
    kw, kc = jax.random.split(key)
    w_dec = jax.random.normal(kw, (latent_dim, input_dim), jnp.float32) * \
        jnp.sqrt(2.0 / (latent_dim + input_dim))
    b_dec = jnp.zeros((input_dim,), jnp.float32)
    bn_gamma = jnp.ones((input_dim,), jnp.float32)      # BatchNorm1d(eps=1e-4)
    bn_beta = jnp.zeros((input_dim,), jnp.float32)      # eval-mode running stats
    bn_mean = jnp.zeros((input_dim,), jnp.float32)
    bn_var = jnp.ones((input_dim,), jnp.float32)
    cluster_layer = jax.random.normal(kc, (dec_cluster_n, latent_dim), jnp.float32) * \
        jnp.sqrt(2.0 / (dec_cluster_n + latent_dim))    # unused in this forward
    return dict(w_dec=w_dec, b_dec=b_dec, bn_gamma=bn_gamma, bn_beta=bn_beta,
                bn_mean=bn_mean, bn_var=bn_var, cluster_layer=cluster_layer)


def fold_decoder(w_dec, b_dec, bn_gamma, bn_beta, bn_mean, bn_var, *, eps):
    """Fold BatchNorm1d (eval running stats) into the Linear (done once)."""
    s = bn_gamma / jnp.sqrt(bn_var + eps)
    w_f = w_dec * s[None, :]
    b_f = ((b_dec - bn_mean) * s + bn_beta)[None, :]
    return w_f, b_f


# ---------------------------------------------------------------------------
# Forward wrapper (only a free reshape on the wrapper side).
# ---------------------------------------------------------------------------
def st_transformer_super_gai_forward(x, x_neighbor, spatial, dec_w, dec_b, *,
                                     training=False, scale=6, k=10,
                                     num_row_blocks=1, agg_dtype=jnp.bfloat16):
    del training  # eval semantics: Dropout = identity, BN uses running stats
    n, d = x.shape
    out_dim = dec_w.shape[1]
    assert n % num_row_blocks == 0
    tm = n // num_row_blocks
    assert tm % 8 == 0 and k < n
    col_bits = max((n - 1).bit_length(), 1)

    # x_neighbor.view(scale, N, D): a free row-major reshape -- no transpose,
    # pad or extra HBM round trip before the kernel.
    xn = x_neighbor.reshape(scale, n, d)

    kernel = functools.partial(_fused_forward_kernel, d=d, k=k, scale=scale,
                               n=n, tm=tm, col_bits=col_bits, agg_dtype=agg_dtype)
    z, de_feat, x1_hr = pl.pallas_call(
        kernel,
        grid=(num_row_blocks,),
        in_specs=[
            pl.BlockSpec((n, d), lambda i: (0, 0)),             # x
            pl.BlockSpec((n, 2), lambda i: (0, 0)),             # spatial
            pl.BlockSpec((scale, n, d), lambda i: (0, 0, 0)),   # x_neighbor
            pl.BlockSpec((d, out_dim), lambda i: (0, 0)),       # folded dec W
            pl.BlockSpec((1, out_dim), lambda i: (0, 0)),       # folded dec b
        ],
        out_specs=(
            pl.BlockSpec((tm, d), lambda i: (i, 0)),            # x1_lr (= z)
            pl.BlockSpec((tm, out_dim), lambda i: (i, 0)),      # de_feat
            pl.BlockSpec((tm, scale * d), lambda i: (i, 0)),    # x1_hr
        ),
        out_shape=(jax.ShapeDtypeStruct((n, d), jnp.float32),
                   jax.ShapeDtypeStruct((n, out_dim), jnp.float32),
                   jax.ShapeDtypeStruct((n, scale * d), jnp.float32)),
        compiler_params=pltpu.CompilerParams(
            dimension_semantics=("parallel",)),   # v7x: 2 TCs split row blocks
    )(x, spatial, xn, dec_w, dec_b)
    return z, de_feat, x1_hr
    # NOTE: score_k is dead in the torch forward; idx_k / diff_patch detach()
    # is moot in inference, so neither is materialized.


# ---------------------------------------------------------------------------
# Pure-JAX reference (unfused, lax.top_k + dense scatter) for checking.
# ---------------------------------------------------------------------------
def reference_forward(x, x_neighbor, spatial, w, *, scale=6, k=10, eps=1e-4):
    n, d = x.shape
    xn = jnp.swapaxes(x_neighbor.reshape(scale, n, d), 0, 1).reshape(n, scale * d)
    sq = jnp.sum(x * x, -1, keepdims=True)
    feat_d = jnp.maximum(sq + sq.T - 2.0 * (x @ x.T), 0.0)
    ssq = jnp.sum(spatial * spatial, -1, keepdims=True)
    sp_d = jnp.maximum(ssq + ssq.T - 2.0 * (spatial @ spatial.T), 0.0)
    dist = jnp.where(jnp.eye(n, dtype=bool), 1e30, feat_d + sp_d)
    _, idx_k = jax.lax.top_k(-dist, k)
    diff = x[idx_k] - x[:, None, :]
    edge_w = jax.nn.softmax(-jnp.sum(diff * diff, axis=-1), axis=-1)
    rows = jnp.arange(n)[:, None]
    adj = jnp.zeros((n, n), jnp.float32).at[rows, idx_k].set(edge_w)
    lr = adj @ x
    hr = adj @ xn
    y = lr @ w["w_dec"] + w["b_dec"]
    s = w["bn_gamma"] / jnp.sqrt(w["bn_var"] + eps)
    y = (y - w["bn_mean"]) * s + w["bn_beta"]
    de = jnp.where(y > 0.0, y, jnp.exp(jnp.minimum(y, 0.0)) - 1.0)
    return lr, de, hr


if __name__ == "__main__":
    N = 64                        # number of spatial spots
    feat_hidden2, gcn_hidden2 = 16, 16
    latent_dim = gcn_hidden2 + feat_hidden2   # 32
    input_dim = 48                # gene/expression dimension
    dec_cluster_n = 8
    scale, k = 6, 10
    bn_eps = 1e-4

    key = jax.random.PRNGKey(0)
    kx, kn, ks, kw = jax.random.split(key, 4)
    x = jax.random.normal(kx, (N, latent_dim), jnp.float32)
    x_neighbor = jax.random.normal(kn, (scale * N, latent_dim), jnp.float32)
    spatial = jax.random.uniform(ks, (N, 2), jnp.float32) * 10.0

    weights = init_weights(kw, latent_dim, input_dim, dec_cluster_n)
    dec_w, dec_b = fold_decoder(weights["w_dec"], weights["b_dec"],
                                weights["bn_gamma"], weights["bn_beta"],
                                weights["bn_mean"], weights["bn_var"], eps=bn_eps)

    z_r, de_r, hr_r = reference_forward(x, x_neighbor, spatial, weights,
                                        scale=scale, k=k, eps=bn_eps)

    def _mostly_close(a, b, rtol, atol, frac=0.97):
        ok = jnp.abs(a - b) <= (atol + rtol * jnp.abs(b))
        return float(jnp.mean(ok.astype(jnp.float32))) >= frac

    # 1) accuracy config: f32 MXU inputs, single row block.
    fwd32 = jax.jit(functools.partial(st_transformer_super_gai_forward,
                                      scale=scale, k=k, num_row_blocks=1,
                                      agg_dtype=jnp.float32))
    z, de_feat, x1_hr = fwd32(x, x_neighbor, spatial, dec_w, dec_b)
    jax.block_until_ready((z, de_feat, x1_hr))

    assert z.shape == (N, latent_dim)
    assert de_feat.shape == (N, input_dim)
    assert x1_hr.shape == (N, scale * latent_dim)
    assert bool(jnp.all(jnp.isfinite(z)) & jnp.all(jnp.isfinite(de_feat)) &
                jnp.all(jnp.isfinite(x1_hr)))
    assert _mostly_close(z, z_r, 5e-3, 5e-3)
    assert _mostly_close(de_feat, de_r, 5e-3, 5e-3)
    assert _mostly_close(x1_hr, hr_r, 5e-3, 5e-3)

    # 2) performance config (v6e/v7x): bf16 MXU inputs + 2 parallel row blocks.
    fwd_bf16 = jax.jit(functools.partial(st_transformer_super_gai_forward,
                                         scale=scale, k=k, num_row_blocks=2,
                                         agg_dtype=jnp.bfloat16))
    z2, de2, hr2 = fwd_bf16(x, x_neighbor, spatial, dec_w, dec_b)
    jax.block_until_ready((z2, de2, hr2))
    assert _mostly_close(z2, z_r, 2e-2, 2e-2)
    assert _mostly_close(de2, de_r, 2e-2, 2e-2)
    assert _mostly_close(hr2, hr_r, 2e-2, 2e-2)

    print("KERNEL_OK")
</pallas_src>

<mosaic_0001>
module attributes {stable_mosaic.version = 11 : i64} {
  func.func @_fused_forward_kernel(%arg0: i32, %arg1: memref<64x32xf32, #tpu.memory_space<vmem>>, %arg2: memref<64x2xf32, #tpu.memory_space<vmem>>, %arg3: memref<6x64x32xf32, #tpu.memory_space<vmem>>, %arg4: memref<32x48xf32, #tpu.memory_space<vmem>>, %arg5: memref<1x48xf32, #tpu.memory_space<vmem>>, %arg6: memref<64x32xf32, #tpu.memory_space<vmem>>, %arg7: memref<64x48xf32, #tpu.memory_space<vmem>>, %arg8: memref<64x192xf32, #tpu.memory_space<vmem>>) attributes {dimension_semantics = [#tpu.dimension_semantics<parallel>], iteration_bounds = array<i64: 1>, scalar_prefetch = 0 : i64, scratch_operands = 0 : i64, tpu.core_type = #tpu.core_type<tc>, window_params = [{pipeline_mode = #tpu.pipeline_mode<synchronous>, transform_indices = @transform_0, window_bounds = array<i64: 64, 32>}, {pipeline_mode = #tpu.pipeline_mode<synchronous>, transform_indices = @transform_1, window_bounds = array<i64: 64, 2>}, {pipeline_mode = #tpu.pipeline_mode<synchronous>, transform_indices = @transform_2, window_bounds = array<i64: 6, 64, 32>}, {pipeline_mode = #tpu.pipeline_mode<synchronous>, transform_indices = @transform_3, window_bounds = array<i64: 32, 48>}, {pipeline_mode = #tpu.pipeline_mode<synchronous>, transform_indices = @transform_4, window_bounds = array<i64: 1, 48>}, {transform_indices = @transform_5, window_bounds = array<i64: 64, 32>}, {transform_indices = @transform_6, window_bounds = array<i64: 64, 48>}, {transform_indices = @transform_7, window_bounds = array<i64: 64, 192>}]} {
    %c64_i32 = arith.constant 64 : i32
    %0 = arith.muli %arg0, %c64_i32 : i32
    %1 = tpu.assume_multiple %0, 8 : i32
    %c0 = arith.constant 0 : index
    %c0_0 = arith.constant 0 : index
    %2 = vector.load %arg1[%c0, %c0_0] : memref<64x32xf32, #tpu.memory_space<vmem>>, vector<64x32xf32>
    %3 = arith.index_cast %1 : i32 to index
    %c0_1 = arith.constant 0 : index
    %4 = vector.load %arg1[%3, %c0_1] : memref<64x32xf32, #tpu.memory_space<vmem>>, vector<64x32xf32>
    %5 = arith.index_cast %1 : i32 to index
    %c0_2 = arith.constant 0 : index
    %6 = vector.load %arg2[%5, %c0_2] : memref<64x2xf32, #tpu.memory_space<vmem>>, vector<64x2xf32>
    %cst = arith.constant dense<0.000000e+00> : vector<64x64xf32>
    %7 = tpu.matmul %4, %2, %cst {dimension_numbers = #tpu.dot_dimension_numbers<[1], [1], [0], [0], [0, 0, 1, 0], [], []>} : vector<64x32xf32>, vector<64x32xf32>, vector<64x64xf32> -> vector<64x64xf32>
    %8 = arith.mulf %4, %4 : vector<64x32xf32>
    %cst_3 = arith.constant dense<0.000000e+00> : vector<64xf32>
    %9 = vector.multi_reduction <add>, %8, %cst_3 [1] : vector<64x32xf32> to vector<64xf32>
    %10 = vector.shape_cast %9 : vector<64xf32> to vector<64x1xf32>
    %11 = arith.mulf %2, %2 : vector<64x32xf32>
    %cst_4 = arith.constant dense<0.000000e+00> : vector<64xf32>
    %12 = vector.multi_reduction <add>, %11, %cst_4 [1] : vector<64x32xf32> to vector<64xf32>
    %13 = vector.shape_cast %12 : vector<64xf32> to vector<64x1xf32>
    %14 = tpu.transpose %13, [1, 0] : vector<64x1xf32> -> vector<1x64xf32>
    %15 = vector.broadcast %10 : vector<64x1xf32> to vector<64x64xf32>
    %16 = vector.broadcast %14 : vector<1x64xf32> to vector<64x64xf32>
    %17 = arith.addf %15, %16 : vector<64x64xf32>
    %cst_5 = arith.constant 2.000000e+00 : f32
    %18 = vector.broadcast %cst_5 : f32 to vector<64x64xf32>
    %19 = arith.mulf %18, %7 : vector<64x64xf32>
    %20 = arith.subf %17, %19 : vector<64x64xf32>
    %cst_6 = arith.constant 0.000000e+00 : f32
    %21 = vector.broadcast %cst_6 : f32 to vector<64x64xf32>
    %22 = arith.maximumf %20, %21 : vector<64x64xf32>
    %c0_7 = arith.constant 0 : index
    %c0_8 = arith.constant 0 : index
    %23 = vector.load %arg2[%c0_7, %c0_8] : memref<64x2xf32, #tpu.memory_space<vmem>>, vector<64x2xf32>
    %24 = tpu.transpose %23, [1, 0] : vector<64x2xf32> -> vector<2x64xf32>
    %25 = vector.extract_strided_slice %6 {offsets = [0, 0], sizes = [64, 1], strides = [1, 1]} : vector<64x2xf32> to vector<64x1xf32>
    %26 = vector.extract_strided_slice %24 {offsets = [0, 0], sizes = [1, 64], strides = [1, 1]} : vector<2x64xf32> to vector<1x64xf32>
    %27 = vector.broadcast %25 : vector<64x1xf32> to vector<64x64xf32>
    %28 = vector.broadcast %26 : vector<1x64xf32> to vector<64x64xf32>
    %29 = arith.subf %27, %28 : vector<64x64xf32>
    %30 = vector.extract_strided_slice %6 {offsets = [0, 1], sizes = [64, 1], strides = [1, 1]} : vector<64x2xf32> to vector<64x1xf32>
    %31 = vector.extract_strided_slice %24 {offsets = [1, 0], sizes = [1, 64], strides = [1, 1]} : vector<2x64xf32> to vector<1x64xf32>
    %32 = vector.broadcast %30 : vector<64x1xf32> to vector<64x64xf32>
    %33 = vector.broadcast %31 : vector<1x64xf32> to vector<64x64xf32>
    %34 = arith.subf %32, %33 : vector<64x64xf32>
    %35 = arith.mulf %29, %29 : vector<64x64xf32>
    %36 = arith.addf %22, %35 : vector<64x64xf32>
    %37 = arith.mulf %34, %34 : vector<64x64xf32>
    %38 = arith.addf %36, %37 : vector<64x64xf32>
    %39 = tpu.iota {dimensions = array<i32: 1>} : vector<64x64xi32>
    %40 = tpu.iota {dimensions = array<i32: 0>} : vector<64x64xi32>
    %41 = vector.broadcast %1 : i32 to vector<64x64xi32>
    %42 = arith.addi %40, %41 : vector<64x64xi32>
    %43 = tpu.bitcast %38 : vector<64x64xf32> -> vector<64x64xi32>
    %c-64_i32 = arith.constant -64 : i32
    %44 = vector.broadcast %c-64_i32 : i32 to vector<64x64xi32>
    %45 = arith.andi %43, %44 : vector<64x64xi32>
    %46 = arith.ori %45, %39 : vector<64x64xi32>
    %47 = arith.cmpi eq, %42, %39 : vector<64x64xi32>
    %c2147483647_i32 = arith.constant 2147483647 : i32
    %48 = vector.broadcast %c2147483647_i32 : i32 to vector<64x64xi32>
    %49 = arith.select %47, %48, %46 : vector<64x64xi1>, vector<64x64xi32>
    %false = arith.constant false
    %50 = vector.broadcast %false : i1 to vector<64x64xi1>
    %cst_9 = arith.constant dense<2147483647> : vector<64xi32>
    %51 = vector.multi_reduction <minsi>, %49, %cst_9 [1] : vector<64x64xi32> to vector<64xi32>
    %52 = vector.shape_cast %51 : vector<64xi32> to vector<64x1xi32>
    %53 = vector.broadcast %52 : vector<64x1xi32> to vector<64x64xi32>
    %54 = arith.cmpi eq, %49, %53 : vector<64x64xi32>
    %55 = arith.ori %50, %54 : vector<64x64xi1>
    %c2147483647_i32_10 = arith.constant 2147483647 : i32
    %56 = vector.broadcast %c2147483647_i32_10 : i32 to vector<64x64xi32>
    %57 = arith.select %54, %56, %49 : vector<64x64xi1>, vector<64x64xi32>
    %cst_11 = arith.constant dense<2147483647> : vector<64xi32>
    %58 = vector.multi_reduction <minsi>, %57, %cst_11 [1] : vector<64x64xi32> to vector<64xi32>
    %59 = vector.shape_cast %58 : vector<64xi32> to vector<64x1xi32>
    %60 = vector.broadcast %59 : vector<64x1xi32> to vector<64x64xi32>
    %61 = arith.cmpi eq, %57, %60 : vector<64x64xi32>
    %62 = arith.ori %55, %61 : vector<64x64xi1>
    %c2147483647_i32_12 = arith.constant 2147483647 : i32
    %63 = vector.broadcast %c2147483647_i32_12 : i32 to vector<64x64xi32>
    %64 = arith.select %61, %63, %57 : vector<64x64xi1>, vector<64x64xi32>
    %cst_13 = arith.constant dense<2147483647> : vector<64xi32>
    %65 = vector.multi_reduction <minsi>, %64, %cst_13 [1] : vector<64x64xi32> to vector<64xi32>
    %66 = vector.shape_cast %65 : vector<64xi32> to vector<64x1xi32>
    %67 = vector.broadcast %66 : vector<64x1xi32> to vector<64x64xi32>
    %68 = arith.cmpi eq, %64, %67 : vector<64x64xi32>
    %69 = arith.ori %62, %68 : vector<64x64xi1>
    %c2147483647_i32_14 = arith.constant 2147483647 : i32
    %70 = vector.broadcast %c2147483647_i32_14 : i32 to vector<64x64xi32>
    %71 = arith.select %68, %70, %64 : vector<64x64xi1>, vector<64x64xi32>
    %cst_15 = arith.constant dense<2147483647> : vector<64xi32>
    %72 = vector.multi_reduction <minsi>, %71, %cst_15 [1] : vector<64x64xi32> to vector<64xi32>
    %73 = vector.shape_cast %72 : vector<64xi32> to vector<64x1xi32>
    %74 = vector.broadcast %73 : vector<64x1xi32> to vector<64x64xi32>
    %75 = arith.cmpi eq, %71, %74 : vector<64x64xi32>
    %76 = arith.ori %69, %75 : vector<64x64xi1>
    %c2147483647_i32_16 = arith.constant 2147483647 : i32
    %77 = vector.broadcast %c2147483647_i32_16 : i32 to vector<64x64xi32>
    %78 = arith.select %75, %77, %71 : vector<64x64xi1>, vector<64x64xi32>
    %cst_17 = arith.constant dense<2147483647> : vector<64xi32>
    %79 = vector.multi_reduction <minsi>, %78, %cst_17 [1] : vector<64x64xi32> to vector<64xi32>
    %80 = vector.shape_cast %79 : vector<64xi32> to vector<64x1xi32>
    %81 = vector.broadcast %80 : vector<64x1xi32> to vector<64x64xi32>
    %82 = arith.cmpi eq, %78, %81 : vector<64x64xi32>
    %83 = arith.ori %76, %82 : vector<64x64xi1>
    %c2147483647_i32_18 = arith.constant 2147483647 : i32
    %84 = vector.broadcast %c2147483647_i32_18 : i32 to vector<64x64xi32>
    %85 = arith.select %82, %84, %78 : vector<64x64xi1>, vector<64x64xi32>
    %cst_19 = arith.constant dense<2147483647> : vector<64xi32>
    %86 = vector.multi_reduction <minsi>, %85, %cst_19 [1] : vector<64x64xi32> to vector<64xi32>
    %87 = vector.shape_cast %86 : vector<64xi32> to vector<64x1xi32>
    %88 = vector.broadcast %87 : vector<64x1xi32> to vector<64x64xi32>
    %89 = arith.cmpi eq, %85, %88 : vector<64x64xi32>
    %90 = arith.ori %83, %89 : vector<64x64xi1>
    %c2147483647_i32_20 = arith.constant 2147483647 : i32
    %91 = vector.broadcast %c2147483647_i32_20 : i32 to vector<64x64xi32>
    %92 = arith.select %89, %91, %85 : vector<64x64xi1>, vector<64x64xi32>
    %cst_21 = arith.constant dense<2147483647> : vector<64xi32>
    %93 = vector.multi_reduction <minsi>, %92, %cst_21 [1] : vector<64x64xi32> to vector<64xi32>
    %94 = vector.shape_cast %93 : vector<64xi32> to vector<64x1xi32>
    %95 = vector.broadcast %94 : vector<64x1xi32> to vector<64x64xi32>
    %96 = arith.cmpi eq, %92, %95 : vector<64x64xi32>
    %97 = arith.ori %90, %96 : vector<64x64xi1>
    %c2147483647_i32_22 = arith.constant 2147483647 : i32
    %98 = vector.broadcast %c2147483647_i32_22 : i32 to vector<64x64xi32>
    %99 = arith.select %96, %98, %92 : vector<64x64xi1>, vector<64x64xi32>
    %cst_23 = arith.constant dense<2147483647> : vector<64xi32>
    %100 = vector.multi_reduction <minsi>, %99, %cst_23 [1] : vector<64x64xi32> to vector<64xi32>
    %101 = vector.shape_cast %100 : vector<64xi32> to vector<64x1xi32>
    %102 = vector.broadcast %101 : vector<64x1xi32> to vector<64x64xi32>
    %103 = arith.cmpi eq, %99, %102 : vector<64x64xi32>
    %104 = arith.ori %97, %103 : vector<64x64xi1>
    %c2147483647_i32_24 = arith.constant 2147483647 : i32
    %105 = vector.broadcast %c2147483647_i32_24 : i32 to vector<64x64xi32>
    %106 = arith.select %103, %105, %99 : vector<64x64xi1>, vector<64x64xi32>
    %cst_25 = arith.constant dense<2147483647> : vector<64xi32>
    %107 = vector.multi_reduction <minsi>, %106, %cst_25 [1] : vector<64x64xi32> to vector<64xi32>
    %108 = vector.shape_cast %107 : vector<64xi32> to vector<64x1xi32>
    %109 = vector.broadcast %108 : vector<64x1xi32> to vector<64x64xi32>
    %110 = arith.cmpi eq, %106, %109 : vector<64x64xi32>
    %111 = arith.ori %104, %110 : vector<64x64xi1>
    %c2147483647_i32_26 = arith.constant 2147483647 : i32
    %112 = vector.broadcast %c2147483647_i32_26 : i32 to vector<64x64xi32>
    %113 = arith.select %110, %112, %106 : vector<64x64xi1>, vector<64x64xi32>
    %cst_27 = arith.constant dense<2147483647> : vector<64xi32>
    %114 = vector.multi_reduction <minsi>, %113, %cst_27 [1] : vector<64x64xi32> to vector<64xi32>
    %115 = vector.shape_cast %114 : vector<64xi32> to vector<64x1xi32>
    %116 = vector.broadcast %115 : vector<64x1xi32> to vector<64x64xi32>
    %117 = arith.cmpi eq, %113, %116 : vector<64x64xi32>
    %118 = arith.ori %111, %117 : vector<64x64xi1>
    %cst_28 = arith.constant 0.000000e+00 : f32
    %119 = vector.broadcast %cst_28 : f32 to vector<64x64xf32>
    %120 = arith.subf %119, %22 : vector<64x64xf32>
    %cst_29 = arith.constant -1.000000e+30 : f32
    %121 = vector.broadcast %cst_29 : f32 to vector<64x64xf32>
    %122 = arith.select %118, %120, %121 : vector<64x64xi1>, vector<64x64xf32>
    %cst_30 = arith.constant dense<0xFF800000> : vector<64xf32>
    %123 = vector.multi_reduction <maximumf>, %122, %cst_30 [1] : vector<64x64xf32> to vector<64xf32>
    %124 = vector.shape_cast %123 : vector<64xf32> to vector<64x1xf32>
    %125 = vector.broadcast %124 : vector<64x1xf32> to vector<64x64xf32>
    %126 = arith.subf %122, %125 : vector<64x64xf32>
    %127 = math.exp %126 : vector<64x64xf32>
    %cst_31 = arith.constant 0.000000e+00 : f32
    %128 = vector.broadcast %cst_31 : f32 to vector<64x64xf32>
    %129 = arith.select %118, %127, %128 : vector<64x64xi1>, vector<64x64xf32>
    %cst_32 = arith.constant dense<0.000000e+00> : vector<64xf32>
    %130 = vector.multi_reduction <add>, %129, %cst_32 [1] : vector<64x64xf32> to vector<64xf32>
    %131 = vector.shape_cast %130 : vector<64xf32> to vector<64x1xf32>
    %132 = tpu.reciprocal %131 {approx = true} : vector<64x1xf32> -> vector<64x1xf32>
    %133 = vector.broadcast %132 : vector<64x1xf32> to vector<64x64xf32>
    %134 = arith.mulf %129, %133 : vector<64x64xf32>
    %cst_33 = arith.constant dense<0.000000e+00> : vector<64x32xf32>
    %135 = tpu.matmul %134, %2, %cst_33 {dimension_numbers = #tpu.dot_dimension_numbers<[1], [0], [0], [1], [0, 0, 1, 1], [], []>} : vector<64x64xf32>, vector<64x32xf32>, vector<64x32xf32> -> vector<64x32xf32>
    %c0_34 = arith.constant 0 : index
    %c0_35 = arith.constant 0 : index
    %136 = vector.load %arg6[%c0_34, %c0_35] : memref<64x32xf32, #tpu.memory_space<vmem>>, vector<64x32xf32>
    tpu.vector_store %arg6[%c0_34, %c0_35], %135 {strides = array<i32>} : memref<64x32xf32, #tpu.memory_space<vmem>>, vector<64x32xf32>,
    %c0_36 = arith.constant 0 : index
    %c0_37 = arith.constant 0 : index
    %c0_38 = arith.constant 0 : index
    %137 = vector.load %arg3[%c0_36, %c0_37, %c0_38] : memref<6x64x32xf32, #tpu.memory_space<vmem>>, vector<1x64x32xf32>
    %138 = vector.shape_cast %137 : vector<1x64x32xf32> to vector<64x32xf32>
    %c1 = arith.constant 1 : index
    %c0_39 = arith.constant 0 : index
    %c0_40 = arith.constant 0 : index
    %139 = vector.load %arg3[%c1, %c0_39, %c0_40] : memref<6x64x32xf32, #tpu.memory_space<vmem>>, vector<1x64x32xf32>
    %140 = vector.shape_cast %139 : vector<1x64x32xf32> to vector<64x32xf32>
    %c2 = arith.constant 2 : index
    %c0_41 = arith.constant 0 : index
    %c0_42 = arith.constant 0 : index
    %141 = vector.load %arg3[%c2, %c0_41, %c0_42] : memref<6x64x32xf32, #tpu.memory_space<vmem>>, vector<1x64x32xf32>
    %142 = vector.shape_cast %141 : vector<1x64x32xf32> to vector<64x32xf32>
    %c3 = arith.constant 3 : index
    %c0_43 = arith.constant 0 : index
    %c0_44 = arith.constant 0 : index
    %143 = vector.load %arg3[%c3, %c0_43, %c0_44] : memref<6x64x32xf32, #tpu.memory_space<vmem>>, vector<1x64x32xf32>
    %144 = vector.shape_cast %143 : vector<1x64x32xf32> to vector<64x32xf32>
    %c4 = arith.constant 4 : index
    %c0_45 = arith.constant 0 : index
    %c0_46 = arith.constant 0 : index
    %145 = vector.load %arg3[%c4, %c0_45, %c0_46] : memref<6x64x32xf32, #tpu.memory_space<vmem>>, vector<1x64x32xf32>
    %146 = vector.shape_cast %145 : vector<1x64x32xf32> to vector<64x32xf32>
    %c5 = arith.constant 5 : index
    %c0_47 = arith.constant 0 : index
    %c0_48 = arith.constant 0 : index
    %147 = vector.load %arg3[%c5, %c0_47, %c0_48] : memref<6x64x32xf32, #tpu.memory_space<vmem>>, vector<1x64x32xf32>
    %148 = vector.shape_cast %147 : vector<1x64x32xf32> to vector<64x32xf32>
    %149 = tpu.concatenate %138, %140, %142, %144, %146, %148 in 1 : vector<64x32xf32>, vector<64x32xf32>, vector<64x32xf32>, vector<64x32xf32>, vector<64x32xf32>, vector<64x32xf32> -> vector<64x192xf32>
    %cst_49 = arith.constant dense<0.000000e+00> : vector<64x192xf32>
    %150 = tpu.matmul %134, %149, %cst_49 {dimension_numbers = #tpu.dot_dimension_numbers<[1], [0], [0], [1], [0, 0, 1, 1], [], []>} : vector<64x64xf32>, vector<64x192xf32>, vector<64x192xf32> -> vector<64x192xf32>
    %c0_50 = arith.constant 0 : index
    %c0_51 = arith.constant 0 : index
    %151 = vector.load %arg8[%c0_50, %c0_51] : memref<64x192xf32, #tpu.memory_space<vmem>>, vector<64x192xf32>
    tpu.vector_store %arg8[%c0_50, %c0_51], %150 {strides = array<i32>} : memref<64x192xf32, #tpu.memory_space<vmem>>, vector<64x192xf32>,
    %c0_52 = arith.constant 0 : index
    %c0_53 = arith.constant 0 : index
    %152 = vector.load %arg4[%c0_52, %c0_53] : memref<32x48xf32, #tpu.memory_space<vmem>>, vector<32x48xf32>
    %cst_54 = arith.constant dense<0.000000e+00> : vector<64x48xf32>
    %153 = tpu.matmul %135, %152, %cst_54 {dimension_numbers = #tpu.dot_dimension_numbers<[1], [0], [0], [1], [0, 0, 1, 1], [], []>} : vector<64x32xf32>, vector<32x48xf32>, vector<64x48xf32> -> vector<64x48xf32>
    %c0_55 = arith.constant 0 : index
    %c0_56 = arith.constant 0 : index
    %154 = vector.load %arg5[%c0_55, %c0_56] : memref<1x48xf32, #tpu.memory_space<vmem>>, vector<1x48xf32>
    %155 = vector.broadcast %154 : vector<1x48xf32> to vector<64x48xf32>
    %156 = arith.addf %153, %155 : vector<64x48xf32>
    %cst_57 = arith.constant 0.000000e+00 : f32
    %157 = vector.broadcast %cst_57 : f32 to vector<64x48xf32>
    %158 = arith.cmpf ogt, %156, %157 : vector<64x48xf32>
    %cst_58 = arith.constant 0.000000e+00 : f32
    %159 = vector.broadcast %cst_58 : f32 to vector<64x48xf32>
    %160 = arith.minimumf %156, %159 : vector<64x48xf32>
    %161 = math.exp %160 : vector<64x48xf32>
    %cst_59 = arith.constant 1.000000e+00 : f32
    %162 = vector.broadcast %cst_59 : f32 to vector<64x48xf32>
    %163 = arith.subf %161, %162 : vector<64x48xf32>
    %164 = arith.select %158, %156, %163 : vector<64x48xi1>, vector<64x48xf32>
    %c0_60 = arith.constant 0 : index
    %c0_61 = arith.constant 0 : index
    %165 = vector.load %arg7[%c0_60, %c0_61] : memref<64x48xf32, #tpu.memory_space<vmem>>, vector<64x48xf32>
    tpu.vector_store %arg7[%c0_60, %c0_61], %164 {strides = array<i32>} : memref<64x48xf32, #tpu.memory_space<vmem>>, vector<64x48xf32>,
    return
  }
  func.func @transform_0(%arg0: i32) -> (i32, i32) {
    %c0_i32 = arith.constant 0 : i32
    %c0_i32_0 = arith.constant 0 : i32
    %c0_i32_1 = arith.constant 0 : i32
    return %c0_i32, %c0_i32_0 : i32, i32
  }
  func.func @transform_1(%arg0: i32) -> (i32, i32) {
    %c0_i32 = arith.constant 0 : i32
    %c0_i32_0 = arith.constant 0 : i32
    %c0_i32_1 = arith.constant 0 : i32
    return %c0_i32, %c0_i32_0 : i32, i32
  }
  func.func @transform_2(%arg0: i32) -> (i32, i32, i32) {
    %c0_i32 = arith.constant 0 : i32
    %c0_i32_0 = arith.constant 0 : i32
    %c0_i32_1 = arith.constant 0 : i32
    %c0_i32_2 = arith.constant 0 : i32
    return %c0_i32, %c0_i32_0, %c0_i32_1 : i32, i32, i32
  }
  func.func @transform_3(%arg0: i32) -> (i32, i32) {
    %c0_i32 = arith.constant 0 : i32
    %c0_i32_0 = arith.constant 0 : i32
    %c0_i32_1 = arith.constant 0 : i32
    return %c0_i32, %c0_i32_0 : i32, i32
  }
  func.func @transform_4(%arg0: i32) -> (i32, i32) {
    %c0_i32 = arith.constant 0 : i32
    %c0_i32_0 = arith.constant 0 : i32
    %c0_i32_1 = arith.constant 0 : i32
    return %c0_i32, %c0_i32_0 : i32, i32
  }
  func.func @transform_5(%arg0: i32) -> (i32, i32) {
    %c0_i32 = arith.constant 0 : i32
    %c0_i32_0 = arith.constant 0 : i32
    return %arg0, %c0_i32 : i32, i32
  }
  func.func @transform_6(%arg0: i32) -> (i32, i32) {
    %c0_i32 = arith.constant 0 : i32
    %c0_i32_0 = arith.constant 0 : i32
    return %arg0, %c0_i32 : i32, i32
  }
  func.func @transform_7(%arg0: i32) -> (i32, i32) {
    %c0_i32 = arith.constant 0 : i32
    %c0_i32_0 = arith.constant 0 : i32
    return %arg0, %c0_i32 : i32, i32
  }
}

</mosaic_0001>

<bundles_post_ra>
// kernel: st_transformer_super_gai_forward.1
= control target key start
LH: loop header
LB: loop body
LE: loop exit
PB: predicated region body
PF: predicated region fallthrough
CT: control target
= control target key end

     0   :  { %vm5210_vm0 = vcmask 261120   ;;  %s5202_s0 = inlined_call_operand.vmem [shape: f32[64,32], index: 0, kind: input, shape index: {}]   ;;  %s5203_s1 = inlined_call_operand.vmem [shape: f32[64,2], index: 1, kind: input, shape index: {}]   ;;  %s5204_s2 = inlined_call_operand.vmem [shape: f32[6,64,32], index: 2, kind: input, shape index: {}]   ;;  %s5205_s3 = inlined_call_operand.vmem [shape: f32[32,48], index: 3, kind: input, shape index: {}]   ;;  %s5206_s4 = inlined_call_operand.vmem [shape: f32[1,48], index: 4, kind: input, shape index: {}]   ;;  %s5207_s5 = inlined_call_operand.vmem [shape: f32[64,32], index: 5, kind: output, shape index: {0}]   ;;  %s5208_s6 = inlined_call_operand.vmem [shape: f32[64,48], index: 6, kind: output, shape index: {1}]   ;;  %s5209_s7 = inlined_call_operand.hbm [shape: f32[64,192], index: 7, kind: output, shape index: {2}]  }
   0x1   :  { %v2906_v0 = vld [vmem:[%s5203_s1] sm:$0xff]  ;;  %v2924_v4 = vld [vmem:[%s5202_s0 + $0x28] sm:$0xff] }
   0x2   :  { %v2911_v1 = vld [vmem:[%s5202_s0 + $0x20] sm:$0xff]  ;;  %278 = vxpose.xlu1.b32.start [1/8] (short) (narrow) %v2906_v0, 8 }
   0x3   :  { %v177_v2 = vmul.f32 %v2911_v1, %v2911_v1  ;;  %v2919_v3 = vld [vmem:[%s5202_s0] sm:$0xff] }
   0x4   :  { %v141_v5 = vmul.f32 %v2919_v3, %v2919_v3 }
   0x5   :  { %v193_v6 = vsel %vm5210_vm0, %v177_v2, 0.0 }
   0x6   :  { %13 = vsyncpa [#allocation3], 0  ;;  %194 = vadd.xlane.f32.xlu2 %v193_v6  ;;  %v149_v7 = vsel %vm5210_vm0, %v141_v5, 0.0  ;;  %v178_v8 = vmul.f32 %v2924_v4, %v2924_v4  ;;  %v2935_v9 = vld [vmem:[%s5202_s0 + $0x8] sm:$0xff]  ;;  %v2950_v14 = vld [vmem:[%s5203_s1 + $0x10] sm:$0xff]  ;;  %v2855_v15 = vmov 0   ;;  %v432_v55 = vlaneseq }
   0x7   :  { %182 = vadd.xlane.f32.xlu0 %v149_v7  ;;  %v2940_v10 = vld [vmem:[%s5203_s1 + $0x8] sm:$0xff]  ;;  %v142_v11 = vmul.f32 %v2935_v9, %v2935_v9  ;;  %2691 = vset.pattern.permute.xlu2 %v2855_v15  ;;  %v2957_v16 = vld [vmem:[%s5203_s1 + $0x18] sm:$0xff]  ;;  %v2963_v17 = vld [vmem:[%s5203_s1 + $0x20] sm:$0xff]  ;;  %v2856_v23 = vmov 1   ;;  %vm492_vm2 = vcmask 523264   ;;  %s2857_s12 = smov 32  }
   0x8   :  { %v196_v12 = vsel %vm5210_vm0, %v178_v8, 0.0  ;;  %v2969_v18 = vld [vmem:[%s5203_s1 + $0x28] sm:$0xff]  ;;  %v2975_v19 = vld [vmem:[%s5203_s1 + $0x30] sm:$0xff]  ;;  %v2982_v20 = vld [vmem:[%s5203_s1 + $0x38] sm:$0xff]  ;;  %2692 = vset.pattern.permute.xlu0 %v2856_v23  ;;  %v3077_v61 = vshrl.u32 %v432_v55, 7  ;;  %s2858_s21 = smov 64  }
   0x9   :  { %v152_v13 = vsel %vm5210_vm0, %v142_v11, 0.0  ;;  %v2988_v21 = vld [vmem:[%s5202_s0 + $0x30] sm:$0xff]  ;;  %v32_v28 = vld [vmem:[%s5202_s0 + $0x38] sm:$0xff]  ;;  %s2859_s1 = smov 96   ;;  %s2860_s19 = smov [#allocation2]  }
   0xa   :  { %279 = vxpose.xlu1.b32.cont [2/8] (short) (narrow) %v2940_v10, 8  ;;  %v179_v22 = vmul.f32 %v2988_v21, %v2988_v21  ;;  %v36_v25 = vld [vmem:[%s5202_s0 + $0x10] sm:$0xff]  ;;  %2570 = vmatpush.xpose.msk.msra.mxu0 %vm5210_vm0, %v32_v28  ;;  %v28_v29 = vld [vmem:[%s5202_s0 + $0x18] sm:$0xff]  ;;  %v180_v32 = vmul.f32 %v32_v28, %v32_v28  ;;  %s2552_s20 = sshll.u32 %s2860_s19, 4  ;;  %s2554_s24 = sshll.u32 %s5209_s7, 4  ;;  %s2553_s20 = int_to_ptr.vmem [resolvable:$true] %s2552_s20  ;;  %s2555_s24 = int_to_ptr.hbm [resolvable:$true] %s2554_s24 }
   0xb   :  { %v143_v26 = vmul.f32 %v36_v25, %v36_v25  ;;  %2061 = vmatpush.msra.mxu1 %v32_v28  ;;  %2666 = vmatpush.msra.mxu2 %v32_v28  ;;  %v176_v30 = vmul.f32 %v28_v29, %v28_v29  ;;  %s2861_s25 = smov 256   ;;  %s2862_s26 = smov 16  }
   0xc   :  { %v199_v24 = vsel %vm5210_vm0, %v179_v22, 0.0  ;;  %2667 = vmatpush.msra.mxu3 %v32_v28  ;;  %v202_v33 = vsel %vm5210_vm0, %v180_v32, 0.0 }
   0xd   :  { %v155_v27 = vsel %vm5210_vm0, %v143_v26, 0.0  ;;  %2062 = vmatpush.msra.mxu1 %v2988_v21  ;;  %2668 = vmatpush.msra.mxu2 %v2988_v21  ;;  %v190_v31 = vsel %vm5210_vm0, %v176_v30, 0.0 }
   0xe   :  { %197 = vadd.xlane.f32.xlu2 %v196_v12  ;;  %2571 = vmatpush.xpose.msk.msra.mxu0 %vm5210_vm0, %v2988_v21 }
   0xf   :  { %185 = vadd.xlane.f32.xlu0 %v152_v13  ;;  %2063 = vmatpush.msra.mxu1 %v2924_v4 }
  0x10   :  { %2669 = vmatpush.msra.mxu3 %v2988_v21  ;;  %2670 = vmatpush.msra.mxu2 %v2924_v4 }
  0x11   :  { %2064 = vmatpush.msra.mxu1 %v2911_v1 }
  0x12   :  { %280 = vxpose.xlu1.b32.cont [3/8] (short) (narrow) %v2950_v14, 8  ;;  %2671 = vmatpush.msra.mxu3 %v2924_v4 }
  0x13   :  { %2672 = vmatpush.msra.mxu2 %v2911_v1  ;;  %2572 = vmatpush.xpose.msk.msra.mxu0 %vm5210_vm0, %v2924_v4 }
  0x14   :  { %2065 = vmatpush.msra.mxu1 %v28_v29  ;;  %2673 = vmatpush.msra.mxu3 %v2911_v1 }
  0x15   :  { %2674 = vmatpush.msra.mxu2 %v28_v29 }
  0x16   :  { %150 = vadd.xlane.f32.xlu2 %v149_v7  ;;  %2066 = vmatpush.msra.mxu1 %v36_v25 }
  0x17   :  { %200 = vadd.xlane.f32.xlu0 %v199_v24  ;;  %2675 = vmatpush.msra.mxu3 %v28_v29 }
  0x18   :  { %2573 = vmatpush.xpose.msk.msra.mxu0 %vm5210_vm0, %v2911_v1  ;;  %2067 = vmatpush.msra.mxu1 %v2935_v9 }
  0x19   :  { %2676 = vmatpush.msra.mxu2 %v36_v25  ;;  %2677 = vmatpush.msra.mxu3 %v36_v25 }
  0x1a   :  { %281 = vxpose.xlu1.b32.cont [4/8] (short) (narrow) %v2957_v16, 8  ;;  %2068 = vmatpush.msra.mxu1 %v2919_v3 }
  0x1b   :  { %2678 = vmatpush.msra.mxu2 %v2935_v9  ;;  %2679 = vmatpush.msra.mxu3 %v2935_v9 }
  0x1c   :  { %2574 = vmatpush.xpose.msk.msra.mxu0 %vm5210_vm0, %v28_v29 }
  0x1d   :  { %2680 = vmatpush.msra.mxu2 %v2919_v3  ;;  %2681 = vmatpush.msra.mxu3 %v2919_v3 }
  0x1e   :  { %153 = vadd.xlane.f32.xlu2 %v152_v13 }
  0x20   :  { %2575 = vmatpush.xpose.msk.msra.mxu0 %vm5210_vm0, %v36_v25 }
  0x22   :  { %282 = vxpose.xlu1.b32.cont [5/8] (short) (narrow) %v2963_v17, 8 }
  0x24   :  { %2576 = vmatpush.xpose.msk.msra.mxu0 %vm5210_vm0, %v2935_v9 }
  0x28   :  { %2577 = vmatpush.xpose.msk.msra.mxu0 %vm5210_vm0, %v2919_v3 }
  0x2a   :  { %283 = vxpose.xlu1.b32.cont [6/8] (short) (narrow) %v2969_v18, 8 }
  0x2b   :  { %368 = vperm.xlu0 %2692, %v2950_v14   ;;  %2578 = vmatmul.msk.f32.vlgmr.msra.gmra.mxu0 %vm5210_vm0, %v2919_v3  ;;  %v3083_v3 = vand.u32 127, %v432_v55 }
  0x2d   :  { %vm476_vm3 = vcmp.eq.s32.totalorder %v3077_v61, %v3083_v3 }
  0x32   :  { %284 = vxpose.xlu1.b32.cont [7/8] (short) (narrow) %v2975_v19, 8 }
  0x33   :  { %2579 = vmatmul.msk.f32.gmra.mxu0 %vm5210_vm0, %v2935_v9 }
  0x36   :  { %317 = vperm.xlu2 %2691, %v2940_v10  }
  0x3a   :  { %285 = vxpose.xlu1.b32.end [8/8] (short) (narrow) %v2982_v20, 8 }
  0x3b   :  { %2580 = vmatmul.msk.f32.gmra.mxu0 %vm5210_vm0, %v36_v25 }
  0x3e   :  { %2694 = vset.pattern.permute.xlu2 %v2856_v23 }
  0x43   :  { %2581 = vmatmul.msk.f32.gmra.mxu0 %vm5210_vm0, %v28_v29 }
  0x4b   :  { %2582 = vmatmul.msk.f32.gmra.mxu0 %vm5210_vm0, %v2911_v1 }
  0x53   :  { %2583 = vmatmul.msk.f32.gmra.mxu0 %vm5210_vm0, %v2924_v4  ;;  %v436_v4 = vadd.s32 8, %v3077_v61 }
  0x55   :  { %vm477_vm1 = vcmp.eq.s32.totalorder %v436_v4, %v3083_v3 }
  0x5b   :  { %2584 = vmatmul.msk.f32.gmra.mxu0 %vm5210_vm0, %v2988_v21 }
  0x5f   :  { %156 = vadd.xlane.f32.xlu2 %v155_v27 }
  0x63   :  { %2585 = vmatmul.msk.f32.gmra.mxu0 %vm5210_vm0, %v32_v28 }
  0x67   :  { %162 = vadd.xlane.f32.xlu2 %v193_v6 }
  0x6f   :  { %165 = vadd.xlane.f32.xlu2 %v196_v12 }
  0x79   :  { %v195_v39 = vpop.xlane.xlu2 %194 }
  0x7a   :  { %v183_v34 = vpop.xlane.xlu0 %182 }
  0x7b   :  { %205 = vxpose.xlu0.b32.start [1/8] (short) (narrow) %v183_v34, 8 }
  0x81   :  { %v198_v40 = vpop.xlane.xlu2 %197 }
  0x82   :  { %v186_v35 = vpop.xlane.xlu0 %185 }
  0x83   :  { %206 = vxpose.xlu0.b32.cont [2/8] (short) (narrow) %v186_v35, 8 }
  0x87   :  { %372 = vperm.xlu2 %2694, %v2957_v16  }
  0x89   :  { %v3061_v43 = vpop.xlane.xlu2 %150 }
  0x8a   :  { %v201_v41 = vpop.xlane.xlu0 %200 }
  0x8d   :  { %2693 = vset.pattern.permute.xlu1 %v2856_v23 }
  0x8f   :  { %380 = vperm.xlu2 %2694, %v2969_v18  }
  0x91   :  { %v154_v45 = vpop.xlane.xlu2 %153 }
  0x97   :  { %2696 = vset.pattern.permute.xlu2 %v2855_v15 }
  0x99   :  { %v318_v53 = vpop.permute.xlu2 %317 }
  0x9a   :  { %188 = vadd.xlane.f32.xlu1 %v155_v27 }
  0x9d   :  { %v3063_v46 = vpop.permute.xlu0 %368 }
  0xa2   :  { %191 = vadd.xlane.f32.xlu1 %v190_v31 }
  0xa6   :  { %v294_v36 = vpop.trf.xlu1 }
  0xa7   :  { %v3067_v48 = vperm.slane %v294_v36, 0  ;;  %v3072_v56 = vperm.slane %v294_v36, 1 }
  0xa8   :  { %v117_v44 = vpop.f32.mrf.mxu0 }
  0xa9   :  { %v352_v58 = vsub.f32 %v318_v53, %v3067_v48  ;;  %v246_v30 = vmul.f32 2.0, %v117_v44 }
  0xaa   :  { %203 = vadd.xlane.f32.xlu1 %v202_v33 }
  0xab   :  { %v401_v63 = vmul.f32 %v352_v58, %v352_v58 }
  0xb0   :  { %v120_v49 = vpop.f32.mrf.mxu0 }
  0xb1   :  { %v247_v51 = vmul.f32 2.0, %v120_v49 }
  0xb8   :  { %168 = vadd.xlane.f32.xlu2 %v199_v24 }
  0xc3   :  { %360 = vperm.xlu1 %2693, %v2906_v0  }
  0xcb   :  { %364 = vperm.xlu1 %2693, %v2940_v10  }
  0xd0   :  { %332 = vperm.xlu2 %2696, %v2963_v17  }
  0xd2   :  { %v157_v12 = vpop.xlane.xlu2 %156 }
  0xd3   :  { %2695 = vset.pattern.permute.xlu1 %v2855_v15 }
  0xd8   :  { %342 = vperm.xlu2 %2696, %v2975_v19  }
  0xda   :  { %v163_v13 = vpop.xlane.xlu2 %162 }
  0xe0   :  { %2698 = vset.pattern.permute.xlu2 %v2856_v23 }
  0xe1   :  { %388 = vperm.xlu2 %2698, %v2982_v20  }
  0xf5   :  { %159 = vadd.xlane.f32.xlu1 %v190_v31 }
 0x10d   :  { %v189_v37 = vpop.xlane.xlu1 %188 }
 0x10e   :  { %337 = vperm.xlu1 %2695, %v2969_v18   ;;  %207 = vxpose.xlu0.b32.cont [3/8] (short) (narrow) %v189_v37, 8 }
 0x115   :  { %v192_v38 = vpop.xlane.xlu1 %191 }
 0x116   :  { %208 = vxpose.xlu0.b32.cont [4/8] (short) (narrow) %v192_v38, 8 }
 0x11d   :  { %v204_v42 = vpop.xlane.xlu1 %203 }
 0x11e   :  { %209 = vxpose.xlu0.b32.cont [5/8] (short) (narrow) %v195_v39, 8 }
 0x126   :  { %210 = vxpose.xlu0.b32.cont [6/8] (short) (narrow) %v198_v40, 8 }
 0x12e   :  { %211 = vxpose.xlu0.b32.cont [7/8] (short) (narrow) %v201_v41, 8 }
 0x135   :  { %v3065_v47 = vpop.permute.xlu1 %360 }
 0x136   :  { %212 = vxpose.xlu0.b32.end [8/8] (short) (narrow) %v204_v42, 8  ;;  %v392_v39 = vsub.f32 %v3065_v47, %v3072_v56  ;;  %v394_v47 = vsub.f32 %v3063_v46, %v3072_v56 }
 0x138   :  { %171 = vadd.xlane.f32.xlu1 %v202_v33  ;;  %v416_v49 = vmul.f32 %v392_v39, %v392_v39 }
 0x13d   :  { %v365_v54 = vpop.permute.xlu1 %364 }
 0x13e   :  { %v393_v59 = vsub.f32 %v365_v54, %v3072_v56 }
 0x140   :  { %v417_v1 = vmul.f32 %v393_v59, %v393_v59  ;;  %v440_v59 = vadd.s32 40, %v3077_v61 }
 0x142   :  { %vm481_vm4 = vcmp.eq.s32.totalorder %v440_v59, %v3083_v3 }
 0x168   :  { %v160_v21 = vpop.xlane.xlu1 %159 }
 0x1a2   :  { %v221_v50 = vpop.trf.xlu0 }
 0x1a3   :  { %v3069_v52 = vperm.slane %v221_v50, 0 }
 0x1a4   :  { %376 = vperm.xlu0 %2692, %v2963_v17   ;;  %v166_v17 = vpop.xlane.xlu2 %165 }
 0x1a5   :  { %v239_v57 = vadd.f32 %v3069_v52, %v154_v45  ;;  %v238_v31 = vadd.f32 %v3069_v52, %v3061_v43  ;;  %v240_v43 = vadd.f32 %v3069_v52, %v157_v12 }
 0x1a7   :  { %v255_v60 = vsub.f32 %v239_v57, %v247_v51  ;;  %v254_v35 = vsub.f32 %v238_v31, %v246_v30  ;;  %v242_v51 = vadd.f32 %v3069_v52, %v163_v13 }
 0x1a9   :  { %v3079_v62 = vmax.f32 %v255_v60, 0.0  ;;  %v3119_v44 = vmax.f32 %v254_v35, 0.0 }
 0x1ab   :  { %5227 = vst [vmem:[#allocation5_spill] sm:$0xff] %v3079_v62  ;;  %v409_v2 = vadd.f32 %v401_v63, %v3079_v62 }
 0x1ac   :  { %384 = vperm.xlu0 %2692, %v2975_v19   ;;  %5229 = vst [vmem:[#allocation7_spill] sm:$0xff] %v3119_v44 }
 0x1ad   :  { %v425_v5 = vadd.f32 %v417_v1, %v409_v2 }
 0x1af   :  { %v461_v6 = vand.u32 4294967232, %v425_v5 }
 0x1b1   :  { %v469_v7 = vor.u32 %v461_v6, %v3083_v3 }
 0x1b3   :  { %v3088_v8 = vsel %vm477_vm1, 2147483647, %v469_v7  ;;  %v241_v7 = vadd.f32 %v3069_v52, %v160_v21 }
 0x1b4   :  { %2697 = vset.pattern.permute.xlu0 %v2855_v15  ;;  %v3093_v9 = vsel %vm492_vm2, %v3088_v8, 2147483647  ;;  %v123_v15 = vpop.f32.mrf.mxu0 }
 0x1b5   :  { %312 = vperm.xlu0 %2697, %v2906_v0   ;;  %v510_v10 = vshra.s32 %v3093_v9, 16  ;;  %v3104_v0 = vpop.permute.xlu2 %372  ;;  %v248_v42 = vmul.f32 2.0, %v123_v15 }
 0x1b7   :  { %v3097_v11 = vcvt.s32.f32 %v510_v10  ;;  %v256_v57 = vsub.f32 %v240_v43, %v248_v42 }
 0x1b9   :  { %513 = vmin.xlane.f32.xlu2 %v3097_v11  ;;  %v3134_v12 = vmax.f32 %v256_v57, 0.0 }
 0x1bb   :  { %5230 = vst [vmem:[#allocation8_spill] sm:$0xff] %v3134_v12 }
 0x1bc   :  { %v126_v18 = vpop.f32.mrf.mxu0 }
 0x1bd   :  { %322 = vperm.xlu0 %2697, %v2950_v14   ;;  %v381_v22 = vpop.permute.xlu2 %380  ;;  %v243_v14 = vadd.f32 %v3069_v52, %v166_v17  ;;  %v249_v6 = vmul.f32 2.0, %v126_v18  ;;  %v418_v18 = vmul.f32 %v394_v47, %v394_v47 }
 0x1be   :  { %v397_v32 = vsub.f32 %v381_v22, %v3072_v56 }
 0x1c0   :  { %v421_v36 = vmul.f32 %v397_v32, %v397_v32  ;;  %v395_v32 = vsub.f32 %v3104_v0, %v3072_v56 }
 0x1c4   :  { %v129_v19 = vpop.f32.mrf.mxu0 }
 0x1c5   :  { %327 = vperm.xlu0 %2697, %v2957_v16   ;;  %v338_v16 = vpop.permute.xlu1 %337  ;;  %v169_v27 = vpop.xlane.xlu2 %168  ;;  %v250_v50 = vmul.f32 2.0, %v129_v19 }
 0x1c6   :  { %v244_v17 = vadd.f32 %v3069_v52, %v169_v27 }
 0x1c7   :  { %v258_v1 = vsub.f32 %v242_v51, %v250_v50 }
 0x1c9   :  { %v3139_v22 = vmax.f32 %v258_v1, 0.0 }
 0x1cb   :  { %5231 = vst [vmem:[#allocation9_spill] sm:$0xff] %v3139_v22 }
 0x1cc   :  { %v132_v25 = vpop.f32.mrf.mxu0 }
 0x1cd   :  { %347 = vperm.xlu0 %2697, %v2982_v20   ;;  %v251_v26 = vmul.f32 2.0, %v132_v25  ;;  %v333_v37 = vpop.permute.xlu2 %332 }
 0x1ce   :  { %v355_v60 = vsub.f32 %v333_v37, %v3067_v48 }
 0x1cf   :  { %v259_v20 = vsub.f32 %v243_v14, %v251_v26  ;;  %v257_v14 = vsub.f32 %v241_v7, %v249_v6 }
 0x1d0   :  { %v404_v26 = vmul.f32 %v355_v60, %v355_v60 }
 0x1d1   :  { %v3110_v29 = vmax.f32 %v259_v20, 0.0  ;;  %v3159_v39 = vmax.f32 %v257_v14, 0.0  ;;  %v441_v14 = vadd.s32 48, %v3077_v61 }
 0x1d3   :  { %5228 = vst [vmem:[#allocation6_spill] sm:$0xff] %v3110_v29  ;;  %vm482_vm9 = vcmp.eq.s32.totalorder %v441_v14, %v3083_v3 }
 0x1d4   :  { %v135_v63 = vpop.f32.mrf.mxu0  ;;  %5232 = vst [vmem:[#allocation10_spill] sm:$0xff] %v3159_v39 }
 0x1d5   :  { %2779 = vset.pattern.permute.xlu0 %v2856_v23  ;;  %v356_v23 = vsub.f32 %v338_v16, %v3067_v48  ;;  %v343_v5 = vpop.permute.xlu2 %342  ;;  %v252_v19 = vmul.f32 2.0, %v135_v63  ;;  %v437_v16 = vadd.s32 16, %v3077_v61  ;;  %v439_v63 = vadd.s32 32, %v3077_v61 }
 0x1d7   :  { %v405_v33 = vmul.f32 %v356_v23, %v356_v23  ;;  %v260_v31 = vsub.f32 %v244_v17, %v252_v19  ;;  %vm478_vm5 = vcmp.eq.s32.totalorder %v437_v16, %v3083_v3  ;;  %vm480_vm7 = vcmp.eq.s32.totalorder %v439_v63, %v3083_v3 }
 0x1d9   :  { %v413_v34 = vadd.f32 %v405_v33, %v3110_v29  ;;  %v3170_v50 = vmax.f32 %v260_v31, 0.0 }
 0x1db   :  { %v429_v41 = vadd.f32 %v421_v36, %v413_v34  ;;  %v412_v34 = vadd.f32 %v404_v26, %v3139_v22  ;;  %5233 = vst [vmem:[#allocation11_spill] sm:$0xff] %v3170_v50 }
 0x1dd   :  { %v465_v54 = vand.u32 4294967232, %v429_v41  ;;  %v389_v43 = vpop.permute.xlu2 %388 }
 0x1df   :  { %v473_v10 = vor.u32 %v465_v54, %v3083_v3 }
 0x1e1   :  { %v3150_v30 = vsel %vm481_vm4, 2147483647, %v473_v10 }
 0x216   :  { %v377_v24 = vpop.permute.xlu0 %376 }
 0x217   :  { %v396_v46 = vsub.f32 %v377_v24, %v3072_v56 }
 0x219   :  { %v420_v20 = vmul.f32 %v396_v46, %v396_v46 }
 0x21b   :  { %v428_v41 = vadd.f32 %v420_v20, %v412_v34 }
 0x21d   :  { %v464_v47 = vand.u32 4294967232, %v428_v41 }
 0x21e   :  { %v3107_v28 = vpop.permute.xlu0 %384 }
 0x21f   :  { %v398_v0 = vsub.f32 %v3107_v28, %v3072_v56  ;;  %v438_v28 = vadd.s32 24, %v3077_v61  ;;  %v472_v6 = vor.u32 %v464_v47, %v3083_v3 }
 0x221   :  { %vm479_vm6 = vcmp.eq.s32.totalorder %v438_v28, %v3083_v3 }
 0x227   :  { %v313_v38 = vpop.permute.xlu0 %312 }
 0x228   :  { %v351_v40 = vsub.f32 %v313_v38, %v3067_v48  ;;  %v357_v38 = vsub.f32 %v343_v5, %v3067_v48 }
 0x22a   :  { %v400_v45 = vmul.f32 %v351_v40, %v351_v40  ;;  %v3164_v40 = vsel %vm492_vm2, %v3150_v30, 2147483647 }
 0x22b   :  { %v570_v54 = vshra.s32 %v3164_v40, 16 }
 0x22c   :  { %v408_v53 = vadd.f32 %v400_v45, %v3119_v44  ;;  %v3193_v46 = vpop.xlane.xlu2 %513 }
 0x22d   :  { %v3186_v5 = vcvt.s32.f32 %v570_v54  ;;  %vm515_vm8 = vcmp.eq.f32.partialorder %v3097_v11, %v3193_v46  ;;  %v520_v14 = vcvt.f32.s32 %v3193_v46 }
 0x22e   :  { %v424_v55 = vadd.f32 %v416_v49, %v408_v53  ;;  %v419_v49 = vmul.f32 %v395_v32, %v395_v32 }
 0x22f   :  { %v323_v58 = vpop.permute.xlu0 %322 }
 0x230   :  { %v460_v2 = vand.u32 4294967232, %v424_v55  ;;  %v353_v4 = vsub.f32 %v323_v58, %v3067_v48  ;;  %v406_v55 = vmul.f32 %v357_v38, %v357_v38  ;;  %v422_v58 = vmul.f32 %v398_v0, %v398_v0 }
 0x232   :  { %v402_v13 = vmul.f32 %v353_v4, %v353_v4  ;;  %v468_v15 = vor.u32 %v460_v2, %v3083_v3  ;;  %v414_v1 = vadd.f32 %v406_v55, %v3170_v50 }
 0x234   :  { %v410_v21 = vadd.f32 %v402_v13, %v3134_v12  ;;  %v3142_v25 = vsel %vm476_vm3, 2147483647, %v468_v15  ;;  %v430_v7 = vadd.f32 %v422_v58, %v414_v1  ;;  %v509_v13 = vand.u32 65535, %v3093_v9 }
 0x235   :  { %v3146_v24 = vsel %vm492_vm2, %v3142_v25, 2147483647 }
 0x236   :  { %v426_v27 = vadd.f32 %v418_v18, %v410_v21  ;;  %v495_v23 = vshra.s32 %v3146_v24, 16  ;;  %v466_v19 = vand.u32 4294967232, %v430_v7  ;;  %v3203_v21 = vsel %vm480_vm7, 2147483647, %v472_v6 }
 0x237   :  { %v328_v33 = vpop.permute.xlu0 %327  ;;  %v511_v26 = vcvt.s32.f32 %v509_v13  ;;  %v3208_v9 = vsel %vm492_vm2, %v3203_v21, 2147483647 }
 0x238   :  { %v462_v35 = vand.u32 4294967232, %v426_v27  ;;  %v354_v36 = vsub.f32 %v328_v33, %v3067_v48  ;;  %v3156_v37 = vcvt.s32.f32 %v495_v23  ;;  %v474_v27 = vor.u32 %v466_v19, %v3083_v3 }
 0x239   :  { %v516_v20 = vsel %vm515_vm8, %v511_v26, inf  ;;  %v555_v23 = vshra.s32 %v3208_v9, 16 }
 0x23a   :  { %v403_v42 = vmul.f32 %v354_v36, %v354_v36  ;;  %498 = vmin.xlane.f32.xlu0 %v3156_v37  ;;  %v470_v45 = vor.u32 %v462_v35, %v3083_v3  ;;  %v3213_v11 = vsel %vm482_vm9, 2147483647, %v474_v27  ;;  %v172_v35 = vpop.xlane.xlu1 %171  ;;  %v138_v36 = vpop.f32.mrf.mxu0 }
 0x23b   :  { %v557_v31 = vcvt.s32.f32 %v555_v23  ;;  %v3217_v32 = vsel %vm492_vm2, %v3213_v11, 2147483647  ;;  %v245_v41 = vadd.f32 %v3069_v52, %v172_v35  ;;  %v253_v0 = vmul.f32 2.0, %v138_v36 }
 0x23c   :  { %v411_v51 = vadd.f32 %v403_v42, %v3159_v39  ;;  %v3173_v53 = vsel %vm478_vm5, 2147483647, %v470_v45  ;;  %v585_v33 = vshra.s32 %v3217_v32, 16  ;;  %v494_v52 = vand.u32 65535, %v3146_v24 }
 0x23d   :  { %v3178_v57 = vsel %vm492_vm2, %v3173_v53, 2147483647  ;;  %v261_v45 = vsub.f32 %v245_v41, %v253_v0  ;;  %v554_v23 = vand.u32 65535, %v3208_v9  ;;  %v584_v46 = vand.u32 65535, %v3217_v32 }
 0x23e   :  { %v427_v59 = vadd.f32 %v419_v49, %v411_v51  ;;  %v525_v60 = vshra.s32 %v3178_v57, 16  ;;  %v3220_v34 = vcvt.s32.f32 %v585_v33  ;;  %v399_v51 = vsub.f32 %v389_v43, %v3072_v56 }
 0x23f   :  { %v348_v38 = vpop.permute.xlu0 %347  ;;  %v3226_v54 = vmax.f32 %v261_v45, 0.0  ;;  %v496_v1 = vcvt.s32.f32 %v494_v52  ;;  %v586_v36 = vcvt.s32.f32 %v584_v46 }
 0x240   :  { %v463_v2 = vand.u32 4294967232, %v427_v59  ;;  %v3184_v4 = vcvt.s32.f32 %v525_v60  ;;  %v358_v42 = vsub.f32 %v348_v38, %v3067_v48  ;;  %v423_v28 = vmul.f32 %v399_v51, %v399_v51 }
 0x241   :  { %5234 = vst [vmem:[#allocation12_spill] sm:$0xff] %v3226_v54  ;;  %v442_v59 = vadd.s32 56, %v3077_v61 }
 0x242   :  { %528 = vmin.xlane.f32.xlu1 %v3184_v4  ;;  %573 = vmin.xlane.f32.xlu0 %v3186_v5  ;;  %v471_v10 = vor.u32 %v463_v2, %v3083_v3  ;;  %v407_v49 = vmul.f32 %v358_v42, %v358_v42  ;;  %v524_v2 = vand.u32 65535, %v3178_v57 }
 0x243   :  { %vm483_vm10 = vcmp.eq.s32.totalorder %v442_v59, %v3083_v3 }
 0x244   :  { %v3197_v15 = vsel %vm479_vm6, 2147483647, %v471_v10  ;;  %v415_v55 = vadd.f32 %v407_v49, %v3226_v54  ;;  %v526_v24 = vcvt.s32.f32 %v524_v2 }
 0x245   :  { %v538_v17 = vsel %vm492_vm2, %v3197_v15, 2147483647 }
 0x246   :  { %v540_v18 = vshra.s32 %v538_v17, 16  ;;  %v431_v47 = vadd.f32 %v423_v28, %v415_v55  ;;  %v539_v13 = vand.u32 65535, %v538_v17  ;;  %v521_v17 = vshll.u32 %v520_v14, 16 }
 0x248   :  { %v542_v16 = vcvt.s32.f32 %v540_v18  ;;  %v467_v58 = vand.u32 4294967232, %v431_v47  ;;  %v541_v18 = vcvt.s32.f32 %v539_v13 }
 0x24a   :  { %543 = vmin.xlane.f32.xlu1 %v542_v16  ;;  %517 = vmin.xlane.f32.xlu0 %v516_v20  ;;  %v475_v60 = vor.u32 %v467_v58, %v3083_v3 }
 0x24c   :  { %v3233_v48 = vsel %vm483_vm10, 2147483647, %v475_v60 }
 0x24d   :  { %v598_v43 = vsel %vm492_vm2, %v3233_v48, 2147483647 }
 0x24e   :  { %v600_v61 = vshra.s32 %v598_v43, 16  ;;  %v599_v55 = vand.u32 65535, %v598_v43 }
 0x250   :  { %v602_v3 = vcvt.s32.f32 %v600_v61  ;;  %v601_v60 = vcvt.s32.f32 %v599_v55 }
 0x252   :  { %558 = vmin.xlane.f32.xlu1 %v557_v31 }
 0x25a   :  { %588 = vmin.xlane.f32.xlu1 %v3220_v34 }
 0x2ad   :  { %v499_v63 = vpop.xlane.xlu0 %498 }
 0x2ae   :  { %vm500_vm11 = vcmp.eq.f32.partialorder %v3156_v37, %v499_v63  ;;  %v569_v37 = vand.u32 65535, %v3164_v40  ;;  %v505_v0 = vcvt.f32.s32 %v499_v63 }
 0x2af   :  { %v501_v56 = vsel %vm500_vm11, %v496_v1, inf }
 0x2b0   :  { %502 = vmin.xlane.f32.xlu2 %v501_v56  ;;  %v571_v57 = vcvt.s32.f32 %v569_v37  ;;  %v506_v45 = vshll.u32 %v505_v0, 16 }
 0x2b5   :  { %v529_v6 = vpop.xlane.xlu1 %528  ;;  %v3239_v7 = vpop.xlane.xlu0 %573 }
 0x2b6   :  { %vm530_vm12 = vcmp.eq.f32.partialorder %v3184_v4, %v529_v6  ;;  %vm575_vm13 = vcmp.eq.f32.partialorder %v3186_v5, %v3239_v7  ;;  %v556_v5 = vcvt.s32.f32 %v554_v23  ;;  %v580_v61 = vcvt.f32.s32 %v3239_v7 }
 0x2b7   :  { %v531_v10 = vsel %vm530_vm12, %v526_v24, inf  ;;  %v576_v27 = vsel %vm575_vm13, %v571_v57, inf }
 0x2b8   :  { %532 = vmin.xlane.f32.xlu1 %v531_v10  ;;  %603 = vmin.xlane.f32.xlu2 %v602_v3 }
 0x2bd   :  { %v544_v19 = vpop.xlane.xlu1 %543  ;;  %v518_v26 = vpop.xlane.xlu0 %517 }
 0x2be   :  { %vm545_vm14 = vcmp.eq.f32.partialorder %v542_v16, %v544_v19  ;;  %v519_v4 = vcvt.f32.s32 %v518_v26 }
 0x2bf   :  { %v546_v20 = vsel %vm545_vm14, %v541_v18, inf  ;;  %v581_v18 = vshll.u32 %v580_v61, 16 }
 0x2c0   :  { %547 = vmin.xlane.f32.xlu0 %v546_v20  ;;  %577 = vmin.xlane.f32.xlu1 %v576_v27  ;;  %v3247_v33 = vadd.s32 %v521_v17, %v519_v4 }
 0x2c2   :  { %vm614_vm1 = vcmp.eq.s32.totalorder %v3088_v8, %v3247_v33 }
 0x2c3   :  { %v3259_v16 = vsel %vm614_vm1, 2147483647, %v3088_v8 }
 0x2c4   :  { %v3267_v38 = vsel %vm492_vm2, %v3259_v16, 2147483647 }
 0x2c5   :  { %v3249_v40 = vpop.xlane.xlu1 %558  ;;  %v646_v32 = vshra.s32 %v3267_v38, 16 }
 0x2c6   :  { %vm560_vm15 = vcmp.eq.f32.partialorder %v557_v31, %v3249_v40  ;;  %v565_v27 = vcvt.f32.s32 %v3249_v40 }
 0x2c7   :  { %v561_v35 = vsel %vm560_vm15, %v556_v5, inf  ;;  %v3270_v41 = vcvt.s32.f32 %v646_v32 }
 0x2c8   :  { %562 = vmin.xlane.f32.xlu2 %v561_v35 }
 0x2cd   :  { %v3261_v9 = vpop.xlane.xlu1 %588 }
 0x2ce   :  { %vm590_vm3 = vcmp.eq.f32.partialorder %v3220_v34, %v3261_v9  ;;  %v535_v34 = vcvt.f32.s32 %v529_v6  ;;  %v550_v6 = vcvt.f32.s32 %v544_v19 }
 0x2cf   :  { %v591_v31 = vsel %vm590_vm3, %v586_v36, inf  ;;  %v566_v36 = vshll.u32 %v565_v27, 16 }
 0x2d0   :  { %592 = vmin.xlane.f32.xlu0 %v591_v31  ;;  %v536_v63 = vshll.u32 %v535_v34, 16  ;;  %v551_v7 = vshll.u32 %v550_v6, 16 }
 0x2d8   :  { %649 = vmin.xlane.f32.xlu0 %v3270_v41 }
 0x323   :  { %v503_v42 = vpop.xlane.xlu2 %502 }
 0x324   :  { %v504_v49 = vcvt.f32.s32 %v503_v42 }
 0x326   :  { %v3273_v51 = vadd.s32 %v506_v45, %v504_v49  ;;  %v595_v45 = vcvt.f32.s32 %v3261_v9  ;;  %v645_v9 = vand.u32 65535, %v3267_v38 }
 0x328   :  { %vm613_vm4 = vcmp.eq.s32.totalorder %v3142_v25, %v3273_v51 }
 0x329   :  { %v3281_v28 = vsel %vm613_vm4, 2147483647, %v3142_v25 }
 0x32a   :  { %v3285_v47 = vsel %vm492_vm2, %v3281_v28, 2147483647 }
 0x32b   :  { %v533_v58 = vpop.xlane.xlu1 %532  ;;  %v3287_v59 = vpop.xlane.xlu2 %603  ;;  %v631_v52 = vshra.s32 %v3285_v47, 16 }
 0x32c   :  { %v534_v1 = vcvt.f32.s32 %v533_v58  ;;  %vm605_vm5 = vcmp.eq.f32.partialorder %v602_v3, %v3287_v59  ;;  %v610_v38 = vcvt.f32.s32 %v3287_v59 }
 0x32d   :  { %v606_v56 = vsel %vm605_vm5, %v601_v60, inf  ;;  %v3291_v43 = vcvt.s32.f32 %v631_v52  ;;  %v596_v60 = vshll.u32 %v595_v45, 16 }
 0x32e   :  { %v3293_v2 = vadd.s32 %v536_v63, %v534_v1  ;;  %607 = vmin.xlane.f32.xlu2 %v606_v56 }
 0x32f   :  { %634 = vmin.xlane.f32.xlu1 %v3291_v43 }
 0x330   :  { %vm615_vm6 = vcmp.eq.s32.totalorder %v3173_v53, %v3293_v2 }
 0x331   :  { %v3303_v24 = vsel %vm615_vm6, 2147483647, %v3173_v53 }
 0x332   :  { %v3307_v3 = vsel %vm492_vm2, %v3303_v24, 2147483647 }
 0x333   :  { %v548_v10 = vpop.xlane.xlu0 %547  ;;  %v578_v13 = vpop.xlane.xlu1 %577  ;;  %v661_v37 = vshra.s32 %v3307_v3, 16 }
 0x334   :  { %v549_v19 = vcvt.f32.s32 %v548_v10  ;;  %v579_v57 = vcvt.f32.s32 %v578_v13  ;;  %v647_v10 = vcvt.s32.f32 %v645_v9 }
 0x335   :  { %v3310_v26 = vcvt.s32.f32 %v661_v37 }
 0x336   :  { %v3312_v14 = vadd.s32 %v551_v7, %v549_v19  ;;  %v3314_v20 = vadd.s32 %v581_v18, %v579_v57  ;;  %v630_v7 = vand.u32 65535, %v3285_v47  ;;  %v611_v57 = vshll.u32 %v610_v38, 16 }
 0x337   :  { %664 = vmin.xlane.f32.xlu2 %v3310_v26 }
 0x338   :  { %vm616_vm7 = vcmp.eq.s32.totalorder %v3197_v15, %v3312_v14  ;;  %vm618_vm8 = vcmp.eq.s32.totalorder %v3150_v30, %v3314_v20 }
 0x339   :  { %v3326_v4 = vsel %vm616_vm7, 2147483647, %v3197_v15  ;;  %v3332_v23 = vsel %vm618_vm8, 2147483647, %v3150_v30 }
 0x33a   :  { %v674_v17 = vsel %vm492_vm2, %v3326_v4, 2147483647  ;;  %v704_v40 = vsel %vm492_vm2, %v3332_v23, 2147483647 }
 0x33b   :  { %v563_v5 = vpop.xlane.xlu2 %562  ;;  %v676_v35 = vshra.s32 %v674_v17, 16  ;;  %v706_v46 = vshra.s32 %v704_v40, 16 }
 0x33c   :  { %v564_v31 = vcvt.f32.s32 %v563_v5 }
 0x33d   :  { %v678_v32 = vcvt.s32.f32 %v676_v35  ;;  %v708_v0 = vcvt.s32.f32 %v706_v46  ;;  %v632_v35 = vcvt.s32.f32 %v630_v7 }
 0x33e   :  { %v3338_v42 = vadd.s32 %v566_v36, %v564_v31 }
 0x33f   :  { %679 = vmin.xlane.f32.xlu1 %v678_v32  ;;  %709 = vmin.xlane.f32.xlu2 %v708_v0 }
 0x340   :  { %vm5226_vm9 = vcmp.eq.s32.totalorder %v3203_v21, %v3338_v42 }
 0x341   :  { %v3347_v49 = vsel %vm5226_vm9, 2147483647, %v3203_v21 }
 0x342   :  { %v689_v55 = vsel %vm492_vm2, %v3347_v49, 2147483647 }
 0x343   :  { %v593_v34 = vpop.xlane.xlu0 %592  ;;  %v691_v58 = vshra.s32 %v689_v55, 16 }
 0x344   :  { %v594_v52 = vcvt.f32.s32 %v593_v34 }
 0x345   :  { %v693_v63 = vcvt.s32.f32 %v691_v58 }
 0x346   :  { %v3351_v1 = vadd.s32 %v596_v60, %v594_v52  ;;  %v675_v60 = vand.u32 65535, %v674_v17 }
 0x347   :  { %694 = vmin.xlane.f32.xlu0 %v693_v63 }
 0x348   :  { %vm5220_vm10 = vcmp.eq.s32.totalorder %v3213_v11, %v3351_v1 }
 0x349   :  { %v3360_v56 = vsel %vm5220_vm10, 2147483647, %v3213_v11 }
 0x34a   :  { %v719_v61 = vsel %vm492_vm2, %v3360_v56, 2147483647 }
 0x34b   :  { %v650_v6 = vpop.xlane.xlu0 %649  ;;  %v721_v13 = vshra.s32 %v719_v61, 16 }
 0x34c   :  { %vm651_vm11 = vcmp.eq.f32.partialorder %v3270_v41, %v650_v6  ;;  %v660_v41 = vand.u32 65535, %v3307_v3  ;;  %v705_v3 = vand.u32 65535, %v704_v40  ;;  %v656_v40 = vcvt.f32.s32 %v650_v6 }
 0x34d   :  { %v652_v37 = vsel %vm651_vm11, %v647_v10, inf  ;;  %v723_v18 = vcvt.s32.f32 %v721_v13  ;;  %v677_v10 = vcvt.s32.f32 %v675_v60 }
 0x34e   :  { %653 = vmin.xlane.f32.xlu2 %v652_v37  ;;  %v662_v45 = vcvt.s32.f32 %v660_v41  ;;  %v707_v13 = vcvt.s32.f32 %v705_v3 }
 0x34f   :  { %724 = vmin.xlane.f32.xlu0 %v723_v18 }
 0x3a1   :  { %v608_v19 = vpop.xlane.xlu2 %607 }
 0x3a2   :  { %v609_v27 = vcvt.f32.s32 %v608_v19  ;;  %v635_v5 = vpop.xlane.xlu1 %634 }
 0x3a3   :  { %vm636_vm12 = vcmp.eq.f32.partialorder %v3291_v43, %v635_v5 }
 0x3a4   :  { %v3368_v46 = vadd.s32 %v611_v57, %v609_v27  ;;  %v637_v36 = vsel %vm636_vm12, %v632_v35, inf  ;;  %v720_v57 = vand.u32 65535, %v719_v61  ;;  %v657_v35 = vshll.u32 %v656_v40, 16 }
 0x3a5   :  { %638 = vmin.xlane.f32.xlu1 %v637_v36 }
 0x3a6   :  { %5235 = vst [vmem:[#allocation13_spill] sm:$0xff] %v3368_v46  ;;  %vm5213_vm13 = vcmp.eq.s32.totalorder %v3233_v48, %v3368_v46 }
 0x3a7   :  { %v3377_v47 = vsel %vm5213_vm13, 2147483647, %v3233_v48 }
 0x3a8   :  { %v734_v59 = vsel %vm492_vm2, %v3377_v47, 2147483647 }
 0x3a9   :  { %v736_v31 = vshra.s32 %v734_v59, 16 }
 0x3aa   :  { %v665_v43 = vpop.xlane.xlu2 %664 }
 0x3ab   :  { %v738_v34 = vcvt.s32.f32 %v736_v31  ;;  %vm666_vm14 = vcmp.eq.f32.partialorder %v3310_v26, %v665_v43  ;;  %v690_v26 = vand.u32 65535, %v689_v55  ;;  %v641_v31 = vcvt.f32.s32 %v635_v5 }
 0x3ac   :  { %v667_v58 = vsel %vm666_vm14, %v662_v45, inf }
 0x3ad   :  { %739 = vmin.xlane.f32.xlu1 %v738_v34  ;;  %668 = vmin.xlane.f32.xlu0 %v667_v58  ;;  %v692_v19 = vcvt.s32.f32 %v690_v26  ;;  %v642_v58 = vshll.u32 %v641_v31, 16 }
 0x3b2   :  { %v3382_v52 = vpop.xlane.xlu1 %679  ;;  %v3384_v9 = vpop.xlane.xlu2 %709 }
 0x3b3   :  { %vm681_vm15 = vcmp.eq.f32.partialorder %v678_v32, %v3382_v52  ;;  %vm711_vm3 = vcmp.eq.f32.partialorder %v708_v0, %v3384_v9  ;;  %v722_v0 = vcvt.s32.f32 %v720_v57 }
 0x3b4   :  { %v682_v37 = vsel %vm681_vm15, %v677_v10, inf  ;;  %v712_v38 = vsel %vm711_vm3, %v707_v13, inf  ;;  %v735_v10 = vand.u32 65535, %v734_v59  ;;  %v671_v13 = vcvt.f32.s32 %v665_v43 }
 0x3b5   :  { %683 = vmin.xlane.f32.xlu2 %v682_v37  ;;  %713 = vmin.xlane.f32.xlu0 %v712_v38 }
 0x3b6   :  { %v672_v43 = vshll.u32 %v671_v13, 16 }
 0x3ba   :  { %v3388_v7 = vpop.xlane.xlu0 %694 }
 0x3bb   :  { %vm696_vm5 = vcmp.eq.f32.partialorder %v693_v63, %v3388_v7 }
 0x3bc   :  { %v697_v17 = vsel %vm696_vm5, %v692_v19, inf  ;;  %v737_v19 = vcvt.s32.f32 %v735_v10 }
 0x3bd   :  { %698 = vmin.xlane.f32.xlu1 %v697_v17 }
 0x3c1   :  { %v654_v27 = vpop.xlane.xlu2 %653 }
 0x3c2   :  { %v655_v36 = vcvt.f32.s32 %v654_v27  ;;  %v3391_v32 = vpop.xlane.xlu0 %724 }
 0x3c3   :  { %vm726_vm11 = vcmp.eq.f32.partialorder %v723_v18, %v3391_v32 }
 0x3c4   :  { %v3394_v41 = vadd.s32 %v657_v35, %v655_v36  ;;  %v727_v55 = vsel %vm726_vm11, %v722_v0, inf  ;;  %v686_v35 = vcvt.f32.s32 %v3382_v52  ;;  %v716_v36 = vcvt.f32.s32 %v3384_v9 }
 0x3c5   :  { %728 = vmin.xlane.f32.xlu2 %v727_v55 }
 0x3c6   :  { %vm750_vm12 = vcmp.eq.s32.totalorder %v3259_v16, %v3394_v41  ;;  %v687_v52 = vshll.u32 %v686_v35, 16 }
 0x3c7   :  { %v3402_v63 = vsel %vm750_vm12, 2147483647, %v3259_v16 }
 0x3c8   :  { %v3406_v61 = vsel %vm492_vm2, %v3402_v63, 2147483647 }
 0x3c9   :  { %v790_v6 = vshra.s32 %v3406_v61, 16 }
 0x3cb   :  { %v3409_v18 = vcvt.s32.f32 %v790_v6 }
 0x3cd   :  { %793 = vmin.xlane.f32.xlu2 %v3409_v18 }
 0x418   :  { %v639_v45 = vpop.xlane.xlu1 %638 }
 0x419   :  { %v640_v60 = vcvt.f32.s32 %v639_v45  ;;  %v717_v45 = vshll.u32 %v716_v36, 16 }
 0x41b   :  { %v3412_v3 = vadd.s32 %v642_v58, %v640_v60 }
 0x41d   :  { %vm749_vm14 = vcmp.eq.s32.totalorder %v3281_v28, %v3412_v3 }
 0x41e   :  { %v3420_v37 = vsel %vm749_vm14, 2147483647, %v3281_v28 }
 0x41f   :  { %v3424_v38 = vsel %vm492_vm2, %v3420_v37, 2147483647 }
 0x420   :  { %v3426_v5 = vpop.xlane.xlu1 %739  ;;  %v669_v26 = vpop.xlane.xlu0 %668  ;;  %v775_v59 = vshra.s32 %v3424_v38, 16  ;;  %v774_v22 = vand.u32 65535, %v3424_v38 }
 0x421   :  { %v670_v17 = vcvt.f32.s32 %v669_v26  ;;  %vm741_vm15 = vcmp.eq.f32.partialorder %v738_v34, %v3426_v5  ;;  %v701_v26 = vcvt.f32.s32 %v3388_v7 }
 0x422   :  { %v742_v40 = vsel %vm741_vm15, %v737_v19, inf  ;;  %v3430_v57 = vcvt.s32.f32 %v775_v59  ;;  %v776_v62 = vcvt.s32.f32 %v774_v22 }
 0x423   :  { %v3432_v27 = vadd.s32 %v672_v43, %v670_v17  ;;  %743 = vmin.xlane.f32.xlu1 %v742_v40  ;;  %v702_v36 = vshll.u32 %v701_v26, 16 }
 0x424   :  { %778 = vmin.xlane.f32.xlu0 %v3430_v57 }
 0x425   :  { %vm751_vm3 = vcmp.eq.s32.totalorder %v3303_v24, %v3432_v27 }
 0x426   :  { %v3443_v34 = vsel %vm751_vm3, 2147483647, %v3303_v24 }
 0x427   :  { %v3447_v0 = vsel %vm492_vm2, %v3443_v34, 2147483647 }
 0x428   :  { %v714_v55 = vpop.xlane.xlu0 %713  ;;  %v684_v6 = vpop.xlane.xlu2 %683  ;;  %v805_v31 = vshra.s32 %v3447_v0, 16 }
 0x429   :  { %v715_v9 = vcvt.f32.s32 %v714_v55  ;;  %v685_v58 = vcvt.f32.s32 %v684_v6 }
 0x42a   :  { %v3450_v60 = vcvt.s32.f32 %v805_v31 }
 0x42b   :  { %v3452_v10 = vadd.s32 %v717_v45, %v715_v9  ;;  %v3454_v13 = vadd.s32 %v687_v52, %v685_v58  ;;  %v731_v45 = vcvt.f32.s32 %v3391_v32  ;;  %v789_v32 = vand.u32 65535, %v3406_v61 }
 0x42c   :  { %808 = vmin.xlane.f32.xlu1 %v3450_v60  ;;  %v746_v61 = vcvt.f32.s32 %v3426_v5 }
 0x42d   :  { %vm754_vm5 = vcmp.eq.s32.totalorder %v3332_v23, %v3452_v10  ;;  %vm752_vm11 = vcmp.eq.s32.totalorder %v3326_v4, %v3454_v13 }
 0x42e   :  { %v3466_v19 = vsel %vm754_vm5, 2147483647, %v3332_v23  ;;  %v3472_v59 = vsel %vm752_vm11, 2147483647, %v3326_v4  ;;  %v747_v29 = vshll.u32 %v746_v61, 16 }
 0x42f   :  { %v848_v7 = vsel %vm492_vm2, %v3466_v19, 2147483647  ;;  %v818_v43 = vsel %vm492_vm2, %v3472_v59, 2147483647 }
 0x430   :  { %v699_v17 = vpop.xlane.xlu1 %698  ;;  %v850_v40 = vshra.s32 %v848_v7, 16  ;;  %v820_v35 = vshra.s32 %v818_v43, 16 }
 0x431   :  { %v700_v55 = vcvt.f32.s32 %v699_v17 }
 0x432   :  { %v852_v6 = vcvt.s32.f32 %v850_v40  ;;  %v822_v31 = vcvt.s32.f32 %v820_v35  ;;  %v732_v40 = vshll.u32 %v731_v45, 16 }
 0x433   :  { %v3478_v52 = vadd.s32 %v702_v36, %v700_v55 }
 0x434   :  { %853 = vmin.xlane.f32.xlu1 %v852_v6  ;;  %823 = vmin.xlane.f32.xlu0 %v822_v31 }
 0x435   :  { %vm753_vm15 = vcmp.eq.s32.totalorder %v3347_v49, %v3478_v52 }
 0x436   :  { %v3487_v9 = vsel %vm753_vm15, 2147483647, %v3347_v49 }
 0x437   :  { %v833_v58 = vsel %vm492_vm2, %v3487_v9, 2147483647 }
 0x438   :  { %v729_v26 = vpop.xlane.xlu2 %728  ;;  %v835_v17 = vshra.s32 %v833_v58, 16 }
 0x439   :  { %v730_v35 = vcvt.f32.s32 %v729_v26  ;;  %v791_v26 = vcvt.s32.f32 %v789_v32 }
 0x43a   :  { %v837_v36 = vcvt.s32.f32 %v835_v17 }
 0x43b   :  { %v3491_v55 = vadd.s32 %v732_v40, %v730_v35 }
 0x43c   :  { %838 = vmin.xlane.f32.xlu2 %v837_v36 }
 0x43d   :  { %vm5223_vm0 = vcmp.eq.s32.totalorder %v3360_v56, %v3491_v55 }
 0x43e   :  { %v3500_v54 = vsel %vm5223_vm0, 2147483647, %v3360_v56 }
 0x43f   :  { %v863_v50 = vsel %vm492_vm2, %v3500_v54, 2147483647 }
 0x440   :  { %v794_v45 = vpop.xlane.xlu2 %793  ;;  %v865_v17 = vshra.s32 %v863_v50, 16 }
 0x441   :  { %vm795_vm13 = vcmp.eq.f32.partialorder %v3409_v18, %v794_v45  ;;  %v804_v18 = vand.u32 65535, %v3447_v0  ;;  %v819_v0 = vand.u32 65535, %v818_v43  ;;  %v800_v43 = vcvt.f32.s32 %v794_v45 }
 0x442   :  { %v796_v40 = vsel %vm795_vm13, %v791_v26, inf  ;;  %v867_v35 = vcvt.s32.f32 %v865_v17 }
 0x443   :  { %797 = vmin.xlane.f32.xlu1 %v796_v40  ;;  %v821_v61 = vcvt.s32.f32 %v819_v0  ;;  %v801_v0 = vshll.u32 %v800_v43, 16 }
 0x444   :  { %868 = vmin.xlane.f32.xlu2 %v867_v35 }
 0x496   :  { %v744_v39 = vpop.xlane.xlu1 %743 }
 0x497   :  { %v745_v12 = vcvt.f32.s32 %v744_v39  ;;  %v779_v44 = vpop.xlane.xlu0 %778 }
 0x498   :  { %vm780_vm10 = vcmp.eq.f32.partialorder %v3430_v57, %v779_v44  ;;  %v849_v57 = vand.u32 65535, %v848_v7  ;;  %v785_v8 = vcvt.f32.s32 %v779_v44 }
 0x499   :  { %v3508_v46 = vadd.s32 %v747_v29, %v745_v12  ;;  %v781_v32 = vsel %vm780_vm10, %v776_v62, inf  ;;  %v806_v29 = vcvt.s32.f32 %v804_v18 }
 0x49a   :  { %782 = vmin.xlane.f32.xlu0 %v781_v32  ;;  %v851_v40 = vcvt.s32.f32 %v849_v57  ;;  %v786_v41 = vshll.u32 %v785_v8, 16 }
 0x49b   :  { %vm5222_vm13 = vcmp.eq.s32.totalorder %v3377_v47, %v3508_v46 }
 0x49c   :  { %v3517_v38 = vsel %vm5222_vm13, 2147483647, %v3377_v47 }
 0x49d   :  { %5236 = vst [vmem:[#allocation14_spill] sm:$0xff] %v3517_v38  ;;  %v878_v22 = vsel %vm492_vm2, %v3517_v38, 2147483647 }
 0x49e   :  { %v880_v39 = vshra.s32 %v878_v22, 16 }
 0x49f   :  { %v809_v5 = vpop.xlane.xlu1 %808 }
 0x4a0   :  { %v882_v12 = vcvt.s32.f32 %v880_v39  ;;  %vm810_vm10 = vcmp.eq.f32.partialorder %v3450_v60, %v809_v5  ;;  %v834_v60 = vand.u32 65535, %v833_v58 }
 0x4a1   :  { %v811_v62 = vsel %vm810_vm10, %v806_v29, inf }
 0x4a2   :  { %883 = vmin.xlane.f32.xlu0 %v882_v12  ;;  %812 = vmin.xlane.f32.xlu2 %v811_v62  ;;  %v836_v29 = vcvt.s32.f32 %v834_v60  ;;  %v864_v62 = vand.u32 65535, %v863_v50 }
 0x4a7   :  { %v3522_v26 = vpop.xlane.xlu1 %853  ;;  %v3524_v17 = vpop.xlane.xlu0 %823 }
 0x4a8   :  { %vm855_vm13 = vcmp.eq.f32.partialorder %v852_v6, %v3522_v26  ;;  %vm825_vm0 = vcmp.eq.f32.partialorder %v822_v31, %v3524_v17  ;;  %v866_v31 = vcvt.s32.f32 %v864_v62  ;;  %v860_v43 = vcvt.f32.s32 %v3522_v26 }
 0x4a9   :  { %v856_v32 = vsel %vm855_vm13, %v851_v40, inf  ;;  %v826_v18 = vsel %vm825_vm0, %v821_v61, inf  ;;  %vm758_vm13 = vmor %vm614_vm1, %vm750_vm12  ;;  %v830_v62 = vcvt.f32.s32 %v3524_v17 }
 0x4aa   :  { %857 = vmin.xlane.f32.xlu2 %v856_v32  ;;  %827 = vmin.xlane.f32.xlu1 %v826_v18  ;;  %vm757_vm1 = vmor %vm613_vm4, %vm749_vm14  ;;  %v815_v32 = vcvt.f32.s32 %v809_v5  ;;  %v861_v26 = vshll.u32 %v860_v43, 16 }
 0x4ab   :  { %vm759_vm14 = vmor %vm615_vm6, %vm751_vm3 }
 0x4ac   :  { %v816_v51 = vshll.u32 %v815_v32, 16  ;;  %vm760_vm6 = vmor %vm616_vm7, %vm752_vm11 }
 0x4af   :  { %v3528_v39 = vpop.xlane.xlu2 %838 }
 0x4b0   :  { %vm840_vm10 = vcmp.eq.f32.partialorder %v837_v36, %v3528_v39 }
 0x4b1   :  { %v841_v7 = vsel %vm840_vm10, %v836_v29, inf }
 0x4b2   :  { %842 = vmin.xlane.f32.xlu0 %v841_v7 }
 0x4b6   :  { %v798_v57 = vpop.xlane.xlu1 %797 }
 0x4b7   :  { %v799_v38 = vcvt.f32.s32 %v798_v57  ;;  %v3531_v6 = vpop.xlane.xlu2 %868 }
 0x4b8   :  { %vm870_vm0 = vcmp.eq.f32.partialorder %v867_v35, %v3531_v6 }
 0x4b9   :  { %v802_v40 = vadd.s32 %v801_v0, %v799_v38  ;;  %v871_v61 = vsel %vm870_vm0, %v866_v31, inf  ;;  %v879_v38 = vand.u32 65535, %v878_v22  ;;  %v831_v0 = vshll.u32 %v830_v62, 16 }
 0x4ba   :  { %872 = vmin.xlane.f32.xlu1 %v871_v61 }
 0x4bb   :  { %vm894_vm10 = vcmp.eq.s32.totalorder %v3402_v63, %v802_v40  ;;  %v881_v3 = vcvt.s32.f32 %v879_v38 }
 0x4bc   :  { %v3542_v50 = vsel %vm894_vm10, 2147483647, %v3402_v63  ;;  %vm3544_vm9 = vmor %vm758_vm13, %vm894_vm10 }
 0x4bd   :  { %v3550_v36 = vsel %vm492_vm2, %v3542_v50, 2147483647 }
 0x4be   :  { %v934_v45 = vshra.s32 %v3550_v36, 16 }
 0x4c0   :  { %v3553_v16 = vcvt.s32.f32 %v934_v45  ;;  %v845_v45 = vcvt.f32.s32 %v3528_v39 }
 0x4c2   :  { %937 = vmin.xlane.f32.xlu1 %v3553_v16  ;;  %v846_v39 = vshll.u32 %v845_v45, 16 }
 0x50d   :  { %v783_v33 = vpop.xlane.xlu0 %782 }
 0x50e   :  { %v784_v35 = vcvt.f32.s32 %v783_v33 }
 0x510   :  { %v787_v63 = vadd.s32 %v786_v41, %v784_v35  ;;  %v875_v35 = vcvt.f32.s32 %v3531_v6  ;;  %v933_v6 = vand.u32 65535, %v3550_v36 }
 0x512   :  { %vm893_vm12 = vcmp.eq.s32.totalorder %v3420_v37, %v787_v63  ;;  %v876_v52 = vshll.u32 %v875_v35, 16 }
 0x513   :  { %v3564_v18 = vsel %vm893_vm12, 2147483647, %v3420_v37  ;;  %vm3566_vm0 = vmor %vm757_vm1, %vm893_vm12 }
 0x514   :  { %v3572_v22 = vsel %vm492_vm2, %v3564_v18, 2147483647  ;;  %vm762_vm1 = vmor %vm618_vm8, %vm754_vm5  ;;  %vm5247_vm8 = vcmp.eq.s32.totalorder %v3203_v21, %v3338_v42 }
 0x515   :  { %v3574_v60 = vpop.xlane.xlu0 %883  ;;  %v813_v28 = vpop.xlane.xlu2 %812  ;;  %v919_v25 = vshra.s32 %v3572_v22, 16  ;;  %vm761_vm5 = vmor %vm5247_vm8, %vm753_vm15  ;;  %vm5250_vm15 = vcmp.eq.s32.totalorder %v3360_v56, %v3491_v55  ;;  %v918_v55 = vand.u32 65535, %v3572_v22 }
 0x516   :  { %v814_v5 = vcvt.f32.s32 %v813_v28  ;;  %vm885_vm4 = vcmp.eq.f32.partialorder %v882_v12, %v3574_v60 }
 0x517   :  { %v886_v37 = vsel %vm885_vm4, %v881_v3, inf  ;;  %v3578_v29 = vcvt.s32.f32 %v919_v25 }
 0x518   :  { %v817_v7 = vadd.s32 %v816_v51, %v814_v5  ;;  %887 = vmin.xlane.f32.xlu0 %v886_v37  ;;  %v935_v5 = vcvt.s32.f32 %v933_v6 }
 0x519   :  { %922 = vmin.xlane.f32.xlu2 %v3578_v29 }
 0x51a   :  { %vm895_vm13 = vcmp.eq.s32.totalorder %v3443_v34, %v817_v7 }
 0x51b   :  { %v3591_v12 = vsel %vm895_vm13, 2147483647, %v3443_v34  ;;  %vm3593_vm10 = vmor %vm759_vm14, %vm895_vm13  ;;  %vm5251_vm13 = vcmp.eq.s32.totalorder %v3213_v11, %v3351_v1  ;;  %v890_v1 = vcvt.f32.s32 %v3574_v60  ;;  %v5257_v60 = vld [vmem:[#allocation14_spill] sm:$0xff] }
 0x51c   :  { %v3599_v24 = vsel %vm492_vm2, %v3591_v12, 2147483647 }
 0x51d   :  { %v828_v27 = vpop.xlane.xlu1 %827  ;;  %v858_v53 = vpop.xlane.xlu2 %857  ;;  %v949_v2 = vshra.s32 %v3599_v24, 16  ;;  %v891_v43 = vshll.u32 %v890_v1, 16  ;;  %v948_v22 = vand.u32 65535, %v3599_v24 }
 0x51e   :  { %v829_v17 = vcvt.f32.s32 %v828_v27  ;;  %v859_v31 = vcvt.f32.s32 %v858_v53  ;;  %v920_v27 = vcvt.s32.f32 %v918_v55 }
 0x51f   :  { %v3602_v40 = vcvt.s32.f32 %v949_v2 }
 0x520   :  { %v832_v34 = vadd.s32 %v831_v0, %v829_v17  ;;  %v862_v61 = vadd.s32 %v861_v26, %v859_v31 }
 0x521   :  { %952 = vmin.xlane.f32.xlu0 %v3602_v40 }
 0x522   :  { %vm896_vm3 = vcmp.eq.s32.totalorder %v3472_v59, %v832_v34  ;;  %vm898_vm12 = vcmp.eq.s32.totalorder %v3466_v19, %v862_v61 }
 0x523   :  { %vm3620_vm4 = vmor %vm762_vm1, %vm898_vm12  ;;  %v3625_v15 = vsel %vm896_vm3, 2147483647, %v3472_v59  ;;  %v3628_v14 = vsel %vm898_vm12, 2147483647, %v3466_v19 }
 0x524   :  { %v3632_v13 = vsel %vm492_vm2, %v3625_v15, 2147483647  ;;  %v3636_v30 = vsel %vm492_vm2, %v3628_v14, 2147483647  ;;  %vm3638_vm7 = vmor %vm760_vm6, %vm896_vm3 }
 0x525   :  { %v843_v23 = vpop.xlane.xlu0 %842  ;;  %v964_v10 = vshra.s32 %v3632_v13, 16  ;;  %v994_v59 = vshra.s32 %v3636_v30, 16  ;;  %vm763_vm6 = vmor %vm5251_vm13, %vm5250_vm15  ;;  %v993_v24 = vand.u32 65535, %v3636_v30  ;;  %v963_v34 = vand.u32 65535, %v3632_v13 }
 0x526   :  { %v844_v19 = vcvt.f32.s32 %v843_v23 }
 0x527   :  { %v3644_v8 = vcvt.s32.f32 %v964_v10  ;;  %v3646_v33 = vcvt.s32.f32 %v994_v59  ;;  %v995_v23 = vcvt.s32.f32 %v993_v24  ;;  %v965_v10 = vcvt.s32.f32 %v963_v34 }
 0x528   :  { %v847_v41 = vadd.s32 %v846_v39, %v844_v19 }
 0x529   :  { %967 = vmin.xlane.f32.xlu2 %v3644_v8  ;;  %997 = vmin.xlane.f32.xlu0 %v3646_v33 }
 0x52a   :  { %vm897_vm11 = vcmp.eq.s32.totalorder %v3487_v9, %v847_v41 }
 0x52b   :  { %v3659_v63 = vsel %vm897_vm11, 2147483647, %v3487_v9  ;;  %vm3661_vm14 = vmor %vm761_vm5, %vm897_vm11  ;;  %vm5254_vm5 = vcmp.eq.s32.totalorder %v3377_v47, %v3508_v46  ;;  %v950_v47 = vcvt.s32.f32 %v948_v22 }
 0x52c   :  { %v977_v32 = vsel %vm492_vm2, %v3659_v63, 2147483647 }
 0x52d   :  { %v873_v28 = vpop.xlane.xlu1 %872  ;;  %v979_v49 = vshra.s32 %v977_v32, 16  ;;  %v978_v39 = vand.u32 65535, %v977_v32 }
 0x52e   :  { %v874_v3 = vcvt.f32.s32 %v873_v28 }
 0x52f   :  { %v981_v21 = vcvt.s32.f32 %v979_v49  ;;  %v980_v13 = vcvt.s32.f32 %v978_v39 }
 0x530   :  { %v877_v42 = vadd.s32 %v876_v52, %v874_v3 }
 0x531   :  { %982 = vmin.xlane.f32.xlu1 %v981_v21 }
 0x532   :  { %vm899_vm3 = vcmp.eq.s32.totalorder %v3500_v54, %v877_v42 }
 0x533   :  { %vm3675_vm1 = vmor %vm763_vm6, %vm899_vm3  ;;  %v3680_v25 = vsel %vm899_vm3, 2147483647, %v3500_v54 }
 0x534   :  { %v1007_v51 = vsel %vm492_vm2, %v3680_v25, 2147483647 }
 0x535   :  { %v938_v36 = vpop.xlane.xlu1 %937  ;;  %v1009_v37 = vshra.s32 %v1007_v51, 16  ;;  %v1008_v35 = vand.u32 65535, %v1007_v51 }
 0x536   :  { %vm939_vm12 = vcmp.eq.f32.partialorder %v3553_v16, %v938_v36  ;;  %v5255_v16 = vld [vmem:[#allocation13_spill] sm:$0xff]  ;;  %v944_v41 = vcvt.f32.s32 %v938_v36 }
 0x537   :  { %v940_v56 = vsel %vm939_vm12, %v935_v5, inf  ;;  %v1011_v11 = vcvt.s32.f32 %v1009_v37  ;;  %vm5256_vm11 = vcmp.eq.s32.totalorder %v3233_v48, %v5255_v16 }
 0x538   :  { %941 = vmin.xlane.f32.xlu0 %v940_v56  ;;  %vm764_vm15 = vmor %vm5256_vm11, %vm5254_vm5  ;;  %v945_v49 = vshll.u32 %v944_v41, 16 }
 0x539   :  { %1012 = vmin.xlane.f32.xlu1 %v1011_v11 }
 0x58b   :  { %v888_v7 = vpop.xlane.xlu0 %887 }
 0x58c   :  { %v889_v54 = vcvt.f32.s32 %v888_v7  ;;  %v923_v62 = vpop.xlane.xlu2 %922 }
 0x58d   :  { %vm924_vm8 = vcmp.eq.f32.partialorder %v3578_v29, %v923_v62  ;;  %v929_v5 = vcvt.f32.s32 %v923_v62 }
 0x58e   :  { %v892_v53 = vadd.s32 %v891_v43, %v889_v54  ;;  %v925_v2 = vsel %vm924_vm8, %v920_v27, inf }
 0x58f   :  { %926 = vmin.xlane.f32.xlu2 %v925_v2  ;;  %v930_v58 = vshll.u32 %v929_v5, 16 }
 0x590   :  { %vm900_vm13 = vcmp.eq.s32.totalorder %v5257_v60, %v892_v53 }
 0x591   :  { %vm3696_vm6 = vmor %vm764_vm15, %vm900_vm13  ;;  %v3701_v29 = vsel %vm900_vm13, 2147483647, %v5257_v60 }
 0x592   :  { %v1022_v0 = vsel %vm492_vm2, %v3701_v29, 2147483647 }
 0x593   :  { %v1024_v17 = vshra.s32 %v1022_v0, 16  ;;  %v1023_v1 = vand.u32 65535, %v1022_v0 }
 0x594   :  { %v953_v46 = vpop.xlane.xlu0 %952 }
 0x595   :  { %vm954_vm3 = vcmp.eq.f32.partialorder %v3602_v40, %v953_v46  ;;  %v1026_v48 = vcvt.s32.f32 %v1024_v17  ;;  %v959_v55 = vcvt.f32.s32 %v953_v46  ;;  %v1025_v27 = vcvt.s32.f32 %v1023_v1 }
 0x596   :  { %v955_v31 = vsel %vm954_vm3, %v950_v47, inf }
 0x597   :  { %956 = vmin.xlane.f32.xlu1 %v955_v31  ;;  %1027 = vmin.xlane.f32.xlu2 %v1026_v48  ;;  %v960_v2 = vshll.u32 %v959_v55, 16 }
 0x59c   :  { %v3708_v61 = vpop.xlane.xlu0 %997  ;;  %v3710_v45 = vpop.xlane.xlu2 %967 }
 0x59d   :  { %vm999_vm12 = vcmp.eq.f32.partialorder %v3646_v33, %v3708_v61  ;;  %vm969_vm8 = vcmp.eq.f32.partialorder %v3644_v8, %v3710_v45  ;;  %v1010_v8 = vcvt.s32.f32 %v1008_v35  ;;  %v974_v0 = vcvt.f32.s32 %v3710_v45 }
 0x59e   :  { %v1000_v40 = vsel %vm999_vm12, %v995_v23, inf  ;;  %v970_v59 = vsel %vm969_vm8, %v965_v10, inf }
 0x59f   :  { %1001 = vmin.xlane.f32.xlu1 %v1000_v40  ;;  %971 = vmin.xlane.f32.xlu0 %v970_v59 }
 0x5a4   :  { %v3716_v30 = vpop.xlane.xlu1 %982 }
 0x5a5   :  { %vm984_vm5 = vcmp.eq.f32.partialorder %v981_v21, %v3716_v30 }
 0x5a6   :  { %v985_v19 = vsel %vm984_vm5, %v980_v13, inf }
 0x5a7   :  { %986 = vmin.xlane.f32.xlu2 %v985_v19 }
 0x5ab   :  { %v942_v28 = vpop.xlane.xlu0 %941 }
 0x5ac   :  { %v943_v33 = vcvt.f32.s32 %v942_v28  ;;  %v3719_v52 = vpop.xlane.xlu1 %1012 }
 0x5ad   :  { %vm1014_vm11 = vcmp.eq.f32.partialorder %v1011_v11, %v3719_v52 }
 0x5ae   :  { %v946_v3 = vadd.s32 %v945_v49, %v943_v33  ;;  %v1015_v42 = vsel %vm1014_vm11, %v1010_v8, inf  ;;  %v1019_v8 = vcvt.f32.s32 %v3719_v52 }
 0x5af   :  { %1016 = vmin.xlane.f32.xlu0 %v1015_v42 }
 0x5b0   :  { %vm1038_vm15 = vcmp.eq.s32.totalorder %v3542_v50, %v946_v3 }
 0x5b1   :  { %vm3725_vm13 = vmor %vm3544_vm9, %vm1038_vm15  ;;  %v3730_v21 = vsel %vm1038_vm15, 2147483647, %v3542_v50 }
 0x5b2   :  { %v3734_v6 = vsel %vm492_vm2, %v3730_v21, 2147483647 }
 0x5b3   :  { %v1078_v51 = vshra.s32 %v3734_v6, 16  ;;  %v1077_v1 = vand.u32 65535, %v3734_v6 }
 0x5b5   :  { %v3737_v36 = vcvt.s32.f32 %v1078_v51 }
 0x5b7   :  { %1081 = vmin.xlane.f32.xlu0 %v3737_v36 }
 0x602   :  { %v927_v37 = vpop.xlane.xlu2 %926 }
 0x603   :  { %v928_v56 = vcvt.f32.s32 %v927_v37 }
 0x605   :  { %v931_v11 = vadd.s32 %v930_v58, %v928_v56  ;;  %v1020_v58 = vshll.u32 %v1019_v8, 16 }
 0x607   :  { %vm1037_vm9 = vcmp.eq.s32.totalorder %v3564_v18, %v931_v11 }
 0x608   :  { %vm3743_vm3 = vmor %vm3566_vm0, %vm1037_vm9  ;;  %v3748_v7 = vsel %vm1037_vm9, 2147483647, %v3564_v18  ;;  %v1004_v18 = vcvt.f32.s32 %v3708_v61  ;;  %v975_v61 = vshll.u32 %v974_v0, 16 }
 0x609   :  { %v3752_v43 = vsel %vm492_vm2, %v3748_v7, 2147483647 }
 0x60a   :  { %v957_v54 = vpop.xlane.xlu1 %956  ;;  %v3754_v62 = vpop.xlane.xlu2 %1027  ;;  %v1063_v53 = vshra.s32 %v3752_v43, 16  ;;  %v1005_v34 = vshll.u32 %v1004_v18, 16 }
 0x60b   :  { %v958_v16 = vcvt.f32.s32 %v957_v54  ;;  %vm1029_vm0 = vcmp.eq.f32.partialorder %v1026_v48, %v3754_v62  ;;  %v1034_v9 = vcvt.f32.s32 %v3754_v62 }
 0x60c   :  { %v1030_v44 = vsel %vm1029_vm0, %v1025_v27, inf  ;;  %v3758_v60 = vcvt.s32.f32 %v1063_v53  ;;  %v1079_v27 = vcvt.s32.f32 %v1077_v1 }
 0x60d   :  { %v961_v22 = vadd.s32 %v960_v2, %v958_v16  ;;  %1031 = vmin.xlane.f32.xlu2 %v1030_v44  ;;  %v1062_v16 = vand.u32 65535, %v3752_v43 }
 0x60e   :  { %1066 = vmin.xlane.f32.xlu1 %v3758_v60 }
 0x60f   :  { %vm1039_vm12 = vcmp.eq.s32.totalorder %v3591_v12, %v961_v22  ;;  %v1035_v22 = vshll.u32 %v1034_v9, 16  ;;  %v1064_v0 = vcvt.s32.f32 %v1062_v16 }
 0x610   :  { %vm3766_vm8 = vmor %vm3593_vm10, %vm1039_vm12  ;;  %v3771_v46 = vsel %vm1039_vm12, 2147483647, %v3591_v12  ;;  %v989_v12 = vcvt.f32.s32 %v3716_v30 }
 0x611   :  { %v3775_v47 = vsel %vm492_vm2, %v3771_v46, 2147483647 }
 0x612   :  { %v1002_v48 = vpop.xlane.xlu1 %1001  ;;  %v972_v31 = vpop.xlane.xlu0 %971  ;;  %v1093_v24 = vshra.s32 %v3775_v47, 16  ;;  %v990_v35 = vshll.u32 %v989_v12, 16 }
 0x613   :  { %v1003_v45 = vcvt.f32.s32 %v1002_v48  ;;  %v973_v23 = vcvt.f32.s32 %v972_v31 }
 0x614   :  { %v3778_v57 = vcvt.s32.f32 %v1093_v24 }
 0x615   :  { %v1006_v10 = vadd.s32 %v1005_v34, %v1003_v45  ;;  %v976_v40 = vadd.s32 %v975_v61, %v973_v23 }
 0x616   :  { %1096 = vmin.xlane.f32.xlu2 %v3778_v57 }
 0x617   :  { %vm1042_vm10 = vcmp.eq.s32.totalorder %v3628_v14, %v1006_v10  ;;  %vm1040_vm5 = vcmp.eq.s32.totalorder %v3625_v15, %v976_v40 }
 0x618   :  { %vm3786_vm11 = vmor %vm3620_vm4, %vm1042_vm10  ;;  %v3791_v39 = vsel %vm1040_vm5, 2147483647, %v3625_v15  ;;  %v3794_v13 = vsel %vm1042_vm10, 2147483647, %v3628_v14 }
 0x619   :  { %vm3798_vm15 = vmor %vm3638_vm7, %vm1040_vm5  ;;  %v3804_v19 = vsel %vm492_vm2, %v3791_v39, 2147483647  ;;  %v3808_v4 = vsel %vm492_vm2, %v3794_v13, 2147483647 }
 0x61a   :  { %v987_v41 = vpop.xlane.xlu2 %986  ;;  %v1108_v15 = vshra.s32 %v3804_v19, 16  ;;  %v1138_v14 = vshra.s32 %v3808_v4, 16  ;;  %v1107_v26 = vand.u32 65535, %v3804_v19 }
 0x61b   :  { %v988_v28 = vcvt.f32.s32 %v987_v41 }
 0x61c   :  { %v3812_v20 = vcvt.s32.f32 %v1108_v15  ;;  %v3814_v49 = vcvt.s32.f32 %v1138_v14  ;;  %v1109_v40 = vcvt.s32.f32 %v1107_v26 }
 0x61d   :  { %v991_v33 = vadd.s32 %v990_v35, %v988_v28 }
 0x61e   :  { %1111 = vmin.xlane.f32.xlu1 %v3812_v20  ;;  %1141 = vmin.xlane.f32.xlu2 %v3814_v49 }
 0x61f   :  { %vm1041_vm4 = vcmp.eq.s32.totalorder %v3659_v63, %v991_v33 }
 0x620   :  { %vm3822_vm7 = vmor %vm3661_vm14, %vm1041_vm4  ;;  %v3827_v42 = vsel %vm1041_vm4, 2147483647, %v3659_v63 }
 0x621   :  { %v1121_v51 = vsel %vm492_vm2, %v3827_v42, 2147483647 }
 0x622   :  { %v1017_v5 = vpop.xlane.xlu0 %1016  ;;  %v1123_v37 = vshra.s32 %v1121_v51, 16  ;;  %v1122_v15 = vand.u32 65535, %v1121_v51 }
 0x623   :  { %v1018_v56 = vcvt.f32.s32 %v1017_v5 }
 0x624   :  { %v1125_v11 = vcvt.s32.f32 %v1123_v37 }
 0x625   :  { %v1021_v52 = vadd.s32 %v1020_v58, %v1018_v56 }
 0x626   :  { %1126 = vmin.xlane.f32.xlu0 %v1125_v11 }
 0x627   :  { %vm1043_vm14 = vcmp.eq.s32.totalorder %v3680_v25, %v1021_v52 }
 0x628   :  { %vm3835_vm9 = vmor %vm3675_vm1, %vm1043_vm14  ;;  %v3840_v63 = vsel %vm1043_vm14, 2147483647, %v3680_v25 }
 0x629   :  { %v1151_v55 = vsel %vm492_vm2, %v3840_v63, 2147483647 }
 0x62a   :  { %v1082_v54 = vpop.xlane.xlu0 %1081  ;;  %v1153_v53 = vshra.s32 %v1151_v55, 16  ;;  %v1152_v28 = vand.u32 65535, %v1151_v55 }
 0x62b   :  { %vm1083_vm0 = vcmp.eq.f32.partialorder %v3737_v36, %v1082_v54  ;;  %v1092_v36 = vand.u32 65535, %v3775_v47  ;;  %v1137_v47 = vand.u32 65535, %v3808_v4  ;;  %v1124_v4 = vcvt.s32.f32 %v1122_v15 }
 0x62c   :  { %v1084_v6 = vsel %vm1083_vm0, %v1079_v27, inf  ;;  %v1155_v2 = vcvt.s32.f32 %v1153_v53  ;;  %v1088_v35 = vcvt.f32.s32 %v1082_v54 }
 0x62d   :  { %1085 = vmin.xlane.f32.xlu2 %v1084_v6  ;;  %v1094_v61 = vcvt.s32.f32 %v1092_v36  ;;  %v1139_v12 = vcvt.s32.f32 %v1137_v47 }
 0x62e   :  { %1156 = vmin.xlane.f32.xlu0 %v1155_v2  ;;  %v1089_v8 = vshll.u32 %v1088_v35, 16 }
 0x680   :  { %v1032_v44 = vpop.xlane.xlu2 %1031 }
 0x681   :  { %v1033_v25 = vcvt.f32.s32 %v1032_v44  ;;  %v1067_v18 = vpop.xlane.xlu1 %1066 }
 0x682   :  { %vm1068_vm1 = vcmp.eq.f32.partialorder %v3758_v60, %v1067_v18  ;;  %v1073_v55 = vcvt.f32.s32 %v1067_v18 }
 0x683   :  { %v1036_v48 = vadd.s32 %v1035_v22, %v1033_v25  ;;  %v1069_v31 = vsel %vm1068_vm1, %v1064_v0, inf }
 0x684   :  { %1070 = vmin.xlane.f32.xlu1 %v1069_v31  ;;  %v1074_v32 = vshll.u32 %v1073_v55, 16 }
 0x685   :  { %vm1044_vm12 = vcmp.eq.s32.totalorder %v3701_v29, %v1036_v48 }
 0x686   :  { %vm3852_vm10 = vmor %vm3696_vm6, %vm1044_vm12  ;;  %v3857_v43 = vsel %vm1044_vm12, 2147483647, %v3701_v29 }
 0x687   :  { %v1166_v24 = vsel %vm492_vm2, %v3857_v43, 2147483647 }
 0x688   :  { %v1168_v60 = vshra.s32 %v1166_v24, 16  ;;  %v1167_v6 = vand.u32 65535, %v1166_v24 }
 0x689   :  { %v1097_v34 = vpop.xlane.xlu2 %1096 }
 0x68a   :  { %v1170_v45 = vcvt.s32.f32 %v1168_v60  ;;  %vm1098_vm5 = vcmp.eq.f32.partialorder %v3778_v57, %v1097_v34  ;;  %v1169_v25 = vcvt.s32.f32 %v1167_v6 }
 0x68b   :  { %v1099_v23 = vsel %vm1098_vm5, %v1094_v61, inf }
 0x68c   :  { %1171 = vmin.xlane.f32.xlu1 %v1170_v45  ;;  %1100 = vmin.xlane.f32.xlu0 %v1099_v23 }
 0x691   :  { %v3864_v10 = vpop.xlane.xlu1 %1111  ;;  %v3866_v29 = vpop.xlane.xlu2 %1141 }
 0x692   :  { %vm1113_vm6 = vcmp.eq.f32.partialorder %v3812_v20, %v3864_v10  ;;  %vm1143_vm4 = vcmp.eq.f32.partialorder %v3814_v49, %v3866_v29  ;;  %v1154_v49 = vcvt.s32.f32 %v1152_v28  ;;  %v1148_v24 = vcvt.f32.s32 %v3866_v29 }
 0x693   :  { %v1114_v57 = vsel %vm1113_vm6, %v1109_v40, inf  ;;  %v1144_v41 = vsel %vm1143_vm4, %v1139_v12, inf }
 0x694   :  { %1115 = vmin.xlane.f32.xlu2 %v1114_v57  ;;  %1145 = vmin.xlane.f32.xlu0 %v1144_v41 }
 0x699   :  { %v3872_v19 = vpop.xlane.xlu0 %1126 }
 0x69a   :  { %vm1128_vm14 = vcmp.eq.f32.partialorder %v1125_v11, %v3872_v19 }
 0x69b   :  { %v1129_v14 = vsel %vm1128_vm14, %v1124_v4, inf }
 0x69c   :  { %1130 = vmin.xlane.f32.xlu1 %v1129_v14 }
 0x6a0   :  { %v1086_v33 = vpop.xlane.xlu2 %1085 }
 0x6a1   :  { %v1087_v20 = vcvt.f32.s32 %v1086_v33  ;;  %v3875_v5 = vpop.xlane.xlu0 %1156 }
 0x6a2   :  { %vm1158_vm0 = vcmp.eq.f32.partialorder %v1155_v2, %v3875_v5  ;;  %v1103_v2 = vcvt.f32.s32 %v1097_v34 }
 0x6a3   :  { %v1090_v37 = vadd.s32 %v1089_v8, %v1087_v20  ;;  %v1159_v58 = vsel %vm1158_vm0, %v1154_v49, inf  ;;  %v1163_v49 = vcvt.f32.s32 %v3875_v5 }
 0x6a4   :  { %1160 = vmin.xlane.f32.xlu2 %v1159_v58  ;;  %v1104_v0 = vshll.u32 %v1103_v2, 16 }
 0x6a5   :  { %vm1182_vm1 = vcmp.eq.s32.totalorder %v3730_v21, %v1090_v37 }
 0x6a6   :  { %vm3881_vm12 = vmor %vm3725_vm13, %vm1182_vm1  ;;  %v3886_v56 = vsel %vm1182_vm1, 2147483647, %v3730_v21 }
 0x6a7   :  { %v3890_v11 = vsel %vm492_vm2, %v3886_v56, 2147483647 }
 0x6a8   :  { %v1222_v52 = vshra.s32 %v3890_v11, 16  ;;  %v1221_v6 = vand.u32 65535, %v3890_v11 }
 0x6aa   :  { %v3893_v1 = vcvt.s32.f32 %v1222_v52 }
 0x6ac   :  { %1225 = vmin.xlane.f32.xlu2 %v3893_v1 }
 0x6f7   :  { %v1071_v54 = vpop.xlane.xlu1 %1070 }
 0x6f8   :  { %v1072_v27 = vcvt.f32.s32 %v1071_v54 }
 0x6fa   :  { %v1075_v53 = vadd.s32 %v1074_v32, %v1072_v27  ;;  %v1164_v32 = vshll.u32 %v1163_v49, 16 }
 0x6fc   :  { %vm1181_vm13 = vcmp.eq.s32.totalorder %v3748_v7, %v1075_v53 }
 0x6fd   :  { %vm3899_vm5 = vmor %vm3743_vm3, %vm1181_vm13  ;;  %v3904_v9 = vsel %vm1181_vm13, 2147483647, %v3748_v7  ;;  %v1118_v7 = vcvt.f32.s32 %v3864_v10  ;;  %v1149_v10 = vshll.u32 %v1148_v24, 16 }
 0x6fe   :  { %v3908_v16 = vsel %vm492_vm2, %v3904_v9, 2147483647 }
 0x6ff   :  { %v3910_v44 = vpop.xlane.xlu1 %1171  ;;  %v1101_v22 = vpop.xlane.xlu0 %1100  ;;  %v1207_v18 = vshra.s32 %v3908_v16, 16  ;;  %v1119_v47 = vshll.u32 %v1118_v7, 16 }
 0x700   :  { %v1102_v48 = vcvt.f32.s32 %v1101_v22  ;;  %vm1173_vm3 = vcmp.eq.f32.partialorder %v1170_v45, %v3910_v44  ;;  %v1178_v38 = vcvt.f32.s32 %v3910_v44 }
 0x701   :  { %v1174_v50 = vsel %vm1173_vm3, %v1169_v25, inf  ;;  %v3914_v31 = vcvt.s32.f32 %v1207_v18  ;;  %v1223_v25 = vcvt.s32.f32 %v1221_v6 }
 0x702   :  { %v1105_v36 = vadd.s32 %v1104_v0, %v1102_v48  ;;  %1175 = vmin.xlane.f32.xlu1 %v1174_v50  ;;  %v1206_v48 = vand.u32 65535, %v3908_v16 }
 0x703   :  { %1210 = vmin.xlane.f32.xlu0 %v3914_v31 }
 0x704   :  { %vm1183_vm6 = vcmp.eq.s32.totalorder %v3771_v46, %v1105_v36  ;;  %v1179_v36 = vshll.u32 %v1178_v38, 16  ;;  %v1208_v24 = vcvt.s32.f32 %v1206_v48 }
 0x705   :  { %vm3922_vm4 = vmor %vm3766_vm8, %vm1183_vm6  ;;  %v3927_v34 = vsel %vm1183_vm6, 2147483647, %v3771_v46  ;;  %v1133_v46 = vcvt.f32.s32 %v3872_v19 }
 0x706   :  { %v3931_v61 = vsel %vm492_vm2, %v3927_v34, 2147483647 }
 0x707   :  { %v1146_v45 = vpop.xlane.xlu0 %1145  ;;  %v1116_v23 = vpop.xlane.xlu2 %1115  ;;  %v1237_v26 = vshra.s32 %v3931_v61, 16  ;;  %v1134_v28 = vshll.u32 %v1133_v46, 16 }
 0x708   :  { %v1147_v29 = vcvt.f32.s32 %v1146_v45  ;;  %v1117_v40 = vcvt.f32.s32 %v1116_v23 }
 0x709   :  { %v3934_v17 = vcvt.s32.f32 %v1237_v26 }
 0x70a   :  { %v1150_v12 = vadd.s32 %v1149_v10, %v1147_v29  ;;  %v1120_v57 = vadd.s32 %v1119_v47, %v1117_v40 }
 0x70b   :  { %1240 = vmin.xlane.f32.xlu1 %v3934_v17 }
 0x70c   :  { %vm1186_vm8 = vcmp.eq.s32.totalorder %v3794_v13, %v1150_v12  ;;  %vm1184_vm14 = vcmp.eq.s32.totalorder %v3791_v39, %v1120_v57 }
 0x70d   :  { %vm3942_vm0 = vmor %vm3786_vm11, %vm1186_vm8  ;;  %v3947_v15 = vsel %vm1186_vm8, 2147483647, %v3794_v13  ;;  %v3950_v4 = vsel %vm1184_vm14, 2147483647, %v3791_v39 }
 0x70e   :  { %vm3954_vm1 = vmor %vm3798_vm15, %vm1184_vm14  ;;  %v3960_v14 = vsel %vm492_vm2, %v3947_v15, 2147483647  ;;  %v3964_v59 = vsel %vm492_vm2, %v3950_v4, 2147483647 }
 0x70f   :  { %v1131_v35 = vpop.xlane.xlu1 %1130  ;;  %v1282_v13 = vshra.s32 %v3960_v14, 16  ;;  %v1252_v39 = vshra.s32 %v3964_v59, 16  ;;  %v1281_v62 = vand.u32 65535, %v3960_v14 }
 0x710   :  { %v1132_v33 = vcvt.f32.s32 %v1131_v35 }
 0x711   :  { %v3968_v30 = vcvt.s32.f32 %v1282_v13  ;;  %v3970_v8 = vcvt.s32.f32 %v1252_v39  ;;  %v1283_v57 = vcvt.s32.f32 %v1281_v62 }
 0x712   :  { %v1135_v20 = vadd.s32 %v1134_v28, %v1132_v33 }
 0x713   :  { %1285 = vmin.xlane.f32.xlu1 %v3968_v30  ;;  %1255 = vmin.xlane.f32.xlu0 %v3970_v8 }
 0x714   :  { %vm1185_vm11 = vcmp.eq.s32.totalorder %v3827_v42, %v1135_v20 }
 0x715   :  { %vm3978_vm15 = vmor %vm3822_vm7, %vm1185_vm11  ;;  %v3983_v58 = vsel %vm1185_vm11, 2147483647, %v3827_v42 }
 0x716   :  { %v1265_v52 = vsel %vm492_vm2, %v3983_v58, 2147483647 }
 0x717   :  { %v1161_v55 = vpop.xlane.xlu2 %1160  ;;  %v1267_v54 = vshra.s32 %v1265_v52, 16  ;;  %v1266_v13 = vand.u32 65535, %v1265_v52 }
 0x718   :  { %v1162_v27 = vcvt.f32.s32 %v1161_v55 }
 0x719   :  { %v1269_v53 = vcvt.s32.f32 %v1267_v54 }
 0x71a   :  { %v1165_v5 = vadd.s32 %v1164_v32, %v1162_v27 }
 0x71b   :  { %1270 = vmin.xlane.f32.xlu2 %v1269_v53 }
 0x71c   :  { %vm1187_vm7 = vcmp.eq.s32.totalorder %v3840_v63, %v1165_v5 }
 0x71d   :  { %vm3991_vm13 = vmor %vm3835_vm9, %vm1187_vm7  ;;  %v3996_v42 = vsel %vm1187_vm7, 2147483647, %v3840_v63 }
 0x71e   :  { %v1295_v2 = vsel %vm492_vm2, %v3996_v42, 2147483647 }
 0x71f   :  { %v1226_v22 = vpop.xlane.xlu2 %1225  ;;  %v1297_v18 = vshra.s32 %v1295_v2, 16  ;;  %v1296_v33 = vand.u32 65535, %v1295_v2 }
 0x720   :  { %vm1227_vm3 = vcmp.eq.f32.partialorder %v3893_v1, %v1226_v22  ;;  %v1236_v1 = vand.u32 65535, %v3931_v61  ;;  %v1251_v61 = vand.u32 65535, %v3964_v59  ;;  %v1268_v59 = vcvt.s32.f32 %v1266_v13 }
 0x721   :  { %v1228_v11 = vsel %vm1227_vm3, %v1223_v25, inf  ;;  %v1299_v0 = vcvt.s32.f32 %v1297_v18  ;;  %v1232_v28 = vcvt.f32.s32 %v1226_v22 }
 0x722   :  { %1229 = vmin.xlane.f32.xlu1 %v1228_v11  ;;  %v1238_v10 = vcvt.s32.f32 %v1236_v1  ;;  %v1253_v46 = vcvt.s32.f32 %v1251_v61 }
 0x723   :  { %1300 = vmin.xlane.f32.xlu2 %v1299_v0  ;;  %v1233_v49 = vshll.u32 %v1232_v28, 16 }
 0x775   :  { %v1176_v50 = vpop.xlane.xlu1 %1175 }
 0x776   :  { %v1177_v63 = vcvt.f32.s32 %v1176_v50  ;;  %v1211_v7 = vpop.xlane.xlu0 %1210 }
 0x777   :  { %vm1212_vm9 = vcmp.eq.f32.partialorder %v3914_v31, %v1211_v7  ;;  %v1217_v2 = vcvt.f32.s32 %v1211_v7 }
 0x778   :  { %v1180_v45 = vadd.s32 %v1179_v36, %v1177_v63  ;;  %v1213_v23 = vsel %vm1212_vm9, %v1208_v24, inf }
 0x779   :  { %1214 = vmin.xlane.f32.xlu0 %v1213_v23  ;;  %v1218_v51 = vshll.u32 %v1217_v2, 16 }
 0x77a   :  { %vm1188_vm6 = vcmp.eq.s32.totalorder %v3857_v43, %v1180_v45 }
 0x77b   :  { %vm4008_vm8 = vmor %vm3852_vm10, %vm1188_vm6  ;;  %v4013_v16 = vsel %vm1188_vm6, 2147483647, %v3857_v43 }
 0x77c   :  { %v1310_v26 = vsel %vm492_vm2, %v4013_v16, 2147483647 }
 0x77d   :  { %v1312_v31 = vshra.s32 %v1310_v26, 16  ;;  %v1311_v11 = vand.u32 65535, %v1310_v26 }
 0x77e   :  { %v1241_v47 = vpop.xlane.xlu1 %1240 }
 0x77f   :  { %v1314_v29 = vcvt.s32.f32 %v1312_v31  ;;  %vm1242_vm14 = vcmp.eq.f32.partialorder %v3934_v17, %v1241_v47  ;;  %v1313_v63 = vcvt.s32.f32 %v1311_v11 }
 0x780   :  { %v1243_v40 = vsel %vm1242_vm14, %v1238_v10, inf }
 0x781   :  { %1315 = vmin.xlane.f32.xlu0 %v1314_v29  ;;  %1244 = vmin.xlane.f32.xlu2 %v1243_v40 }
 0x786   :  { %v4020_v12 = vpop.xlane.xlu1 %1285  ;;  %v4022_v43 = vpop.xlane.xlu0 %1255 }
 0x787   :  { %vm1287_vm10 = vcmp.eq.f32.partialorder %v3968_v30, %v4020_v12  ;;  %vm1257_vm11 = vcmp.eq.f32.partialorder %v3970_v8, %v4022_v43  ;;  %v1298_v8 = vcvt.s32.f32 %v1296_v33  ;;  %v1262_v26 = vcvt.f32.s32 %v4022_v43 }
 0x788   :  { %v1288_v17 = vsel %vm1287_vm10, %v1283_v57, inf  ;;  %v1258_v35 = vsel %vm1257_vm11, %v1253_v46, inf }
 0x789   :  { %1289 = vmin.xlane.f32.xlu2 %v1288_v17  ;;  %1259 = vmin.xlane.f32.xlu1 %v1258_v35 }
 0x78e   :  { %v4028_v14 = vpop.xlane.xlu2 %1270 }
 0x78f   :  { %vm1272_vm7 = vcmp.eq.f32.partialorder %v1269_v53, %v4028_v14 }
 0x790   :  { %v1273_v39 = vsel %vm1272_vm7, %v1268_v59, inf }
 0x791   :  { %1274 = vmin.xlane.f32.xlu0 %v1273_v39 }
 0x795   :  { %v1230_v20 = vpop.xlane.xlu1 %1229 }
 0x796   :  { %v1231_v30 = vcvt.f32.s32 %v1230_v20  ;;  %v4031_v55 = vpop.xlane.xlu2 %1300 }
 0x797   :  { %vm1302_vm3 = vcmp.eq.f32.partialorder %v1299_v0, %v4031_v55  ;;  %v1247_v0 = vcvt.f32.s32 %v1241_v47 }
 0x798   :  { %v1234_v54 = vadd.s32 %v1233_v49, %v1231_v30  ;;  %v1303_v32 = vsel %vm1302_vm3, %v1298_v8, inf  ;;  %v1307_v8 = vcvt.f32.s32 %v4031_v55 }
 0x799   :  { %1304 = vmin.xlane.f32.xlu1 %v1303_v32  ;;  %v1248_v24 = vshll.u32 %v1247_v0, 16 }
 0x79a   :  { %vm1326_vm9 = vcmp.eq.s32.totalorder %v3886_v56, %v1234_v54 }
 0x79b   :  { %vm4037_vm6 = vmor %vm3881_vm12, %vm1326_vm9  ;;  %v4042_v27 = vsel %vm1326_vm9, 2147483647, %v3886_v56 }
 0x79c   :  { %v4046_v53 = vsel %vm492_vm2, %v4042_v27, 2147483647 }
 0x79d   :  { %v1366_v5 = vshra.s32 %v4046_v53, 16  ;;  %v1365_v11 = vand.u32 65535, %v4046_v53 }
 0x79f   :  { %v4049_v6 = vcvt.s32.f32 %v1366_v5 }
 0x7a1   :  { %1369 = vmin.xlane.f32.xlu1 %v4049_v6 }
 0x7ec   :  { %v1215_v22 = vpop.xlane.xlu0 %1214 }
 0x7ed   :  { %v1216_v25 = vcvt.f32.s32 %v1215_v22 }
 0x7ef   :  { %v1219_v18 = vadd.s32 %v1218_v51, %v1216_v25  ;;  %v1308_v51 = vshll.u32 %v1307_v8, 16 }
 0x7f1   :  { %vm1325_vm12 = vcmp.eq.s32.totalorder %v3904_v9, %v1219_v18 }
 0x7f2   :  { %vm4055_vm14 = vmor %vm3899_vm5, %vm1325_vm12  ;;  %v4060_v38 = vsel %vm1325_vm12, 2147483647, %v3904_v9  ;;  %v1292_v9 = vcvt.f32.s32 %v4020_v12  ;;  %v1263_v12 = vshll.u32 %v1262_v26, 16 }
 0x7f3   :  { %v4064_v48 = vsel %vm492_vm2, %v4060_v38, 2147483647 }
 0x7f4   :  { %v4066_v50 = vpop.xlane.xlu0 %1315  ;;  %v1245_v36 = vpop.xlane.xlu2 %1244  ;;  %v1351_v7 = vshra.s32 %v4064_v48, 16  ;;  %v1293_v61 = vshll.u32 %v1292_v9, 16 }
 0x7f5   :  { %v1246_v45 = vcvt.f32.s32 %v1245_v36  ;;  %vm1317_vm5 = vcmp.eq.f32.partialorder %v1314_v29, %v4066_v50  ;;  %v1322_v3 = vcvt.f32.s32 %v4066_v50 }
 0x7f6   :  { %v1318_v21 = vsel %vm1317_vm5, %v1313_v63, inf  ;;  %v4070_v23 = vcvt.s32.f32 %v1351_v7  ;;  %v1367_v63 = vcvt.s32.f32 %v1365_v11 }
 0x7f7   :  { %v1249_v1 = vadd.s32 %v1248_v24, %v1246_v45  ;;  %1319 = vmin.xlane.f32.xlu0 %v1318_v21  ;;  %v1350_v45 = vand.u32 65535, %v4064_v48 }
 0x7f8   :  { %1354 = vmin.xlane.f32.xlu2 %v4070_v23 }
 0x7f9   :  { %vm1327_vm10 = vcmp.eq.s32.totalorder %v3927_v34, %v1249_v1  ;;  %v1323_v1 = vshll.u32 %v1322_v3, 16  ;;  %v1352_v26 = vcvt.s32.f32 %v1350_v45 }
 0x7fa   :  { %vm4078_vm11 = vmor %vm3922_vm4, %vm1327_vm10  ;;  %v4083_v47 = vsel %vm1327_vm10, 2147483647, %v3927_v34  ;;  %v1277_v34 = vcvt.f32.s32 %v4028_v14 }
 0x7fb   :  { %v4087_v10 = vsel %vm492_vm2, %v4083_v47, 2147483647 }
 0x7fc   :  { %v1260_v29 = vpop.xlane.xlu1 %1259  ;;  %v1290_v40 = vpop.xlane.xlu2 %1289  ;;  %v1381_v62 = vshra.s32 %v4087_v10, 16  ;;  %v1278_v33 = vshll.u32 %v1277_v34, 16 }
 0x7fd   :  { %v1261_v43 = vcvt.f32.s32 %v1260_v29  ;;  %v1291_v57 = vcvt.f32.s32 %v1290_v40 }
 0x7fe   :  { %v4090_v60 = vcvt.s32.f32 %v1381_v62 }
 0x7ff   :  { %v1264_v46 = vadd.s32 %v1263_v12, %v1261_v43  ;;  %v1294_v17 = vadd.s32 %v1293_v61, %v1291_v57 }
 0x800   :  { %1384 = vmin.xlane.f32.xlu0 %v4090_v60 }
 0x801   :  { %vm1328_vm4 = vcmp.eq.s32.totalorder %v3950_v4, %v1264_v46  ;;  %vm1330_vm7 = vcmp.eq.s32.totalorder %v3947_v15, %v1294_v17 }
 0x802   :  { %vm4098_vm3 = vmor %vm3954_vm1, %vm1328_vm4  ;;  %v4103_v13 = vsel %vm1328_vm4, 2147483647, %v3950_v4  ;;  %v4106_v59 = vsel %vm1330_vm7, 2147483647, %v3947_v15 }
 0x803   :  { %vm4110_vm9 = vmor %vm3942_vm0, %vm1330_vm7  ;;  %v4116_v39 = vsel %vm492_vm2, %v4103_v13, 2147483647  ;;  %v4120_v19 = vsel %vm492_vm2, %v4106_v59, 2147483647 }
 0x804   :  { %v1275_v28 = vpop.xlane.xlu0 %1274  ;;  %v1396_v4 = vshra.s32 %v4116_v39, 16  ;;  %v1426_v15 = vshra.s32 %v4120_v19, 16  ;;  %v1425_v44 = vand.u32 65535, %v4120_v19 }
 0x805   :  { %v1276_v20 = vcvt.f32.s32 %v1275_v28 }
 0x806   :  { %v4124_v41 = vcvt.s32.f32 %v1396_v4  ;;  %v1428_v49 = vcvt.s32.f32 %v1426_v15  ;;  %v1427_v17 = vcvt.s32.f32 %v1425_v44 }
 0x807   :  { %v1279_v30 = vadd.s32 %v1278_v33, %v1276_v20 }
 0x808   :  { %1399 = vmin.xlane.f32.xlu2 %v4124_v41  ;;  %1429 = vmin.xlane.f32.xlu0 %v1428_v49 }
 0x809   :  { %vm1329_vm0 = vcmp.eq.s32.totalorder %v3983_v58, %v1279_v30 }
 0x80a   :  { %vm4131_vm1 = vmor %vm3978_vm15, %vm1329_vm0  ;;  %v4136_v32 = vsel %vm1329_vm0, 2147483647, %v3983_v58 }
 0x80b   :  { %v1409_v5 = vsel %vm492_vm2, %v4136_v32, 2147483647 }
 0x80c   :  { %v1305_v2 = vpop.xlane.xlu1 %1304  ;;  %v1411_v22 = vshra.s32 %v1409_v5, 16  ;;  %v1410_v4 = vand.u32 65535, %v1409_v5 }
 0x80d   :  { %v1306_v25 = vcvt.f32.s32 %v1305_v2 }
 0x80e   :  { %v1413_v18 = vcvt.s32.f32 %v1411_v22  ;;  %v1412_v19 = vcvt.s32.f32 %v1410_v4 }
 0x80f   :  { %v1309_v55 = vadd.s32 %v1308_v51, %v1306_v25 }
 0x810   :  { %1414 = vmin.xlane.f32.xlu1 %v1413_v18 }
 0x811   :  { %vm1331_vm15 = vcmp.eq.s32.totalorder %v3996_v42, %v1309_v55 }
 0x812   :  { %vm4144_vm12 = vmor %vm3991_vm13, %vm1331_vm15  ;;  %v4149_v58 = vsel %vm1331_vm15, 2147483647, %v3996_v42 }
 0x813   :  { %v1439_v0 = vsel %vm492_vm2, %v4149_v58, 2147483647 }
 0x814   :  { %v1370_v36 = vpop.xlane.xlu1 %1369  ;;  %v1441_v7 = vshra.s32 %v1439_v0, 16  ;;  %v1440_v20 = vand.u32 65535, %v1439_v0 }
 0x815   :  { %vm1371_vm5 = vcmp.eq.f32.partialorder %v4049_v6, %v1370_v36  ;;  %v1380_v6 = vand.u32 65535, %v4087_v10  ;;  %v1395_v10 = vand.u32 65535, %v4116_v39  ;;  %v1376_v33 = vcvt.f32.s32 %v1370_v36 }
 0x816   :  { %v1372_v53 = vsel %vm1371_vm5, %v1367_v63, inf  ;;  %v1443_v24 = vcvt.s32.f32 %v1441_v7 }
 0x817   :  { %1373 = vmin.xlane.f32.xlu0 %v1372_v53  ;;  %v1382_v12 = vcvt.s32.f32 %v1380_v6  ;;  %v1397_v34 = vcvt.s32.f32 %v1395_v10  ;;  %v1377_v8 = vshll.u32 %v1376_v33, 16 }
 0x818   :  { %1444 = vmin.xlane.f32.xlu1 %v1443_v24 }
 0x86a   :  { %v1320_v21 = vpop.xlane.xlu0 %1319 }
 0x86b   :  { %v1321_v42 = vcvt.f32.s32 %v1320_v21  ;;  %v1355_v9 = vpop.xlane.xlu2 %1354 }
 0x86c   :  { %vm1356_vm13 = vcmp.eq.f32.partialorder %v4070_v23, %v1355_v9  ;;  %v1361_v0 = vcvt.f32.s32 %v1355_v9 }
 0x86d   :  { %v1324_v29 = vadd.s32 %v1323_v1, %v1321_v42  ;;  %v1357_v40 = vsel %vm1356_vm13, %v1352_v26, inf }
 0x86e   :  { %1358 = vmin.xlane.f32.xlu2 %v1357_v40  ;;  %v1362_v52 = vshll.u32 %v1361_v0, 16 }
 0x86f   :  { %vm1332_vm10 = vcmp.eq.s32.totalorder %v4013_v16, %v1324_v29 }
 0x870   :  { %vm4161_vm4 = vmor %vm4008_vm8, %vm1332_vm10  ;;  %v4166_v48 = vsel %vm1332_vm10, 2147483647, %v4013_v16 }
 0x871   :  { %v1454_v62 = vsel %vm492_vm2, %v4166_v48, 2147483647 }
 0x872   :  { %v1456_v23 = vshra.s32 %v1454_v62, 16  ;;  %v1455_v53 = vand.u32 65535, %v1454_v62 }
 0x873   :  { %v1385_v61 = vpop.xlane.xlu0 %1384 }
 0x874   :  { %vm1386_vm7 = vcmp.eq.f32.partialorder %v4090_v60, %v1385_v61  ;;  %v1458_v43 = vcvt.s32.f32 %v1456_v23  ;;  %v1457_v42 = vcvt.s32.f32 %v1455_v53 }
 0x875   :  { %v1387_v57 = vsel %vm1386_vm7, %v1382_v12, inf }
 0x876   :  { %1388 = vmin.xlane.f32.xlu1 %v1387_v57  ;;  %1459 = vmin.xlane.f32.xlu2 %v1458_v43 }
 0x87b   :  { %v4173_v46 = vpop.xlane.xlu0 %1429  ;;  %v4175_v16 = vpop.xlane.xlu2 %1399 }
 0x87c   :  { %vm1431_vm8 = vcmp.eq.f32.partialorder %v1428_v49, %v4173_v46  ;;  %vm1401_vm0 = vcmp.eq.f32.partialorder %v4124_v41, %v4175_v16  ;;  %v1442_v41 = vcvt.s32.f32 %v1440_v20  ;;  %v1406_v62 = vcvt.f32.s32 %v4175_v16 }
 0x87d   :  { %v1432_v60 = vsel %vm1431_vm8, %v1427_v17, inf  ;;  %v1402_v28 = vsel %vm1401_vm0, %v1397_v34, inf }
 0x87e   :  { %1433 = vmin.xlane.f32.xlu1 %v1432_v60  ;;  %1403 = vmin.xlane.f32.xlu0 %v1402_v28 }
 0x883   :  { %v4180_v15 = vpop.xlane.xlu1 %1414 }
 0x884   :  { %vm1416_vm15 = vcmp.eq.f32.partialorder %v1413_v18, %v4180_v15 }
 0x885   :  { %v1417_v39 = vsel %vm1416_vm15, %v1412_v19, inf }
 0x886   :  { %1418 = vmin.xlane.f32.xlu2 %v1417_v39 }
 0x88a   :  { %v1374_v30 = vpop.xlane.xlu0 %1373 }
 0x88b   :  { %v1375_v49 = vcvt.f32.s32 %v1374_v30  ;;  %v4183_v2 = vpop.xlane.xlu1 %1444 }
 0x88c   :  { %vm1446_vm5 = vcmp.eq.f32.partialorder %v1443_v24, %v4183_v2  ;;  %v1391_v24 = vcvt.f32.s32 %v1385_v61 }
 0x88d   :  { %v1378_v22 = vadd.s32 %v1377_v8, %v1375_v49  ;;  %v1447_v51 = vsel %vm1446_vm5, %v1442_v41, inf  ;;  %v1451_v41 = vcvt.f32.s32 %v4183_v2 }
 0x88e   :  { %1448 = vmin.xlane.f32.xlu0 %v1447_v51  ;;  %v1392_v26 = vshll.u32 %v1391_v24, 16 }
 0x88f   :  { %vm1470_vm13 = vcmp.eq.s32.totalorder %v4042_v27, %v1378_v22 }
 0x890   :  { %vm4189_vm10 = vmor %vm4037_vm6, %vm1470_vm13  ;;  %v4194_v25 = vsel %vm1470_vm13, 2147483647, %v4042_v27 }
 0x891   :  { %v4198_v18 = vsel %vm492_vm2, %v4194_v25, 2147483647 }
 0x892   :  { %v1510_v55 = vshra.s32 %v4198_v18, 16  ;;  %v1509_v53 = vand.u32 65535, %v4198_v18 }
 0x894   :  { %v4201_v11 = vcvt.s32.f32 %v1510_v55 }
 0x896   :  { %1513 = vmin.xlane.f32.xlu0 %v4201_v11 }
 0x8e1   :  { %v1359_v36 = vpop.xlane.xlu2 %1358 }
 0x8e2   :  { %v1360_v63 = vcvt.f32.s32 %v1359_v36 }
 0x8e4   :  { %v1363_v7 = vadd.s32 %v1362_v52, %v1360_v63  ;;  %v1452_v52 = vshll.u32 %v1451_v41, 16 }
 0x8e6   :  { %vm1469_vm6 = vcmp.eq.s32.totalorder %v4060_v38, %v1363_v7 }
 0x8e7   :  { %vm4207_vm7 = vmor %vm4055_vm14, %vm1469_vm6  ;;  %v4212_v3 = vsel %vm1469_vm6, 2147483647, %v4060_v38  ;;  %v1436_v38 = vcvt.f32.s32 %v4173_v46  ;;  %v1407_v46 = vshll.u32 %v1406_v62, 16 }
 0x8e8   :  { %v4216_v45 = vsel %vm492_vm2, %v4212_v3, 2147483647 }
 0x8e9   :  { %v1389_v21 = vpop.xlane.xlu1 %1388  ;;  %v4218_v1 = vpop.xlane.xlu2 %1459  ;;  %v1495_v9 = vshra.s32 %v4216_v45, 16  ;;  %v1437_v10 = vshll.u32 %v1436_v38, 16 }
 0x8ea   :  { %v1390_v29 = vcvt.f32.s32 %v1389_v21  ;;  %vm1461_vm14 = vcmp.eq.f32.partialorder %v1458_v43, %v4218_v1  ;;  %v1466_v37 = vcvt.f32.s32 %v4218_v1 }
 0x8eb   :  { %v1462_v56 = vsel %vm1461_vm14, %v1457_v42, inf  ;;  %v4222_v40 = vcvt.s32.f32 %v1495_v9  ;;  %v1511_v42 = vcvt.s32.f32 %v1509_v53 }
 0x8ec   :  { %v1393_v6 = vadd.s32 %v1392_v26, %v1390_v29  ;;  %1463 = vmin.xlane.f32.xlu2 %v1462_v56  ;;  %v1494_v29 = vand.u32 65535, %v4216_v45 }
 0x8ed   :  { %1498 = vmin.xlane.f32.xlu1 %v4222_v40 }
 0x8ee   :  { %vm1471_vm8 = vcmp.eq.s32.totalorder %v4083_v47, %v1393_v6  ;;  %v1467_v6 = vshll.u32 %v1466_v37, 16  ;;  %v1496_v62 = vcvt.s32.f32 %v1494_v29 }
 0x8ef   :  { %vm4230_vm0 = vmor %vm4078_vm11, %vm1471_vm8  ;;  %v4235_v61 = vsel %vm1471_vm8, 2147483647, %v4083_v47  ;;  %v1421_v47 = vcvt.f32.s32 %v4180_v15 }
 0x8f0   :  { %v4239_v12 = vsel %vm492_vm2, %v4235_v61, 2147483647 }
 0x8f1   :  { %v1434_v43 = vpop.xlane.xlu1 %1433  ;;  %v1404_v57 = vpop.xlane.xlu0 %1403  ;;  %v1525_v44 = vshra.s32 %v4239_v12, 16  ;;  %v1422_v20 = vshll.u32 %v1421_v47, 16 }
 0x8f2   :  { %v1435_v16 = vcvt.f32.s32 %v1434_v43  ;;  %v1405_v17 = vcvt.f32.s32 %v1404_v57 }
 0x8f3   :  { %v4242_v31 = vcvt.s32.f32 %v1525_v44 }
 0x8f4   :  { %v1438_v34 = vadd.s32 %v1437_v10, %v1435_v16  ;;  %v1408_v60 = vadd.s32 %v1407_v46, %v1405_v17 }
 0x8f5   :  { %1528 = vmin.xlane.f32.xlu2 %v4242_v31 }
 0x8f6   :  { %vm1474_vm11 = vcmp.eq.s32.totalorder %v4106_v59, %v1438_v34  ;;  %vm1472_vm15 = vcmp.eq.s32.totalorder %v4103_v13, %v1408_v60 }
 0x8f7   :  { %vm4250_vm5 = vmor %vm4110_vm9, %vm1474_vm11  ;;  %v4255_v4 = vsel %vm1474_vm11, 2147483647, %v4106_v59  ;;  %v4258_v19 = vsel %vm1472_vm15, 2147483647, %v4103_v13 }
 0x8f8   :  { %vm4262_vm13 = vmor %vm4098_vm3, %vm1472_vm15  ;;  %v4268_v39 = vsel %vm492_vm2, %v4258_v19, 2147483647  ;;  %v4272_v14 = vsel %vm492_vm2, %v4255_v4, 2147483647 }
 0x8f9   :  { %v1419_v33 = vpop.xlane.xlu2 %1418  ;;  %v1540_v59 = vshra.s32 %v4268_v39, 16  ;;  %v1570_v13 = vshra.s32 %v4272_v14, 16  ;;  %v1539_v50 = vand.u32 65535, %v4268_v39 }
 0x8fa   :  { %v1420_v30 = vcvt.f32.s32 %v1419_v33 }
 0x8fb   :  { %v4276_v35 = vcvt.s32.f32 %v1540_v59  ;;  %v4278_v8 = vcvt.s32.f32 %v1570_v13  ;;  %v1541_v60 = vcvt.s32.f32 %v1539_v50 }
 0x8fc   :  { %v1423_v49 = vadd.s32 %v1422_v20, %v1420_v30 }
 0x8fd   :  { %1543 = vmin.xlane.f32.xlu1 %v4276_v35  ;;  %1573 = vmin.xlane.f32.xlu2 %v4278_v8 }
 0x8fe   :  { %vm1473_vm3 = vcmp.eq.s32.totalorder %v4136_v32, %v1423_v49 }
 0x8ff   :  { %vm4286_vm9 = vmor %vm4131_vm1, %vm1473_vm3  ;;  %v4291_v51 = vsel %vm1473_vm3, 2147483647, %v4136_v32 }
 0x900   :  { %v1553_v55 = vsel %vm492_vm2, %v4291_v51, 2147483647 }
 0x901   :  { %v1449_v0 = vpop.xlane.xlu0 %1448  ;;  %v1555_v36 = vshra.s32 %v1553_v55, 16  ;;  %v1554_v59 = vand.u32 65535, %v1553_v55 }
 0x902   :  { %v1450_v63 = vcvt.f32.s32 %v1449_v0 }
 0x903   :  { %v1557_v7 = vcvt.s32.f32 %v1555_v36 }
 0x904   :  { %v1453_v2 = vadd.s32 %v1452_v52, %v1450_v63 }
 0x905   :  { %1558 = vmin.xlane.f32.xlu0 %v1557_v7 }
 0x906   :  { %vm1475_vm1 = vcmp.eq.s32.totalorder %v4149_v58, %v1453_v2 }
 0x907   :  { %vm4299_vm6 = vmor %vm4144_vm12, %vm1475_vm1  ;;  %v4304_v32 = vsel %vm1475_vm1, 2147483647, %v4149_v58 }
 0x908   :  { %v1583_v24 = vsel %vm492_vm2, %v4304_v32, 2147483647 }
 0x909   :  { %v1514_v21 = vpop.xlane.xlu0 %1513  ;;  %v1585_v9 = vshra.s32 %v1583_v24, 16  ;;  %v1584_v30 = vand.u32 65535, %v1583_v24 }
 0x90a   :  { %vm1515_vm14 = vcmp.eq.f32.partialorder %v4201_v11, %v1514_v21  ;;  %v1524_v11 = vand.u32 65535, %v4239_v12  ;;  %v1569_v12 = vand.u32 65535, %v4272_v14  ;;  %v1556_v14 = vcvt.s32.f32 %v1554_v59 }
 0x90b   :  { %v1516_v18 = vsel %vm1515_vm14, %v1511_v42, inf  ;;  %v1587_v26 = vcvt.s32.f32 %v1585_v9  ;;  %v1520_v20 = vcvt.f32.s32 %v1514_v21 }
 0x90c   :  { %1517 = vmin.xlane.f32.xlu2 %v1516_v18  ;;  %v1526_v46 = vcvt.s32.f32 %v1524_v11  ;;  %v1571_v47 = vcvt.s32.f32 %v1569_v12 }
 0x90d   :  { %1588 = vmin.xlane.f32.xlu0 %v1587_v26  ;;  %v1521_v41 = vshll.u32 %v1520_v20, 16 }
 0x95f   :  { %v1464_v56 = vpop.xlane.xlu2 %1463 }
 0x960   :  { %v1465_v58 = vcvt.f32.s32 %v1464_v56  ;;  %v1499_v38 = vpop.xlane.xlu1 %1498 }
 0x961   :  { %vm1500_vm12 = vcmp.eq.f32.partialorder %v4222_v40, %v1499_v38  ;;  %v1505_v24 = vcvt.f32.s32 %v1499_v38 }
 0x962   :  { %v1468_v43 = vadd.s32 %v1467_v6, %v1465_v58  ;;  %v1501_v57 = vsel %vm1500_vm12, %v1496_v62, inf }
 0x963   :  { %1502 = vmin.xlane.f32.xlu1 %v1501_v57  ;;  %v1506_v5 = vshll.u32 %v1505_v24, 16 }
 0x964   :  { %vm1476_vm8 = vcmp.eq.s32.totalorder %v4166_v48, %v1468_v43 }
 0x965   :  { %vm4316_vm11 = vmor %vm4161_vm4, %vm1476_vm8  ;;  %v4321_v45 = vsel %vm1476_vm8, 2147483647, %v4166_v48 }
 0x966   :  { %v1598_v44 = vsel %vm492_vm2, %v4321_v45, 2147483647 }
 0x967   :  { %v1600_v40 = vshra.s32 %v1598_v44, 16  ;;  %v1599_v18 = vand.u32 65535, %v1598_v44 }
 0x968   :  { %v1529_v10 = vpop.xlane.xlu2 %1528 }
 0x969   :  { %vm1530_vm15 = vcmp.eq.f32.partialorder %v4242_v31, %v1529_v10  ;;  %v1602_v16 = vcvt.s32.f32 %v1600_v40  ;;  %v1601_v58 = vcvt.s32.f32 %v1599_v18 }
 0x96a   :  { %v1531_v17 = vsel %vm1530_vm15, %v1526_v46, inf }
 0x96b   :  { %1603 = vmin.xlane.f32.xlu1 %v1602_v16  ;;  %1532 = vmin.xlane.f32.xlu0 %v1531_v17 }
 0x970   :  { %v4328_v34 = vpop.xlane.xlu1 %1543  ;;  %v4330_v48 = vpop.xlane.xlu2 %1573 }
 0x971   :  { %vm1545_vm4 = vcmp.eq.f32.partialorder %v4276_v35, %v4328_v34  ;;  %vm1575_vm3 = vcmp.eq.f32.partialorder %v4278_v8, %v4330_v48  ;;  %v1586_v8 = vcvt.s32.f32 %v1584_v30  ;;  %v1580_v44 = vcvt.f32.s32 %v4330_v48 }
 0x972   :  { %v1546_v31 = vsel %vm1545_vm4, %v1541_v60, inf  ;;  %v1576_v33 = vsel %vm1575_vm3, %v1571_v47, inf }
 0x973   :  { %1547 = vmin.xlane.f32.xlu2 %v1546_v31  ;;  %1577 = vmin.xlane.f32.xlu0 %v1576_v33 }
 0x978   :  { %v4336_v39 = vpop.xlane.xlu0 %1558 }
 0x979   :  { %vm1560_vm1 = vcmp.eq.f32.partialorder %v1557_v7, %v4336_v39 }
 0x97a   :  { %v1561_v13 = vsel %vm1560_vm1, %v1556_v14, inf }
 0x97b   :  { %1562 = vmin.xlane.f32.xlu1 %v1561_v13 }
 0x97f   :  { %v1518_v49 = vpop.xlane.xlu2 %1517 }
 0x980   :  { %v1519_v35 = vcvt.f32.s32 %v1518_v49  ;;  %v4339_v0 = vpop.xlane.xlu0 %1588 }
 0x981   :  { %vm1590_vm14 = vcmp.eq.f32.partialorder %v1587_v26, %v4339_v0  ;;  %v1535_v26 = vcvt.f32.s32 %v1529_v10 }
 0x982   :  { %v1522_v36 = vadd.s32 %v1521_v41, %v1519_v35  ;;  %v1591_v52 = vsel %vm1590_vm14, %v1586_v8, inf  ;;  %v1595_v8 = vcvt.f32.s32 %v4339_v0 }
 0x983   :  { %1592 = vmin.xlane.f32.xlu2 %v1591_v52  ;;  %v1536_v62 = vshll.u32 %v1535_v26, 16 }
 0x984   :  { %vm1614_vm12 = vcmp.eq.s32.totalorder %v4194_v25, %v1522_v36 }
 0x985   :  { %vm4345_vm8 = vmor %vm4189_vm10, %vm1614_vm12  ;;  %v4350_v63 = vsel %vm1614_vm12, 2147483647, %v4194_v25 }
 0x986   :  { %v4354_v7 = vsel %vm492_vm2, %v4350_v63, 2147483647 }
 0x987   :  { %v1654_v2 = vshra.s32 %v4354_v7, 16  ;;  %v1653_v18 = vand.u32 65535, %v4354_v7 }
 0x989   :  { %v4357_v53 = vcvt.s32.f32 %v1654_v2 }
 0x98b   :  { %1657 = vmin.xlane.f32.xlu2 %v4357_v53 }
 0x9d6   :  { %v1503_v21 = vpop.xlane.xlu1 %1502 }
 0x9d7   :  { %v1504_v42 = vcvt.f32.s32 %v1503_v21 }
 0x9d9   :  { %v1507_v9 = vadd.s32 %v1506_v5, %v1504_v42  ;;  %v1596_v5 = vshll.u32 %v1595_v8, 16 }
 0x9db   :  { %vm1613_vm10 = vcmp.eq.s32.totalorder %v4212_v3, %v1507_v9 }
 0x9dc   :  { %vm4363_vm15 = vmor %vm4207_vm7, %vm1613_vm10  ;;  %v4368_v37 = vsel %vm1613_vm10, 2147483647, %v4212_v3  ;;  %v1550_v3 = vcvt.f32.s32 %v4328_v34  ;;  %v1581_v34 = vshll.u32 %v1580_v44, 16 }
 0x9dd   :  { %v4372_v29 = vsel %vm492_vm2, %v4368_v37, 2147483647 }
 0x9de   :  { %v4374_v56 = vpop.xlane.xlu1 %1603  ;;  %v1533_v6 = vpop.xlane.xlu0 %1532  ;;  %v1639_v38 = vshra.s32 %v4372_v29, 16  ;;  %v1551_v12 = vshll.u32 %v1550_v3, 16 }
 0x9df   :  { %vm1605_vm4 = vcmp.eq.f32.partialorder %v1602_v16, %v4374_v56  ;;  %v1534_v27 = vcvt.f32.s32 %v1533_v6  ;;  %v1610_v54 = vcvt.f32.s32 %v4374_v56 }
 0x9e0   :  { %v1606_v43 = vsel %vm1605_vm4, %v1601_v58, inf  ;;  %v4378_v57 = vcvt.s32.f32 %v1639_v38  ;;  %v1655_v58 = vcvt.s32.f32 %v1653_v18 }
 0x9e1   :  { %v1537_v11 = vadd.s32 %v1536_v62, %v1534_v27  ;;  %1607 = vmin.xlane.f32.xlu1 %v1606_v43  ;;  %v1638_v27 = vand.u32 65535, %v4372_v29 }
 0x9e2   :  { %1642 = vmin.xlane.f32.xlu0 %v4378_v57 }
 0x9e3   :  { %vm1615_vm7 = vcmp.eq.s32.totalorder %v4235_v61, %v1537_v11  ;;  %v1611_v11 = vshll.u32 %v1610_v54, 16  ;;  %v1640_v44 = vcvt.s32.f32 %v1638_v27 }
 0x9e4   :  { %vm4386_vm3 = vmor %vm4230_vm0, %vm1615_vm7  ;;  %v4391_v10 = vsel %vm1615_vm7, 2147483647, %v4235_v61  ;;  %v1565_v61 = vcvt.f32.s32 %v4336_v39 }
 0x9e5   :  { %v4395_v46 = vsel %vm492_vm2, %v4391_v10, 2147483647 }
 0x9e6   :  { %v1578_v16 = vpop.xlane.xlu0 %1577  ;;  %v1548_v17 = vpop.xlane.xlu2 %1547  ;;  %v1669_v50 = vshra.s32 %v4395_v46, 16  ;;  %v1566_v30 = vshll.u32 %v1565_v61, 16 }
 0x9e7   :  { %v1579_v48 = vcvt.f32.s32 %v1578_v16  ;;  %v1549_v60 = vcvt.f32.s32 %v1548_v17 }
 0x9e8   :  { %v4398_v23 = vcvt.s32.f32 %v1669_v50 }
 0x9e9   :  { %v1582_v47 = vadd.s32 %v1581_v34, %v1579_v48  ;;  %v1552_v31 = vadd.s32 %v1551_v12, %v1549_v60 }
 0x9ea   :  { %1672 = vmin.xlane.f32.xlu1 %v4398_v23 }
 0x9eb   :  { %vm1618_vm0 = vcmp.eq.s32.totalorder %v4255_v4, %v1582_v47  ;;  %vm1616_vm1 = vcmp.eq.s32.totalorder %v4258_v19, %v1552_v31 }
 0x9ec   :  { %vm4406_vm14 = vmor %vm4250_vm5, %vm1618_vm0  ;;  %v4411_v59 = vsel %vm1618_vm0, 2147483647, %v4255_v4  ;;  %v4414_v14 = vsel %vm1616_vm1, 2147483647, %v4258_v19 }
 0x9ed   :  { %vm4418_vm12 = vmor %vm4262_vm13, %vm1616_vm1  ;;  %v4424_v13 = vsel %vm492_vm2, %v4411_v59, 2147483647  ;;  %v4428_v28 = vsel %vm492_vm2, %v4414_v14, 2147483647 }
 0x9ee   :  { %v1563_v20 = vpop.xlane.xlu1 %1562  ;;  %v1714_v4 = vshra.s32 %v4424_v13, 16  ;;  %v1684_v19 = vshra.s32 %v4428_v28, 16  ;;  %v1713_v1 = vand.u32 65535, %v4424_v13 }
 0x9ef   :  { %v1564_v49 = vcvt.f32.s32 %v1563_v20 }
 0x9f0   :  { %v4432_v15 = vcvt.s32.f32 %v1714_v4  ;;  %v4434_v41 = vcvt.s32.f32 %v1684_v19  ;;  %v1715_v31 = vcvt.s32.f32 %v1713_v1 }
 0x9f1   :  { %v1567_v35 = vadd.s32 %v1566_v30, %v1564_v49 }
 0x9f2   :  { %1717 = vmin.xlane.f32.xlu1 %v4432_v15  ;;  %1687 = vmin.xlane.f32.xlu0 %v4434_v41 }
 0x9f3   :  { %vm1617_vm5 = vcmp.eq.s32.totalorder %v4291_v51, %v1567_v35 }
 0x9f4   :  { %vm4442_vm13 = vmor %vm4286_vm9, %vm1617_vm5  ;;  %v4447_v52 = vsel %vm1617_vm5, 2147483647, %v4291_v51 }
 0x9f5   :  { %v1697_v2 = vsel %vm492_vm2, %v4447_v52, 2147483647 }
 0x9f6   :  { %v1593_v24 = vpop.xlane.xlu2 %1592  ;;  %v1699_v21 = vshra.s32 %v1697_v2, 16  ;;  %v1698_v4 = vand.u32 65535, %v1697_v2 }
 0x9f7   :  { %v1594_v42 = vcvt.f32.s32 %v1593_v24 }
 0x9f8   :  { %v1701_v9 = vcvt.s32.f32 %v1699_v21 }
 0x9f9   :  { %v1597_v0 = vadd.s32 %v1596_v5, %v1594_v42 }
 0x9fa   :  { %1702 = vmin.xlane.f32.xlu2 %v1701_v9 }
 0x9fb   :  { %vm1619_vm9 = vcmp.eq.s32.totalorder %v4304_v32, %v1597_v0 }
 0x9fc   :  { %vm4455_vm10 = vmor %vm4299_vm6, %vm1619_vm9  ;;  %v4460_v51 = vsel %vm1619_vm9, 2147483647, %v4304_v32 }
 0x9fd   :  { %v1727_v26 = vsel %vm492_vm2, %v4460_v51, 2147483647 }
 0x9fe   :  { %v1658_v6 = vpop.xlane.xlu2 %1657  ;;  %v1729_v38 = vshra.s32 %v1727_v26, 16  ;;  %v1728_v49 = vand.u32 65535, %v1727_v26 }
 0x9ff   :  { %vm1659_vm4 = vcmp.eq.f32.partialorder %v4357_v53, %v1658_v6  ;;  %v1668_v53 = vand.u32 65535, %v4395_v46  ;;  %v1683_v46 = vand.u32 65535, %v4428_v28  ;;  %v1700_v28 = vcvt.s32.f32 %v1698_v4 }
 0xa00   :  { %v1660_v7 = vsel %vm1659_vm4, %v1655_v58, inf  ;;  %v1731_v62 = vcvt.s32.f32 %v1729_v38  ;;  %v1664_v30 = vcvt.f32.s32 %v1658_v6 }
 0xa01   :  { %1661 = vmin.xlane.f32.xlu1 %v1660_v7  ;;  %v1670_v34 = vcvt.s32.f32 %v1668_v53  ;;  %v1685_v61 = vcvt.s32.f32 %v1683_v46 }
 0xa02   :  { %1732 = vmin.xlane.f32.xlu2 %v1731_v62  ;;  %v1665_v8 = vshll.u32 %v1664_v30, 16 }
 0xa54   :  { %v1608_v43 = vpop.xlane.xlu1 %1607 }
 0xa55   :  { %v1609_v32 = vcvt.f32.s32 %v1608_v43  ;;  %v1643_v3 = vpop.xlane.xlu0 %1642 }
 0xa56   :  { %vm1644_vm6 = vcmp.eq.f32.partialorder %v4378_v57, %v1643_v3  ;;  %v1649_v26 = vcvt.f32.s32 %v1643_v3 }
 0xa57   :  { %v1612_v16 = vadd.s32 %v1611_v11, %v1609_v32  ;;  %v1645_v17 = vsel %vm1644_vm6, %v1640_v44, inf }
 0xa58   :  { %1646 = vmin.xlane.f32.xlu0 %v1645_v17 }
 0xa59   :  { %vm1620_vm7 = vcmp.eq.s32.totalorder %v4321_v45, %v1612_v16 }
 0xa5a   :  { %vm4472_vm0 = vmor %vm4316_vm11, %vm1620_vm7  ;;  %v4477_v29 = vsel %vm1620_vm7, 2147483647, %v4321_v45 }
 0xa5b   :  { %v1742_v50 = vsel %vm492_vm2, %v4477_v29, 2147483647 }
 0xa5c   :  { %v1744_v57 = vshra.s32 %v1742_v50, 16  ;;  %v1743_v55 = vand.u32 65535, %v1742_v50 }
 0xa5d   :  { %v1673_v12 = vpop.xlane.xlu1 %1672 }
 0xa5e   :  { %vm1674_vm1 = vcmp.eq.f32.partialorder %v4398_v23, %v1673_v12  ;;  %v1746_v48 = vcvt.s32.f32 %v1744_v57  ;;  %v1679_v7 = vcvt.f32.s32 %v1673_v12  ;;  %v1745_v32 = vcvt.s32.f32 %v1743_v55 }
 0xa5f   :  { %v1675_v60 = vsel %vm1674_vm1, %v1670_v34, inf }
 0xa60   :  { %1747 = vmin.xlane.f32.xlu0 %v1746_v48  ;;  %1676 = vmin.xlane.f32.xlu2 %v1675_v60  ;;  %v1680_v44 = vshll.u32 %v1679_v7, 16 }
 0xa65   :  { %v4484_v47 = vpop.xlane.xlu1 %1717  ;;  %v4486_v45 = vpop.xlane.xlu0 %1687 }
 0xa66   :  { %vm1719_vm11 = vcmp.eq.f32.partialorder %v4432_v15, %v4484_v47  ;;  %vm1689_vm5 = vcmp.eq.f32.partialorder %v4434_v41, %v4486_v45  ;;  %v1730_v41 = vcvt.s32.f32 %v1728_v49  ;;  %v1724_v53 = vcvt.f32.s32 %v4484_v47 }
 0xa67   :  { %v1720_v23 = vsel %vm1719_vm11, %v1715_v31, inf  ;;  %v1690_v20 = vsel %vm1689_vm5, %v1685_v61, inf  ;;  %v1694_v50 = vcvt.f32.s32 %v4486_v45 }
 0xa68   :  { %1721 = vmin.xlane.f32.xlu2 %v1720_v23  ;;  %1691 = vmin.xlane.f32.xlu1 %v1690_v20  ;;  %v1725_v46 = vshll.u32 %v1724_v53, 16 }
 0xa69   :  { %v1695_v47 = vshll.u32 %v1694_v50, 16 }
 0xa6d   :  { %v4492_v13 = vpop.xlane.xlu2 %1702 }
 0xa6e   :  { %vm1704_vm9 = vcmp.eq.f32.partialorder %v1701_v9, %v4492_v13  ;;  %v1709_v23 = vcvt.f32.s32 %v4492_v13 }
 0xa6f   :  { %v1705_v19 = vsel %vm1704_vm9, %v1700_v28, inf }
 0xa70   :  { %1706 = vmin.xlane.f32.xlu0 %v1705_v19  ;;  %v1710_v49 = vshll.u32 %v1709_v23, 16 }
 0xa74   :  { %v1662_v35 = vpop.xlane.xlu1 %1661 }
 0xa75   :  { %v1663_v15 = vcvt.f32.s32 %v1662_v35  ;;  %v4495_v24 = vpop.xlane.xlu2 %1732 }
 0xa76   :  { %vm1734_vm4 = vcmp.eq.f32.partialorder %v1731_v62, %v4495_v24  ;;  %v1739_v39 = vcvt.f32.s32 %v4495_v24 }
 0xa77   :  { %v1666_v21 = vadd.s32 %v1665_v8, %v1663_v15  ;;  %v1735_v5 = vsel %vm1734_vm4, %v1730_v41, inf }
 0xa78   :  { %1736 = vmin.xlane.f32.xlu1 %v1735_v5 }
 0xa79   :  { %vm1758_vm6 = vcmp.eq.s32.totalorder %v4350_v63, %v1666_v21 }
 0xa7a   :  { %v4500_v2 = vsel %vm1758_vm6, 2147483647, %v4350_v63  ;;  %vm4504_vm7 = vmor %vm4345_vm8, %vm1758_vm6  ;;  %v1650_v63 = vshll.u32 %v1649_v26, 16 }
 0xa7b   :  { %v4510_v9 = vsel %vm492_vm2, %v4500_v2, 2147483647 }
 0xa7c   :  { %v1798_v0 = vshra.s32 %v4510_v9, 16  ;;  %v1797_v55 = vand.u32 65535, %v4510_v9 }
 0xa7e   :  { %v4513_v18 = vcvt.s32.f32 %v1798_v0 }
 0xa80   :  { %1801 = vmin.xlane.f32.xlu1 %v4513_v18 }
 0xacb   :  { %v1647_v6 = vpop.xlane.xlu0 %1646 }
 0xacc   :  { %v1648_v58 = vcvt.f32.s32 %v1647_v6 }
 0xace   :  { %v1651_v38 = vadd.s32 %v1650_v63, %v1648_v58  ;;  %v1740_v63 = vshll.u32 %v1739_v39, 16 }
 0xad0   :  { %vm1757_vm8 = vcmp.eq.s32.totalorder %v4368_v37, %v1651_v38 }
 0xad1   :  { %v4518_v62 = vsel %vm1757_vm8, 2147483647, %v4368_v37  ;;  %vm4522_vm1 = vmor %vm4363_vm15, %vm1757_vm8 }
 0xad2   :  { %v4528_v27 = vsel %vm492_vm2, %v4518_v62, 2147483647 }
 0xad3   :  { %v4530_v43 = vpop.xlane.xlu0 %1747  ;;  %v1677_v11 = vpop.xlane.xlu2 %1676  ;;  %v1783_v3 = vshra.s32 %v4528_v27, 16  ;;  %v1782_v22 = vand.u32 65535, %v4528_v27 }
 0xad4   :  { %vm1749_vm11 = vcmp.eq.f32.partialorder %v1746_v48, %v4530_v43  ;;  %v1678_v37 = vcvt.f32.s32 %v1677_v11 }
 0xad5   :  { %v1750_v16 = vsel %vm1749_vm11, %v1745_v32, inf  ;;  %v4534_v25 = vcvt.s32.f32 %v1783_v3  ;;  %v1799_v32 = vcvt.s32.f32 %v1797_v55  ;;  %v1784_v50 = vcvt.s32.f32 %v1782_v22 }
 0xad6   :  { %v1681_v17 = vadd.s32 %v1680_v44, %v1678_v37  ;;  %1751 = vmin.xlane.f32.xlu0 %v1750_v16 }
 0xad7   :  { %1786 = vmin.xlane.f32.xlu2 %v4534_v25 }
 0xad8   :  { %vm1759_vm15 = vcmp.eq.s32.totalorder %v4391_v10, %v1681_v17 }
 0xad9   :  { %v4541_v57 = vsel %vm1759_vm15, 2147483647, %v4391_v10  ;;  %vm4545_vm5 = vmor %vm4386_vm3, %vm1759_vm15 }
 0xada   :  { %v4551_v34 = vsel %vm492_vm2, %v4541_v57, 2147483647 }
 0xadb   :  { %v1692_v48 = vpop.xlane.xlu1 %1691  ;;  %v1722_v60 = vpop.xlane.xlu2 %1721  ;;  %v1813_v1 = vshra.s32 %v4551_v34, 16 }
 0xadc   :  { %v1693_v45 = vcvt.f32.s32 %v1692_v48  ;;  %v1723_v31 = vcvt.f32.s32 %v1722_v60 }
 0xadd   :  { %v4554_v10 = vcvt.s32.f32 %v1813_v1 }
 0xade   :  { %v1696_v61 = vadd.s32 %v1695_v47, %v1693_v45  ;;  %v1726_v40 = vadd.s32 %v1725_v46, %v1723_v31 }
 0xadf   :  { %1816 = vmin.xlane.f32.xlu0 %v4554_v10 }
 0xae0   :  { %vm1760_vm3 = vcmp.eq.s32.totalorder %v4414_v14, %v1696_v61  ;;  %vm1762_vm9 = vcmp.eq.s32.totalorder %v4411_v59, %v1726_v40 }
 0xae1   :  { %v4561_v20 = vsel %vm1760_vm3, 2147483647, %v4414_v14  ;;  %v4564_v4 = vsel %vm1762_vm9, 2147483647, %v4411_v59  ;;  %vm4568_vm4 = vmor %vm4406_vm14, %vm1762_vm9 }
 0xae2   :  { %v4574_v19 = vsel %vm492_vm2, %v4561_v20, 2147483647  ;;  %v4578_v13 = vsel %vm492_vm2, %v4564_v4, 2147483647  ;;  %vm4582_vm6 = vmor %vm4418_vm12, %vm1760_vm3 }
 0xae3   :  { %v1707_v59 = vpop.xlane.xlu0 %1706  ;;  %v1828_v33 = vshra.s32 %v4574_v19, 16  ;;  %v1858_v30 = vshra.s32 %v4578_v13, 16  ;;  %v1827_v56 = vand.u32 65535, %v4574_v19 }
 0xae4   :  { %v1708_v35 = vcvt.f32.s32 %v1707_v59 }
 0xae5   :  { %v4588_v8 = vcvt.s32.f32 %v1828_v33  ;;  %v1860_v15 = vcvt.s32.f32 %v1858_v30  ;;  %v1829_v23 = vcvt.s32.f32 %v1827_v56 }
 0xae6   :  { %v1711_v41 = vadd.s32 %v1710_v49, %v1708_v35 }
 0xae7   :  { %1831 = vmin.xlane.f32.xlu2 %v4588_v8  ;;  %1861 = vmin.xlane.f32.xlu0 %v1860_v15 }
 0xae8   :  { %vm1761_vm14 = vcmp.eq.s32.totalorder %v4447_v52, %v1711_v41 }
 0xae9   :  { %v4594_v21 = vsel %vm1761_vm14, 2147483647, %v4447_v52  ;;  %vm4598_vm12 = vmor %vm4442_vm13, %vm1761_vm14 }
 0xaea   :  { %v1841_v0 = vsel %vm492_vm2, %v4594_v21, 2147483647 }
 0xaeb   :  { %v1737_v26 = vpop.xlane.xlu1 %1736  ;;  %v1843_v6 = vshra.s32 %v1841_v0, 16  ;;  %v1842_v33 = vand.u32 65535, %v1841_v0 }
 0xaec   :  { %v1738_v58 = vcvt.f32.s32 %v1737_v26 }
 0xaed   :  { %v1845_v38 = vcvt.s32.f32 %v1843_v6 }
 0xaee   :  { %v1741_v24 = vadd.s32 %v1740_v63, %v1738_v58  ;;  %v5358_v58 = vld [vmem:[#allocation5_spill] sm:$0xff] }
 0xaef   :  { %1846 = vmin.xlane.f32.xlu1 %v1845_v38 }
 0xaf0   :  { %vm1763_vm8 = vcmp.eq.s32.totalorder %v4460_v51, %v1741_v24 }
 0xaf1   :  { %v4607_v36 = vsel %vm1763_vm8, 2147483647, %v4460_v51  ;;  %vm4611_vm13 = vmor %vm4455_vm10, %vm1763_vm8  ;;  %v1754_v51 = vcvt.f32.s32 %v4530_v43 }
 0xaf2   :  { %v1871_v7 = vsel %vm492_vm2, %v4607_v36, 2147483647 }
 0xaf3   :  { %v1802_v11 = vpop.xlane.xlu1 %1801  ;;  %v1873_v3 = vshra.s32 %v1871_v7, 16  ;;  %v1755_v16 = vshll.u32 %v1754_v51, 16  ;;  %v1872_v35 = vand.u32 65535, %v1871_v7 }
 0xaf4   :  { %vm1803_vm11 = vcmp.eq.f32.partialorder %v4513_v18, %v1802_v11  ;;  %v1812_v18 = vand.u32 65535, %v4551_v34  ;;  %v1808_v49 = vcvt.f32.s32 %v1802_v11 }
 0xaf5   :  { %v1804_v9 = vsel %vm1803_vm11, %v1799_v32, inf  ;;  %v1875_v44 = vcvt.s32.f32 %v1873_v3 }
 0xaf6   :  { %1805 = vmin.xlane.f32.xlu0 %v1804_v9  ;;  %v1814_v47 = vcvt.s32.f32 %v1812_v18  ;;  %v1809_v39 = vshll.u32 %v1808_v49, 16 }
 0xaf7   :  { %1876 = vmin.xlane.f32.xlu1 %v1875_v44 }
 0xb49   :  { %v1752_v37 = vpop.xlane.xlu0 %1751 }
 0xb4a   :  { %v1753_v17 = vcvt.f32.s32 %v1752_v37  ;;  %v1787_v53 = vpop.xlane.xlu2 %1786 }
 0xb4b   :  { %vm1788_vm10 = vcmp.eq.f32.partialorder %v4534_v25, %v1787_v53  ;;  %v1793_v7 = vcvt.f32.s32 %v1787_v53 }
 0xb4c   :  { %v1756_v48 = vadd.s32 %v1755_v16, %v1753_v17  ;;  %v1789_v60 = vsel %vm1788_vm10, %v1784_v50, inf }
 0xb4d   :  { %1790 = vmin.xlane.f32.xlu2 %v1789_v60  ;;  %v1794_v32 = vshll.u32 %v1793_v7, 16 }
 0xb4e   :  { %vm1764_vm15 = vcmp.eq.s32.totalorder %v4477_v29, %v1756_v48 }
 0xb4f   :  { %v4624_v1 = vsel %vm1764_vm15, 2147483647, %v4477_v29  ;;  %vm4628_vm3 = vmor %vm4472_vm0, %vm1764_vm15  ;;  %v1857_v29 = vand.u32 65535, %v4578_v13  ;;  %v1844_v13 = vcvt.s32.f32 %v1842_v33 }
 0xb50   :  { %v1886_v43 = vsel %vm492_vm2, %v4624_v1, 2147483647 }
 0xb51   :  { %v1888_v25 = vshra.s32 %v1886_v43, 16  ;;  %v1859_v40 = vcvt.s32.f32 %v1857_v29  ;;  %v1887_v42 = vand.u32 65535, %v1886_v43 }
 0xb52   :  { %v1817_v46 = vpop.xlane.xlu0 %1816 }
 0xb53   :  { %vm1818_vm9 = vcmp.eq.f32.partialorder %v4554_v10, %v1817_v46  ;;  %v1890_v45 = vcvt.s32.f32 %v1888_v25  ;;  %v1823_v9 = vcvt.f32.s32 %v1817_v46  ;;  %v1889_v50 = vcvt.s32.f32 %v1887_v42  ;;  %v5362_v25 = vld [vmem:[#allocation8_spill] sm:$0xff] }
 0xb54   :  { %v1819_v31 = vsel %vm1818_vm9, %v1814_v47, inf  ;;  %v1919_v46 = vsub.f32 0.0, %v5362_v25 }
 0xb55   :  { %1820 = vmin.xlane.f32.xlu1 %v1819_v31  ;;  %1891 = vmin.xlane.f32.xlu2 %v1890_v45 }
 0xb5a   :  { %v4637_v34 = vpop.xlane.xlu0 %1861  ;;  %v4639_v61 = vpop.xlane.xlu2 %1831 }
 0xb5b   :  { %vm1863_vm0 = vcmp.eq.f32.partialorder %v1860_v15, %v4637_v34  ;;  %vm1833_vm14 = vcmp.eq.f32.partialorder %v4588_v8, %v4639_v61  ;;  %v1874_v8 = vcvt.s32.f32 %v1872_v35  ;;  %v1868_v18 = vcvt.f32.s32 %v4637_v34 }
 0xb5c   :  { %v1864_v10 = vsel %vm1863_vm0, %v1859_v40, inf  ;;  %v1834_v59 = vsel %vm1833_vm14, %v1829_v23, inf  ;;  %v1838_v43 = vcvt.f32.s32 %v4639_v61 }
 0xb5d   :  { %1865 = vmin.xlane.f32.xlu1 %v1864_v10  ;;  %1835 = vmin.xlane.f32.xlu0 %v1834_v59  ;;  %v1869_v34 = vshll.u32 %v1868_v18, 16  ;;  %v5365_v59 = vld [vmem:[#allocation6_spill] sm:$0xff] }
 0xb5e   :  { %v1839_v61 = vshll.u32 %v1838_v43, 16  ;;  %v1922_v33 = vsub.f32 0.0, %v5365_v59  ;;  %v5377_v43 = vld [vmem:[#allocation12_spill] sm:$0xff] }
 0xb5f   :  { %v1924_v25 = vsub.f32 0.0, %v5377_v43 }
 0xb62   :  { %v4644_v30 = vpop.xlane.xlu1 %1846 }
 0xb63   :  { %vm1848_vm8 = vcmp.eq.f32.partialorder %v1845_v38, %v4644_v30  ;;  %v1918_v38 = vsub.f32 0.0, %v5358_v58  ;;  %v1853_v10 = vcvt.f32.s32 %v4644_v30  ;;  %v2600_v58 = vld [vmem:[%s5204_s2 + $0x70] sm:$0xff] }
 0xb64   :  { %v1849_v19 = vsel %vm1848_vm8, %v1844_v13, inf }
 0xb65   :  { %1850 = vmin.xlane.f32.xlu2 %v1849_v19  ;;  %v5368_v19 = vld [vmem:[#allocation10_spill] sm:$0xff] }
 0xb66   :  { %v1920_v49 = vsub.f32 0.0, %v5368_v19 }
 0xb69   :  { %v1806_v41 = vpop.xlane.xlu0 %1805 }
 0xb6a   :  { %v1807_v15 = vcvt.f32.s32 %v1806_v41  ;;  %v4647_v26 = vpop.xlane.xlu1 %1876  ;;  %v1854_v41 = vshll.u32 %v1853_v10, 16 }
 0xb6b   :  { %vm1878_vm11 = vcmp.eq.f32.partialorder %v1875_v44, %v4647_v26  ;;  %v5359_v44 = vld [vmem:[#allocation7_spill] sm:$0xff]  ;;  %v1883_v14 = vcvt.f32.s32 %v4647_v26 }
 0xb6c   :  { %v1810_v6 = vadd.s32 %v1809_v39, %v1807_v15  ;;  %v1879_v63 = vsel %vm1878_vm11, %v1874_v8, inf  ;;  %v1917_v51 = vsub.f32 0.0, %v5359_v44 }
 0xb6d   :  { %1880 = vmin.xlane.f32.xlu0 %v1879_v63 }
 0xb6e   :  { %vm1902_vm10 = vcmp.eq.s32.totalorder %v4500_v2, %v1810_v6  ;;  %v5371_v6 = vld [vmem:[#allocation9_spill] sm:$0xff] }
 0xb6f   :  { %vm4653_vm15 = vmor %vm4504_vm7, %vm1902_vm10  ;;  %v1921_v63 = vsub.f32 0.0, %v5371_v6 }
 0xb70   :  { %v4660_v24 = vsel %vm4653_vm15, %v1918_v38, -1e+30 }
 0xb71   :  { %v1936_v55 = vsel %vm492_vm2, %v4660_v24, -inf }
 0xb75   :  { %1937 = vmax.xlane.f32.xlu0 %v1936_v55 }
 0xbc0   :  { %v1791_v11 = vpop.xlane.xlu2 %1790 }
 0xbc1   :  { %v1792_v2 = vcvt.f32.s32 %v1791_v11  ;;  %v1884_v11 = vshll.u32 %v1883_v14, 16 }
 0xbc3   :  { %v1795_v3 = vadd.s32 %v1794_v32, %v1792_v2 }
 0xbc5   :  { %vm1901_vm7 = vcmp.eq.s32.totalorder %v4518_v62, %v1795_v3  ;;  %v1824_v62 = vshll.u32 %v1823_v9, 16 }
 0xbc6   :  { %vm4668_vm9 = vmor %vm4522_vm1, %vm1901_vm7 }
 0xbc7   :  { %v4674_v37 = vsel %vm4668_vm9, %v1917_v51, -1e+30 }
 0xbc8   :  { %v1821_v16 = vpop.xlane.xlu1 %1820  ;;  %v4676_v17 = vpop.xlane.xlu2 %1891  ;;  %v1933_v53 = vsel %vm492_vm2, %v4674_v37, -inf }
 0xbc9   :  { %v1822_v48 = vcvt.f32.s32 %v1821_v16  ;;  %vm1893_vm0 = vcmp.eq.f32.partialorder %v1890_v45, %v4676_v17  ;;  %1934 = vmax.xlane.f32.xlu2 %v1933_v53  ;;  %v1898_v53 = vcvt.f32.s32 %v4676_v17 }
 0xbca   :  { %v1894_v54 = vsel %vm1893_vm0, %v1889_v50, inf }
 0xbcb   :  { %v1825_v60 = vadd.s32 %v1824_v62, %v1822_v48  ;;  %1895 = vmin.xlane.f32.xlu1 %v1894_v54  ;;  %v1899_v54 = vshll.u32 %v1898_v53, 16 }
 0xbcd   :  { %vm1903_vm1 = vcmp.eq.s32.totalorder %v4541_v57, %v1825_v60 }
 0xbce   :  { %vm4687_vm14 = vmor %vm4545_vm5, %vm1903_vm1 }
 0xbcf   :  { %v4693_v45 = vsel %vm4687_vm14, %v1919_v46, -1e+30 }
 0xbd0   :  { %v1866_v31 = vpop.xlane.xlu1 %1865  ;;  %v1836_v29 = vpop.xlane.xlu0 %1835  ;;  %v1939_v56 = vsel %vm492_vm2, %v4693_v45, -inf }
 0xbd1   :  { %v1867_v57 = vcvt.f32.s32 %v1866_v31  ;;  %v1837_v40 = vcvt.f32.s32 %v1836_v29  ;;  %1940 = vmax.xlane.f32.xlu2 %v1939_v56 }
 0xbd3   :  { %v1870_v23 = vadd.s32 %v1869_v34, %v1867_v57  ;;  %v1840_v12 = vadd.s32 %v1839_v61, %v1837_v40 }
 0xbd5   :  { %vm1906_vm5 = vcmp.eq.s32.totalorder %v4564_v4, %v1870_v23  ;;  %vm1904_vm8 = vcmp.eq.s32.totalorder %v4561_v20, %v1840_v12 }
 0xbd6   :  { %vm4703_vm11 = vmor %vm4568_vm4, %vm1906_vm5 }
 0xbd7   :  { %v4710_v35 = vsel %vm4703_vm11, %v1922_v33, -1e+30  ;;  %vm4714_vm10 = vmor %vm4582_vm6, %vm1904_vm8 }
 0xbd8   :  { %v1851_v20 = vpop.xlane.xlu2 %1850  ;;  %v1948_v28 = vsel %vm492_vm2, %v4710_v35, -inf  ;;  %v1928_v30 = vsel %vm4714_vm10, %v1920_v49, -1e+30 }
 0xbd9   :  { %v1852_v39 = vcvt.f32.s32 %v1851_v20  ;;  %1949 = vmax.xlane.f32.xlu2 %v1948_v28  ;;  %v1942_v15 = vsel %vm492_vm2, %v1928_v30, -inf }
 0xbda   :  { %1943 = vmax.xlane.f32.xlu1 %v1942_v15 }
 0xbdb   :  { %v1855_v8 = vadd.s32 %v1854_v41, %v1852_v39 }
 0xbdd   :  { %vm1905_vm4 = vcmp.eq.s32.totalorder %v4594_v21, %v1855_v8  ;;  %v5374_v21 = vld [vmem:[#allocation11_spill] sm:$0xff] }
 0xbde   :  { %vm4728_vm6 = vmor %vm4598_vm12, %vm1905_vm4  ;;  %v1923_v2 = vsub.f32 0.0, %v5374_v21 }
 0xbdf   :  { %v1929_v38 = vsel %vm4728_vm6, %v1921_v63, -1e+30 }
 0xbe0   :  { %v1881_v55 = vpop.xlane.xlu0 %1880  ;;  %v1945_v7 = vsel %vm492_vm2, %v1929_v38, -inf }
 0xbe1   :  { %v1882_v32 = vcvt.f32.s32 %v1881_v55  ;;  %1946 = vmax.xlane.f32.xlu0 %v1945_v7  ;;  %v2599_v7 = vld [vmem:[%s5204_s2 + $0x68] sm:$0xff] }
 0xbe3   :  { %v1885_v26 = vadd.s32 %v1884_v11, %v1882_v32  ;;  %v2633_v11 = vld [vmem:[%s5204_s2 + $0x178] sm:$0xff] }
 0xbe4   :  { %v2714_v32 = vpack.i.bf16 %v2599_v7, %v2633_v11  ;;  %v2604_v7 = vld [vmem:[%s5204_s2 + $0x90] sm:$0xff] }
 0xbe5   :  { %vm1907_vm7 = vcmp.eq.s32.totalorder %v4607_v36, %v1885_v26 }
 0xbe6   :  { %vm4739_vm12 = vmor %vm4611_vm13, %vm1907_vm7 }
 0xbe7   :  { %v1931_v3 = vsel %vm4739_vm12, %v1923_v2, -1e+30 }
 0xbe8   :  { %v1938_v42 = vpop.xlane.xlu0 %1937  ;;  %v1951_v9 = vsel %vm492_vm2, %v1931_v3, -inf }
 0xbe9   :  { %v1958_v44 = vsub.f32 %v4660_v24, %v1938_v42  ;;  %1952 = vmax.xlane.f32.xlu1 %v1951_v9  ;;  %v2607_v42 = vld [vmem:[%s5204_s2 + $0xa8] sm:$0xff] }
 0xbeb   :  { %v1967_v51 = vmul.f32 1.442695, %v1958_v44 }
 0xbed   :  { %2781 = vpow2.f32 %v1967_v51 }
 0xbf3   :  { %v2782_v36 = vpop.eup %2781 }
 0xbf4   :  { %v4749_v16 = vsel %vm4653_vm15, %v2782_v36, 0.0 }
 0xbf5   :  { %v1992_v52 = vsel %vm492_vm2, %v4749_v16, 0.0 }
 0xbf6   :  { %1993 = vadd.xlane.f32.xlu1 %v1992_v52 }
 0xc3c   :  { %v1935_v50 = vpop.xlane.xlu2 %1934 }
 0xc3d   :  { %v1957_v62 = vsub.f32 %v4674_v37, %v1935_v50 }
 0xc3e   :  { %v1896_v48 = vpop.xlane.xlu1 %1895 }
 0xc3f   :  { %v1965_v24 = vmul.f32 1.442695, %v1957_v62  ;;  %v1897_v60 = vcvt.f32.s32 %v1896_v48  ;;  %v2596_v48 = vld [vmem:[%s5204_s2 + $0x50] sm:$0xff] }
 0xc41   :  { %2783 = vpow2.f32 %v1965_v24  ;;  %v1900_v18 = vadd.s32 %v1899_v54, %v1897_v60  ;;  %v2630_v54 = vld [vmem:[%s5204_s2 + $0x160] sm:$0xff]  ;;  %v2608_v60 = vld [vmem:[%s5204_s2 + $0xb0] sm:$0xff] }
 0xc42   :  { %v2739_v24 = vpack.i.bf16 %v2596_v48, %v2630_v54 }
 0xc43   :  { %vm1908_vm13 = vcmp.eq.s32.totalorder %v4624_v1, %v1900_v18  ;;  %v2609_v18 = vld [vmem:[%s5204_s2 + $0xb8] sm:$0xff] }
 0xc44   :  { %v1941_v0 = vpop.xlane.xlu2 %1940  ;;  %vm4759_vm15 = vmor %vm4628_vm3, %vm1908_vm13  ;;  %vm5380_vm3 = vcmask 261120  }
 0xc45   :  { %v1959_v17 = vsub.f32 %v4693_v45, %v1941_v0  ;;  %v1932_v37 = vsel %vm4759_vm15, %v1924_v25, -1e+30  ;;  %v2704_v25 = vpack.i.bf16 %v2608_v60, %v2609_v18  ;;  %vm5382_vm0 = vmmov %vm5380_vm3 }
 0xc46   :  { %v1954_v31 = vsel %vm492_vm2, %v1932_v37, -inf  ;;  %vm5383_vm1 = vmmov %vm5382_vm0 }
 0xc47   :  { %v2784_v29 = vpop.eup %2783  ;;  %v1969_v56 = vmul.f32 1.442695, %v1959_v17  ;;  %1955 = vmax.xlane.f32.xlu0 %v1954_v31  ;;  %v2629_v31 = vld [vmem:[%s5204_s2 + $0x158] sm:$0xff]  ;;  %vm5385_vm5 = vmmov %vm5382_vm0 }
 0xc48   :  { %v4769_v1 = vsel %vm4668_vm9, %v2784_v29, 0.0  ;;  %vm5381_vm9 = vmmov %vm5380_vm3 }
 0xc49   :  { %2785 = vpow2.f32 %v1969_v56  ;;  %v1989_v27 = vsel %vm492_vm2, %v4769_v1, 0.0  ;;  %v2632_v56 = vld [vmem:[%s5204_s2 + $0x170] sm:$0xff]  ;;  %vm5386_vm8 = vmmov %vm5382_vm0 }
 0xc4a   :  { %1990 = vadd.xlane.f32.xlu2 %v1989_v27  ;;  %vm5389_vm4 = vmmov %vm5382_vm0 }
 0xc4b   :  { %vm5390_vm7 = vmmov %vm5382_vm0 }
 0xc4c   :  { %v1950_v34 = vpop.xlane.xlu2 %1949  ;;  %vm5392_vm13 = vmmov %vm5382_vm0 }
 0xc4d   :  { %v1944_v61 = vpop.xlane.xlu1 %1943  ;;  %v1962_v45 = vsub.f32 %v4710_v35, %v1950_v34 }
 0xc4e   :  { %v1960_v57 = vsub.f32 %v1928_v30, %v1944_v61 }
 0xc4f   :  { %v2786_v40 = vpop.eup %2785  ;;  %v1975_v23 = vmul.f32 1.442695, %v1962_v45 }
 0xc50   :  { %v1971_v12 = vmul.f32 1.442695, %v1960_v57  ;;  %v4776_v10 = vsel %vm4687_vm14, %v2786_v40, 0.0  ;;  %vm5384_vm14 = vmmov %vm5382_vm0 }
 0xc51   :  { %2787 = vpow2.f32 %v1975_v23  ;;  %v1995_v22 = vsel %vm492_vm2, %v4776_v10, 0.0 }
 0xc52   :  { %2789 = vpow2.f32 %v1971_v12  ;;  %1996 = vadd.xlane.f32.xlu0 %v1995_v22  ;;  %v2610_v12 = vld [vmem:[%s5204_s2 + $0xc0] sm:$0xff] }
 0xc54   :  { %v1947_v59 = vpop.xlane.xlu0 %1946 }
 0xc55   :  { %v1961_v33 = vsub.f32 %v1929_v38, %v1947_v59  ;;  %v2601_v38 = vld [vmem:[%s5204_s2 + $0x78] sm:$0xff] }
 0xc56   :  { %v2699_v55 = vpack.i.bf16 %v2600_v58, %v2601_v38  ;;  %v2597_v59 = vld [vmem:[%s5204_s2 + $0x58] sm:$0xff]  ;;  %v2602_v58 = vld [vmem:[%s5204_s2 + $0x80] sm:$0xff]  ;;  %v2603_v38 = vld [vmem:[%s5204_s2 + $0x88] sm:$0xff] }
 0xc57   :  { %v2788_v19 = vpop.eup %2787  ;;  %v1973_v49 = vmul.f32 1.442695, %v1961_v33  ;;  %v2631_v33 = vld [vmem:[%s5204_s2 + $0x168] sm:$0xff] }
 0xc58   :  { %v2790_v20 = vpop.eup %2789  ;;  %v4782_v35 = vsel %vm4703_vm11, %v2788_v19, 0.0  ;;  %v2616_v19 = vld [vmem:[%s5204_s2 + $0xf0] sm:$0xff]  ;;  %vm5387_vm11 = vmmov %vm5382_vm0 }
 0xc59   :  { %2791 = vpow2.f32 %v1973_v49  ;;  %v4786_v47 = vsel %vm4714_vm10, %v2790_v20, 0.0  ;;  %v2004_v28 = vsel %vm492_vm2, %v4782_v35, 0.0  ;;  %v2617_v49 = vld [vmem:[%s5204_s2 + $0xf8] sm:$0xff]  ;;  %v2734_v20 = vpack.i.bf16 %v2597_v59, %v2631_v33  ;;  %vm5388_vm10 = vmmov %vm5382_vm0 }
 0xc5a   :  { %v1998_v30 = vsel %vm492_vm2, %v4786_v47, 0.0  ;;  %2005 = vadd.xlane.f32.xlu0 %v2004_v28 }
 0xc5b   :  { %1999 = vadd.xlane.f32.xlu2 %v1998_v30  ;;  %v2709_v30 = vpack.i.bf16 %v2616_v19, %v2617_v49 }
 0xc5c   :  { %v1953_v41 = vpop.xlane.xlu1 %1952 }
 0xc5d   :  { %v1963_v39 = vsub.f32 %v1931_v3, %v1953_v41  ;;  %v2606_v3 = vld [vmem:[%s5204_s2 + $0xa0] sm:$0xff]  ;;  %v2612_v41 = vld [vmem:[%s5204_s2 + $0xd0] sm:$0xff] }
 0xc5e   :  { %v2724_v44 = vpack.i.bf16 %v2606_v3, %v2607_v42  ;;  %v2417_v42 = vld [vmem:[%s5205_s3 + $0x18] sm:$0xff] }
 0xc5f   :  { %v2792_v15 = vpop.eup %2791  ;;  %v1977_v8 = vmul.f32 1.442695, %v1963_v39  ;;  %v2613_v39 = vld [vmem:[%s5204_s2 + $0xd8] sm:$0xff]  ;;  %2458 = vmatpush.msrb.mxu1 %v2417_v42 }
 0xc60   :  { %v4794_v13 = vsel %vm4728_vm6, %v2792_v15, 0.0  ;;  %v2614_v15 = vld [vmem:[%s5204_s2 + $0xe0] sm:$0xff]  ;;  %vm2299_vm6 = vcmask 785408  }
 0xc61   :  { %2793 = vpow2.f32 %v1977_v8  ;;  %v2001_v4 = vsel %vm492_vm2, %v4794_v13, 0.0  ;;  %v2615_v8 = vld [vmem:[%s5204_s2 + $0xe8] sm:$0xff] }
 0xc62   :  { %2002 = vadd.xlane.f32.xlu1 %v2001_v4 }
 0xc67   :  { %v2794_v14 = vpop.eup %2793 }
 0xc68   :  { %v4800_v6 = vsel %vm4739_vm12, %v2794_v14, 0.0  ;;  %vm5391_vm12 = vmmov %vm5382_vm0 }
 0xc69   :  { %v2007_v63 = vsel %vm492_vm2, %v4800_v6, 0.0  ;;  %v1994_v9 = vpop.xlane.xlu1 %1993 }
 0xc6a   :  { %2008 = vadd.xlane.f32.xlu2 %v2007_v63  ;;  %v2729_v63 = vpack.i.bf16 %v2614_v15, %v2615_v8 }
 0xc6e   :  { %2700 = vrot.lane.b32.xlu0 %v2699_v55, %s2857_s12  ;;  %v2764_v55 = vpack.i.bf16 %v2602_v58, %v2603_v38 }
 0xc76   :  { %2715 = vrot.lane.b32.xlu0 %v2714_v32, %s2857_s12  ;;  %v2594_v32 = vld [vmem:[%s5204_s2 + $0x40] sm:$0xff] }
 0xc7e   :  { %2725 = vrot.lane.b32.xlu0 %v2724_v44, %s2858_s21  ;;  %v2415_v44 = vld [vmem:[%s5205_s3 + $0x8] sm:$0xff] }
 0xc82   :  { %2705 = vrot.lane.b32.xlu2 %v2704_v25, %s2858_s21 }
 0xc86   :  { %2740 = vrot.lane.b32.xlu0 %v2739_v24, %s2857_s12 }
 0xcba   :  { %v1956_v26 = vpop.xlane.xlu0 %1955 }
 0xcbb   :  { %v1964_v21 = vsub.f32 %v1932_v37, %v1956_v26  ;;  %v2595_v37 = vld [vmem:[%s5204_s2 + $0x48] sm:$0xff]  ;;  %v2628_v26 = vld [vmem:[%s5204_s2 + $0x150] sm:$0xff] }
 0xcbc   :  { %v2754_v29 = vpack.i.bf16 %v2595_v37, %v2629_v31  ;;  %v2625_v31 = vld [vmem:[%s5204_s2 + $0x138] sm:$0xff] }
 0xcbd   :  { %v1979_v2 = vmul.f32 1.442695, %v1964_v21  ;;  %v1991_v5 = vpop.xlane.xlu2 %1990  ;;  %v2759_v21 = vpack.i.bf16 %v2594_v32, %v2628_v26 }
 0xcbe   :  { %2795 = vrcp.f32 %v1991_v5  ;;  %2755 = vrot.lane.b32.xlu0 %v2754_v29, %s2857_s12  ;;  %v2627_v5 = vld [vmem:[%s5204_s2 + $0x148] sm:$0xff] }
 0xcbf   :  { %2797 = vpow2.f32 %v1979_v2  ;;  %v2626_v2 = vld [vmem:[%s5204_s2 + $0x140] sm:$0xff] }
 0xcc0   :  { %2799 = vrcp.f32 %v1994_v9  ;;  %v2774_v3 = vpack.i.bf16 %v2626_v2, %v2627_v5  ;;  %v2416_v9 = vld [vmem:[%s5205_s3 + $0x10] sm:$0xff] }
 0xcc1   :  { %2459 = vmatpush.msrb.mxu1 %v2416_v9 }
 0xcc3   :  { %2460 = vmatpush.msrb.mxu1 %v2415_v44 }
 0xcc4   :  { %v2796_v51 = vpop.eup %2795 }
 0xcc5   :  { %v2798_v36 = vpop.eup %2797  ;;  %v1997_v52 = vpop.xlane.xlu0 %1996  ;;  %v4826_v53 = vmul.f32 %v2796_v51, %v4769_v1  ;;  %v2414_v51 = vld [vmem:[%s5205_s3] sm:$0xff] }
 0xcc6   :  { %v4830_v50 = vsel %vm4759_vm15, %v2798_v36, 0.0  ;;  %v2800_v43 = vpop.eup %2799  ;;  %2801 = vrcp.f32 %v1997_v52  ;;  %2461 = vmatpush.msrb.mxu1 %v2414_v51  ;;  %vm5393_vm15 = vmmov %vm5382_vm0 }
 0xcc7   :  { %2586 = vmatmul.msk.f32.vlgmr.msra.gmra.mxu1 %vm492_vm2, %v4826_v53  ;;  %v2010_v62 = vsel %vm492_vm2, %v4830_v50, 0.0  ;;  %v4851_v46 = vmul.f32 %v2800_v43, %v4749_v16  ;;  %v2598_v16 = vld [vmem:[%s5204_s2 + $0x60] sm:$0xff] }
 0xcc8   :  { %2011 = vadd.xlane.f32.xlu1 %v2010_v62  ;;  %v2719_v27 = vpack.i.bf16 %v2598_v16, %v2632_v56 }
 0xcca   :  { %2720 = vrot.lane.b32.xlu2 %v2719_v27, %s2857_s12  ;;  %v2624_v27 = vld [vmem:[%s5204_s2 + $0x130] sm:$0xff] }
 0xccc   :  { %v2802_v1 = vpop.eup %2801 }
 0xccd   :  { %v2006_v0 = vpop.xlane.xlu0 %2005  ;;  %v4870_v57 = vmul.f32 %v2802_v1, %v4776_v10  ;;  %v2611_v10 = vld [vmem:[%s5204_s2 + $0xc8] sm:$0xff] }
 0xcce   :  { %2803 = vrcp.f32 %v2006_v0  ;;  %v2000_v17 = vpop.xlane.xlu2 %1999  ;;  %v2769_v22 = vpack.i.bf16 %v2610_v12, %v2611_v10  ;;  %v2623_v10 = vld [vmem:[%s5204_s2 + $0x128] sm:$0xff] }
 0xccf   :  { %2805 = vrcp.f32 %v2000_v17  ;;  %2587 = vmatmul.msk.f32.gmra.mxu1 %vm492_vm2, %v4851_v46 }
 0xcd0   :  { %2770 = vrot.lane.b32.xlu0 %v2769_v22, %s2859_s1 }
 0xcd2   :  { %2735 = vrot.lane.b32.xlu2 %v2734_v20, %s2857_s12 }
 0xcd4   :  { %v2804_v34 = vpop.eup %2803 }
 0xcd5   :  { %v2806_v61 = vpop.eup %2805  ;;  %v2003_v45 = vpop.xlane.xlu1 %2002  ;;  %v4873_v40 = vmul.f32 %v2804_v34, %v4782_v35 }
 0xcd6   :  { %2807 = vrcp.f32 %v2003_v45  ;;  %v4876_v23 = vmul.f32 %v2806_v61, %v4786_v47  ;;  %v2109_v61 = vld [vmem:[%s5204_s2 + $0x38] sm:$0xff]  ;;  %v2108_v45 = vld [vmem:[%s5204_s2 + $0x30] sm:$0xff] }
 0xcd7   :  { %2588 = vmatmul.msk.f32.gmra.mxu1 %vm492_vm2, %v4870_v57  ;;  %2591 = vmatmul.msk.f32.vlgmr.msra.gmra.mxu3 %vm492_vm2, %v4873_v40 }
 0xcd8   :  { %2589 = vmatmul.msk.f32.vlgmr.msra.gmra.mxu2 %vm492_vm2, %v4876_v23 }
 0xcdc   :  { %v2808_v35 = vpop.eup %2807 }
 0xcdd   :  { %v2009_v47 = vpop.xlane.xlu2 %2008  ;;  %v4904_v28 = vmul.f32 %v2808_v35, %v4794_v13  ;;  %v2749_v13 = vpack.i.bf16 %v2612_v41, %v2613_v39  ;;  %v2621_v41 = vld [vmem:[%s5204_s2 + $0x118] sm:$0xff] }
 0xcde   :  { %2809 = vrcp.f32 %v2009_v47  ;;  %v2622_v47 = vld [vmem:[%s5204_s2 + $0x120] sm:$0xff] }
 0xcdf   :  { %2750 = vrot.lane.b32.xlu2 %v2749_v13, %s2859_s1 }
 0xce0   :  { %2590 = vmatmul.msk.f32.gmra.mxu2 %vm492_vm2, %v4904_v28  ;;  %v2701_v36 = vpop.permute.xlu0 %2700 }
 0xce1   :  { %2710 = vrot.lane.b32.xlu1 %v2709_v30, %s2859_s1  ;;  %v2703_v16 = vunpack.i.h.bf16 %v2701_v36  ;;  %v2702_v56 = vunpack.i.l.bf16 %v2701_v36 }
 0xce3   :  { %v2290_v20 = vsel %vm5387_vm11, %v2109_v61, %v2702_v56  ;;  %v2289_v35 = vsel %vm5388_vm10, %v2108_v45, %v2703_v16  ;;  %vm5400_vm11 = vmmov %vm5382_vm0 }
 0xce4   :  { %v2810_v4 = vpop.eup %2809  ;;  %vm5401_vm10 = vmmov %vm5382_vm0 }
 0xce5   :  { %v4921_v14 = vmul.f32 %v2810_v4, %v4800_v6  ;;  %v2605_v6 = vld [vmem:[%s5204_s2 + $0x98] sm:$0xff]  ;;  %v2706_v62 = vpop.permute.xlu2 %2705 }
 0xce6   :  { %v2744_v11 = vpack.i.bf16 %v2604_v7, %v2605_v6  ;;  %v2708_v33 = vunpack.i.h.bf16 %v2706_v62  ;;  %v2707_v19 = vunpack.i.l.bf16 %v2706_v62  ;;  %v2107_v6 = vld [vmem:[%s5204_s2 + $0x28] sm:$0xff] }
 0xce7   :  { %2592 = vmatmul.msk.f32.gmra.mxu3 %vm492_vm2, %v4921_v14  ;;  %2765 = vrot.lane.b32.xlu2 %v2764_v55, %s2858_s21 }
 0xce8   :  { %v4965_v52 = vpop.permute.xlu0 %2715  ;;  %v2298_v15 = vsel %vm492_vm2, %v2290_v20, %v2707_v19  ;;  %v2297_v8 = vsel %vm492_vm2, %v2289_v35, %v2708_v33 }
 0xce9   :  { %2730 = vrot.lane.b32.xlu1 %v2729_v63, %s2859_s1  ;;  %v2717_v0 = vunpack.i.l.bf16 %v4965_v52  ;;  %v2718_v4 = vunpack.i.h.bf16 %v4965_v52 }
 0xceb   :  { %v2315_v29 = vsel %vm5382_vm0, %v2625_v31, %v2717_v0  ;;  %v2288_v5 = vsel %vm5393_vm15, %v2107_v6, %v2718_v4  ;;  %v2103_v31 = vld [vmem:[%s5204_s2 + $0x8] sm:$0xff]  ;;  %v2618_v6 = vld [vmem:[%s5204_s2 + $0x100] sm:$0xff]  ;;  %vm5406_vm15 = vmmov %vm5382_vm0 }
 0xcec   :  { %2365 = vmatpush.msrb.mxu3 %v2315_v29 }
 0xcf0   :  { %v4967_v48 = vpop.permute.xlu0 %2725 }
 0xcf1   :  { %2745 = vrot.lane.b32.xlu1 %v2744_v11, %s2858_s21  ;;  %v2106_v11 = vld [vmem:[%s5204_s2 + $0x20] sm:$0xff]  ;;  %v2727_v2 = vunpack.i.l.bf16 %v4967_v48 }
 0xcf3   :  { %v2296_v51 = vsel %vm492_vm2, %v2288_v5, %v2727_v2 }
 0xcf8   :  { %v4974_v25 = vpop.permute.xlu0 %2740 }
 0xcf9   :  { %2760 = vrot.lane.b32.xlu1 %v2759_v21, %s2857_s12  ;;  %v2742_v34 = vunpack.i.l.bf16 %v4974_v25  ;;  %v2728_v21 = vunpack.i.h.bf16 %v4967_v48 }
 0xcfb   :  { %v2312_v30 = vsel %vm5389_vm4, %v2622_v47, %v2742_v34  ;;  %vm5402_vm4 = vmmov %vm5382_vm0 }
 0xd01   :  { %2775 = vrot.lane.b32.xlu1 %v2774_v3, %s2857_s12 }
 0xd24   :  { %v4969_v24 = vpop.permute.xlu2 %2720 }
 0xd25   :  { %v2722_v17 = vunpack.i.l.bf16 %v4969_v24  ;;  %v2723_v63 = vunpack.i.h.bf16 %v4969_v24 }
 0xd27   :  { %v2314_v12 = vsel %vm5385_vm5, %v2624_v27, %v2722_v17  ;;  %v2105_v17 = vld [vmem:[%s5204_s2 + $0x18] sm:$0xff]  ;;  %vm5398_vm5 = vmmov %vm5382_vm0 }
 0xd28   :  { %2366 = vmatpush.msrb.mxu3 %v2314_v12 }
 0xd2c   :  { %v4985_v37 = vpop.permute.xlu2 %2735 }
 0xd2d   :  { %v2738_v24 = vunpack.i.h.bf16 %v4985_v37 }
 0xd30   :  { %v5011_v22 = vpop.permute.xlu0 %2755 }
 0xd31   :  { %v2757_v49 = vunpack.i.l.bf16 %v5011_v22 }
 0xd33   :  { %v2311_v13 = vsel %vm5390_vm7, %v2621_v41, %v2757_v49  ;;  %v2102_v41 = vld [vmem:[%s5204_s2] sm:$0xff]  ;;  %vm5403_vm7 = vmmov %vm5382_vm0 }
 0xd39   :  { %v2751_v7 = vpop.permute.xlu2 %2750 }
 0xd3a   :  { %v2752_v56 = vunpack.i.l.bf16 %v2751_v7 }
 0xd3b   :  { %v2012_v54 = vpop.xlane.xlu1 %2011 }
 0xd3c   :  { %2811 = vrcp.f32 %v2012_v54 }
 0xd41   :  { %v2766_v0 = vpop.permute.xlu2 %2765 }
 0xd42   :  { %v2812_v60 = vpop.eup %2811  ;;  %v2767_v29 = vunpack.i.l.bf16 %v2766_v0  ;;  %v2768_v47 = vunpack.i.h.bf16 %v2766_v0 }
 0xd43   :  { %v4972_v18 = vmul.f32 %v2812_v60, %v4830_v50  ;;  %v2737_v50 = vunpack.i.l.bf16 %v4985_v37  ;;  %v2743_v60 = vunpack.i.h.bf16 %v4974_v25  ;;  %v2753_v37 = vunpack.i.h.bf16 %v2751_v7  ;;  %v2771_v25 = vpop.permute.xlu0 %2770  ;;  %v2619_v7 = vld [vmem:[%s5204_s2 + $0x108] sm:$0xff] }
 0xd44   :  { %v2070_v43 = vpop.f32.mrf.mxu1 }
 0xd45   :  { %2094 = vst.msk [vmem:[%s5207_s5] sm:$0xff] %vm5380_vm3, %v2070_v43  ;;  %2593 = vmatmul.msk.f32.gmra.mxu3 %vm492_vm2, %v4972_v18  ;;  %2650 = vmatmul.msk.f32.vlgmr.msrb.gmra.mxu1 %vm5381_vm9, %v2070_v43  ;;  %v2313_v59 = vsel %vm5386_vm8, %v2623_v10, %v2737_v50  ;;  %vm5394_vm3 = vmmov %vm5382_vm0  ;;  %v2758_v43 = vunpack.i.h.bf16 %v5011_v22  ;;  %v2104_v50 = vld [vmem:[%s5204_s2 + $0x10] sm:$0xff]  ;;  %v2772_v10 = vunpack.i.l.bf16 %v2771_v25 }
 0xd46   :  { %2367 = vmatpush.msrb.mxu3 %v2313_v59  ;;  %v2287_v3 = vsel %vm5394_vm3, %v2106_v11, %v2723_v63  ;;  %vm5395_vm9 = vmmov %vm5382_vm0  ;;  %v2285_v34 = vsel %vm5398_vm5, %v2104_v50, %v2743_v60 }
 0xd47   :  { %v2295_v36 = vsel %vm492_vm2, %v2287_v3, %v2728_v21  ;;  %vm5399_vm8 = vmmov %vm5382_vm0 }
 0xd48   :  { %2368 = vmatpush.msrb.mxu3 %v2312_v30  ;;  %v2284_v61 = vsel %vm5399_vm8, %v2103_v31, %v2758_v43  ;;  %vm5407_vm3 = vmmov %vm5382_vm0 }
 0xd49   :  { %v2292_v33 = vsel %vm492_vm2, %v2284_v61, %v2767_v29 }
 0xd4a   :  { %2369 = vmatpush.msrb.mxu3 %v2311_v13  ;;  %v2301_v20 = vsel %vm2299_vm6, %v2292_v33, %v2772_v10  ;;  %v2773_v13 = vunpack.i.h.bf16 %v2771_v25 }
 0xd4c   :  { %v2073_v1 = vpop.f32.mrf.mxu1 }
 0xd4d   :  { %2095 = vst.msk [vmem:[%s5207_s5 + $0x8] sm:$0xff] %vm5383_vm1, %v2073_v1  ;;  %2651 = vmatmul.msk.f32.gmra.mxu1 %vm5384_vm14, %v2073_v1  ;;  %vm5396_vm1 = vmmov %vm5382_vm0 }
 0xd4e   :  { %vm5397_vm14 = vmmov %vm5382_vm0 }
 0xd4f   :  { %v2286_v27 = vsel %vm5397_vm14, %v2105_v17, %v2738_v24 }
 0xd53   :  { %v2711_v39 = vpop.permute.xlu1 %2710 }
 0xd54   :  { %v2713_v58 = vunpack.i.h.bf16 %v2711_v39  ;;  %v2712_v38 = vunpack.i.l.bf16 %v2711_v39  ;;  %v2076_v55 = vpop.f32.mrf.mxu1  ;;  %v2620_v39 = vld [vmem:[%s5204_s2 + $0x110] sm:$0xff] }
 0xd55   :  { %2096 = vst.msk [vmem:[%s5207_s5 + $0x10] sm:$0xff] %vm5391_vm12, %v2076_v55  ;;  %2652 = vmatmul.msk.f32.gmra.mxu1 %vm5392_vm13, %v2076_v55  ;;  %vm5404_vm12 = vmmov %vm5382_vm0 }
 0xd56   :  { %v2307_v32 = vsel %vm2299_vm6, %v2298_v15, %v2712_v38  ;;  %v2306_v26 = vsel %vm2299_vm6, %v2297_v8, %v2713_v58  ;;  %vm5405_vm13 = vmmov %vm5382_vm0 }
 0xd57   :  { %2324 = vmatpush.msrb.mxu2 %v2307_v32 }
 0xd59   :  { %2325 = vmatpush.msrb.mxu2 %v2306_v26 }
 0xd5a   :  { %v2085_v42 = vpop.f32.mrf.mxu3 }
 0xd5b   :  { %v2079_v9 = vpop.f32.mrf.mxu2  ;;  %2099 = vst.msk [vmem:[%s5207_s5 + $0x28] sm:$0xff] %vm5395_vm9, %v2085_v42  ;;  %v2731_v44 = vpop.permute.xlu1 %2730  ;;  %vm5409_vm9 = vmmov %vm5382_vm0 }
 0xd5c   :  { %2097 = vst.msk [vmem:[%s5207_s5 + $0x18] sm:$0xff] %vm5382_vm0, %v2079_v9  ;;  %v2733_v52 = vunpack.i.h.bf16 %v2731_v44  ;;  %v2732_v62 = vunpack.i.l.bf16 %v2731_v44 }
 0xd5d   :  { %2653 = vmatmul.msk.f32.gmra.mxu1 %vm5396_vm1, %v2079_v9  ;;  %vm2535_vm1 = vcmask 392192  }
 0xd5e   :  { %v2305_v48 = vsel %vm2299_vm6, %v2296_v51, %v2732_v62  ;;  %v2304_v54 = vsel %vm2299_vm6, %v2295_v36, %v2733_v52 }
 0xd5f   :  { %2326 = vmatpush.msrb.mxu2 %v2305_v48 }
 0xd61   :  { %2327 = vmatpush.msrb.mxu2 %v2304_v54 }
 0xd63   :  { %v2082_v16 = vpop.f32.mrf.mxu2  ;;  %v2746_v1 = vpop.permute.xlu1 %2745 }
 0xd64   :  { %2098 = vst.msk [vmem:[%s5207_s5 + $0x20] sm:$0xff] %vm5400_vm11, %v2082_v16  ;;  %v2748_v45 = vunpack.i.h.bf16 %v2746_v1  ;;  %v2747_v12 = vunpack.i.l.bf16 %v2746_v1 }
 0xd65   :  { %2654 = vmatmul.msk.f32.gmra.mxu1 %vm5401_vm10, %v2082_v16 }
 0xd66   :  { %v2294_v22 = vsel %vm492_vm2, %v2286_v27, %v2747_v12  ;;  %v2293_v59 = vsel %vm492_vm2, %v2285_v34, %v2748_v45 }
 0xd67   :  { %v2303_v19 = vsel %vm2299_vm6, %v2294_v22, %v2752_v56  ;;  %v2302_v49 = vsel %vm2299_vm6, %v2293_v59, %v2753_v37 }
 0xd68   :  { %2328 = vmatpush.msrb.mxu2 %v2303_v19 }
 0xd6a   :  { %v2088_v35 = vpop.f32.mrf.mxu3  ;;  %2329 = vmatpush.msrb.mxu2 %v2302_v49 }
 0xd6b   :  { %2100 = vst.msk [vmem:[%s5207_s5 + $0x30] sm:$0xff] %vm5402_vm4, %v2088_v35  ;;  %v2761_v30 = vpop.permute.xlu1 %2760 }
 0xd6c   :  { %v2763_v15 = vunpack.i.h.bf16 %v2761_v30  ;;  %v2762_v8 = vunpack.i.l.bf16 %v2761_v30  ;;  %2330 = vmatpush.msrb.mxu2 %v2301_v20 }
 0xd6d   :  { %2655 = vmatmul.msk.f32.gmra.mxu1 %vm5403_vm7, %v2085_v42 }
 0xd6e   :  { %v2283_v4 = vsel %vm5404_vm12, %v2102_v41, %v2763_v15  ;;  %v2310_v63 = vsel %vm5405_vm13, %v2620_v39, %v2762_v8 }
 0xd6f   :  { %v2291_v58 = vsel %vm492_vm2, %v2283_v4, %v2768_v47  ;;  %2370 = vmatpush.msrb.mxu3 %v2310_v63 }
 0xd70   :  { %v2300_v38 = vsel %vm2299_vm6, %v2291_v58, %v2773_v13  ;;  %vm5408_vm6 = vmmov %vm5382_vm0 }
 0xd71   :  { %2331 = vmatpush.msrb.mxu2 %v2300_v38 }
 0xd72   :  { %2634 = vmatmul.msk.f32.vlgmr.msrb.gmra.mxu2 %vm492_vm2, %v4826_v53 }
 0xd73   :  { %v2776_v55 = vpop.permute.xlu1 %2775 }
 0xd74   :  { %v2778_v11 = vunpack.i.h.bf16 %v2776_v55  ;;  %v2777_v32 = vunpack.i.l.bf16 %v2776_v55 }
 0xd75   :  { %2656 = vmatmul.msk.f32.gmra.mxu1 %vm5406_vm15, %v2088_v35 }
 0xd76   :  { %v2309_v26 = vsel %vm5407_vm3, %v2619_v7, %v2777_v32  ;;  %v2308_v21 = vsel %vm5408_vm6, %v2618_v6, %v2778_v11 }
 0xd77   :  { %2371 = vmatpush.msrb.mxu3 %v2309_v26 }
 0xd79   :  { %2372 = vmatpush.msrb.mxu3 %v2308_v21 }
 0xd7a   :  { %2635 = vmatmul.msk.f32.gmra.mxu2 %vm492_vm2, %v4851_v46  ;;  %2642 = vmatmul.msk.f32.vlgmr.msrb.gmra.mxu3 %vm492_vm2, %v4826_v53  ;;  %v5144_v53 = vld [vmem:[%s5206_s4] ss:$0 sm:$0xff] }
 0xd82   :  { %2636 = vmatmul.msk.f32.gmra.mxu2 %vm492_vm2, %v4870_v57  ;;  %2643 = vmatmul.msk.f32.gmra.mxu3 %vm492_vm2, %v4851_v46 }
 0xd8a   :  { %2637 = vmatmul.msk.f32.gmra.mxu2 %vm492_vm2, %v4876_v23  ;;  %2644 = vmatmul.msk.f32.gmra.mxu3 %vm492_vm2, %v4870_v57 }
 0xd92   :  { %2638 = vmatmul.msk.f32.gmra.mxu2 %vm492_vm2, %v4904_v28  ;;  %2645 = vmatmul.msk.f32.gmra.mxu3 %vm492_vm2, %v4876_v23 }
 0xd9a   :  { %2639 = vmatmul.msk.f32.gmra.mxu2 %vm492_vm2, %v4873_v40  ;;  %2646 = vmatmul.msk.f32.gmra.mxu3 %vm492_vm2, %v4904_v28 }
 0xda2   :  { %2640 = vmatmul.msk.f32.gmra.mxu2 %vm492_vm2, %v4921_v14  ;;  %2647 = vmatmul.msk.f32.gmra.mxu3 %vm492_vm2, %v4873_v40 }
 0xdaa   :  { %2641 = vmatmul.msk.f32.gmra.mxu2 %vm492_vm2, %v4972_v18  ;;  %2648 = vmatmul.msk.f32.gmra.mxu3 %vm492_vm2, %v4921_v14 }
 0xdb2   :  { %2649 = vmatmul.msk.f32.gmra.mxu3 %vm492_vm2, %v4972_v18 }
 0xdc2   :  { %v2463_v46 = vpop.f32.mrf.mxu1 }
 0xdc3   :  { %v2464_v57 = vadd.f32 %v5144_v53, %v2463_v46 }
 0xdc5   :  { %v2495_v23 = vmin.f32 %v2464_v57, 0.0  ;;  %vm2487_vm14 = vcmp.gt.f32.partialorder %v2464_v57, 0.0 }
 0xdc7   :  { %v2503_v28 = vmul.f32 1.442695, %v2495_v23 }
 0xdc8   :  { %v2091_v40 = vpop.f32.mrf.mxu3 }
 0xdc9   :  { %2813 = vpow2.f32 %v2503_v28  ;;  %2101 = vst.msk [vmem:[%s5207_s5 + $0x38] sm:$0xff] %vm5409_vm9, %v2091_v40  ;;  %2657 = vmatmul.msk.f32.gmra.mxu1 %vm5382_vm0, %v2091_v40 }
 0xdca   :  { %v2466_v14 = vpop.f32.mrf.mxu1 }
 0xdcb   :  { %v2467_v18 = vadd.f32 %v5144_v53, %v2466_v14 }
 0xdcd   :  { %v2496_v2 = vmin.f32 %v2467_v18, 0.0  ;;  %vm2488_vm5 = vcmp.gt.f32.partialorder %v2467_v18, 0.0 }
 0xdcf   :  { %v2814_v5 = vpop.eup %2813  ;;  %v2505_v3 = vmul.f32 1.442695, %v2496_v2 }
 0xdd0   :  { %v2658_v42 = vadd.f32 -1.0, %v2814_v5 }
 0xdd1   :  { %2815 = vpow2.f32 %v2505_v3 }
 0xdd2   :  { %v2527_v9 = vsel %vm2487_vm14, %v2464_v57, %v2658_v42  ;;  %v2469_v44 = vpop.f32.mrf.mxu1 }
 0xdd3   :  { %2536 = vst.msk [vmem:[%s5208_s6] sm:$0xff] %vm2535_vm1, %v2527_v9  ;;  %v2470_v51 = vadd.f32 %v5144_v53, %v2469_v44 }
 0xdd5   :  { %v2497_v36 = vmin.f32 %v2470_v51, 0.0  ;;  %vm2489_vm8 = vcmp.gt.f32.partialorder %v2470_v51, 0.0 }
 0xdd7   :  { %v2816_v52 = vpop.eup %2815  ;;  %v2507_v62 = vmul.f32 1.442695, %v2497_v36 }
 0xdd8   :  { %v2659_v48 = vadd.f32 -1.0, %v2816_v52 }
 0xdd9   :  { %2817 = vpow2.f32 %v2507_v62 }
 0xdda   :  { %v2528_v54 = vsel %vm2488_vm5, %v2467_v18, %v2659_v48  ;;  %v2472_v24 = vpop.f32.mrf.mxu1 }
 0xddb   :  { %2537 = vst.msk [vmem:[%s5208_s6 + $0x8] sm:$0xff] %vm2535_vm1, %v2528_v54  ;;  %v2473_v60 = vadd.f32 %v5144_v53, %v2472_v24 }
 0xddd   :  { %v2498_v43 = vmin.f32 %v2473_v60, 0.0  ;;  %vm2490_vm11 = vcmp.gt.f32.partialorder %v2473_v60, 0.0 }
 0xddf   :  { %v2818_v0 = vpop.eup %2817  ;;  %v2509_v17 = vmul.f32 1.442695, %v2498_v43 }
 0xde0   :  { %v2660_v50 = vadd.f32 -1.0, %v2818_v0 }
 0xde1   :  { %2819 = vpow2.f32 %v2509_v17 }
 0xde2   :  { %v2529_v31 = vsel %vm2489_vm8, %v2470_v51, %v2660_v50  ;;  %v2475_v37 = vpop.f32.mrf.mxu1 }
 0xde3   :  { %2538 = vst.msk [vmem:[%s5208_s6 + $0x10] sm:$0xff] %vm2535_vm1, %v2529_v31  ;;  %v2476_v29 = vadd.f32 %v5144_v53, %v2475_v37 }
 0xde5   :  { %v2499_v25 = vmin.f32 %v2476_v29, 0.0  ;;  %vm2491_vm10 = vcmp.gt.f32.partialorder %v2476_v29, 0.0 }
 0xde7   :  { %v2820_v16 = vpop.eup %2819  ;;  %v2511_v56 = vmul.f32 1.442695, %v2499_v25 }
 0xde8   :  { %v2661_v1 = vadd.f32 -1.0, %v2820_v16 }
 0xde9   :  { %2821 = vpow2.f32 %v2511_v56 }
 0xdea   :  { %v2530_v27 = vsel %vm2490_vm11, %v2473_v60, %v2661_v1  ;;  %v2478_v34 = vpop.f32.mrf.mxu1 }
 0xdeb   :  { %2539 = vst.msk [vmem:[%s5208_s6 + $0x18] sm:$0xff] %vm2535_vm1, %v2530_v27  ;;  %v2479_v61 = vadd.f32 %v5144_v53, %v2478_v34 }
 0xded   :  { %v2500_v45 = vmin.f32 %v2479_v61, 0.0  ;;  %vm2492_vm4 = vcmp.gt.f32.partialorder %v2479_v61, 0.0 }
 0xdef   :  { %v2822_v12 = vpop.eup %2821  ;;  %v2513_v10 = vmul.f32 1.442695, %v2500_v45 }
 0xdf0   :  { %v2662_v22 = vadd.f32 -1.0, %v2822_v12 }
 0xdf1   :  { %2823 = vpow2.f32 %v2513_v10 }
 0xdf2   :  { %v2531_v59 = vsel %vm2491_vm10, %v2476_v29, %v2662_v22  ;;  %v2481_v33 = vpop.f32.mrf.mxu1 }
 0xdf3   :  { %2540 = vst.msk [vmem:[%s5208_s6 + $0x20] sm:$0xff] %vm2535_vm1, %v2531_v59  ;;  %v2482_v19 = vadd.f32 %v5144_v53, %v2481_v33 }
 0xdf5   :  { %v2501_v49 = vmin.f32 %v2482_v19, 0.0  ;;  %v2333_v20 = vpop.f32.mrf.mxu2  ;;  %vm2493_vm7 = vcmp.gt.f32.partialorder %v2482_v19, 0.0 }
 0xdf6   :  { %2398 = vst [vmem:[#allocation2] sm:$0xff] %v2333_v20 }
 0xdf7   :  { %v2824_v35 = vpop.eup %2823  ;;  %v2515_v47 = vmul.f32 1.442695, %v2501_v49 }
 0xdf8   :  { %v2663_v30 = vadd.f32 -1.0, %v2824_v35 }
 0xdf9   :  { %2825 = vpow2.f32 %v2515_v47 }
 0xdfa   :  { %v2532_v41 = vsel %vm2492_vm4, %v2479_v61, %v2663_v30 }
 0xdfb   :  { %2541 = vst.msk [vmem:[%s5208_s6 + $0x28] sm:$0xff] %vm2535_vm1, %v2532_v41 }
 0xdfd   :  { %v2336_v39 = vpop.f32.mrf.mxu2  ;;  %v2374_v15 = vpop.f32.mrf.mxu3 }
 0xdfe   :  { %2400 = vst [vmem:[#allocation2 + $0x10] sm:$0xff] %v2336_v39 }
 0xdff   :  { %v2826_v8 = vpop.eup %2825  ;;  %2399 = vst.msk [vmem:[#allocation2 + $0x8] sm:$0xff] %vm492_vm2, %v2374_v15 }
 0xe00   :  { %v2664_v13 = vadd.f32 -1.0, %v2826_v8 }
 0xe02   :  { %v2533_v4 = vsel %vm2493_vm7, %v2482_v19, %v2664_v13 }
 0xe03   :  { %2542 = vst.msk [vmem:[%s5208_s6 + $0x30] sm:$0xff] %vm2535_vm1, %v2533_v4 }
 0xe05   :  { %v2339_v63 = vpop.f32.mrf.mxu2  ;;  %v2377_v58 = vpop.f32.mrf.mxu3 }
 0xe06   :  { %2402 = vst [vmem:[#allocation2 + $0x20] sm:$0xff] %v2339_v63 }
 0xe07   :  { %2401 = vst.msk [vmem:[#allocation2 + $0x18] sm:$0xff] %vm492_vm2, %v2377_v58 }
 0xe0d   :  { %v2342_v38 = vpop.f32.mrf.mxu2  ;;  %v2380_v55 = vpop.f32.mrf.mxu3 }
 0xe0e   :  { %2404 = vst [vmem:[#allocation2 + $0x30] sm:$0xff] %v2342_v38 }
 0xe0f   :  { %2403 = vst.msk [vmem:[#allocation2 + $0x28] sm:$0xff] %vm492_vm2, %v2380_v55 }
 0xe15   :  { %v2345_v7 = vpop.f32.mrf.mxu2  ;;  %v2383_v6 = vpop.f32.mrf.mxu3 }
 0xe16   :  { %2406 = vst [vmem:[#allocation2 + $0x40] sm:$0xff] %v2345_v7 }
 0xe17   :  { %2405 = vst.msk [vmem:[#allocation2 + $0x38] sm:$0xff] %vm492_vm2, %v2383_v6 }
 0xe1d   :  { %v2348_v11 = vpop.f32.mrf.mxu2  ;;  %v2386_v32 = vpop.f32.mrf.mxu3 }
 0xe1e   :  { %2408 = vst [vmem:[#allocation2 + $0x50] sm:$0xff] %v2348_v11 }
 0xe1f   :  { %2407 = vst.msk [vmem:[#allocation2 + $0x48] sm:$0xff] %vm492_vm2, %v2386_v32 }
 0xe25   :  { %v2351_v26 = vpop.f32.mrf.mxu2  ;;  %v2389_v21 = vpop.f32.mrf.mxu3 }
 0xe26   :  { %2410 = vst [vmem:[#allocation2 + $0x60] sm:$0xff] %v2351_v26 }
 0xe27   :  { %2409 = vst.msk [vmem:[#allocation2 + $0x58] sm:$0xff] %vm492_vm2, %v2389_v21 }
 0xe2d   :  { %v2354_v46 = vpop.f32.mrf.mxu2  ;;  %v2392_v57 = vpop.f32.mrf.mxu3 }
 0xe2e   :  { %2412 = vst [vmem:[#allocation2 + $0x70] sm:$0xff] %v2354_v46 }
 0xe2f   :  { %2411 = vst.msk [vmem:[#allocation2 + $0x68] sm:$0xff] %vm492_vm2, %v2392_v57 }
 0xe35   :  { %v2395_v23 = vpop.f32.mrf.mxu3 }
 0xe36   :  { %2413 = vst.msk [vmem:[#allocation2 + $0x78] sm:$0xff] %vm492_vm2, %v2395_v23 }
 0xe37   :  { %2560 = dma.vmem_to_hbm [thread:$0]  %s2553_s20, 2048, %s2555_s24, [#allocation3], %s2861_s25, %s2861_s25, %s2862_s26  }
 0xe46   :  { %v2484_v28 = vpop.f32.mrf.mxu1 }
 0xe47   :  { %v2485_v40 = vadd.f32 %v5144_v53, %v2484_v28 }
 0xe49   :  { %v2502_v14 = vmin.f32 %v2485_v40, 0.0  ;;  %vm2494_vm12 = vcmp.gt.f32.partialorder %v2485_v40, 0.0 }
 0xe4b   :  { %v2517_v18 = vmul.f32 1.442695, %v2502_v14 }
 0xe4d   :  { %2827 = vpow2.f32 %v2517_v18 }
 0xe53   :  { %v2828_v2 = vpop.eup %2827 }
 0xe54   :  { %v2665_v5 = vadd.f32 -1.0, %v2828_v2 }
 0xe56   :  { %v2534_v3 = vsel %vm2494_vm12, %v2485_v40, %v2665_v5 }
 0xe57   :  { %2543 = vst.msk [vmem:[%s5208_s6 + $0x38] sm:$0xff] %vm2535_vm1, %v2534_v3 }
 0xe58   :  { %2853 = dma.done.wait [#allocation3], 2048  }
 0xe59   :  { %2854 = vsyncadd [#allocation3], 4294965248 }
 0xe5a   :  { %2569 = vsyncpa [#allocation3], 1 }

</bundles_post_ra>
